<compile_context>
chip_gen: v6e
topology: v6e:2x2x1
jax: 0.10.0
libtpu: 0.0.40
codegen_flags: <defaults>
</compile_context>

<pallas_src>
import math
from functools import partial

import jax
import jax.numpy as jnp
from jax.experimental import pallas as pl
from jax.experimental.pallas import tpu as pltpu

# ----------------------------- synthetic config ------------------------------
HIDDEN = 64
INTERMEDIATE = 128
NUM_LAYERS = 2
NUM_HEADS = 4
HEAD_DIM = HIDDEN // NUM_HEADS
ATOM_VOCAB = 16
BOND_VOCAB = 4
PAD_ID = 0
POS_FEAT = 8              # position_feature_size
NUM_FINGERPRINTS = 4
NUM_PROPERTIES = 3
RMS_EPS = 1e-6
LN_EPS = 1e-5
NEG_BIAS = -1e9           # finite mask bias (avoids -inf saturation / NaN rows)

BATCH = 2
SEQ = 8


# ------------------------------- Pallas kernel --------------------------------
def fused_encoder_kernel(h_ref, mask_ref,
                         wqkv_ref, wo_ref, wgu_ref, wd_ref,
                         ln1_ref, ln2_ref, norm_f_ref,
                         out_ref, *, num_layers, num_heads, head_dim,
                         hidden, intermediate, rms_eps, batch, seq_pad):
    """Both encoder layers + final RMSNorm over the whole (row-stacked) batch."""
    x = h_ref[...].astype(jnp.float32)                  # (B*Tp, H)

    for l in range(num_layers):                         # static unroll; weights resident
        # --- input RMSNorm ---
        var = jnp.mean(x * x, axis=-1, keepdims=True)
        xn = x * jax.lax.rsqrt(var + rms_eps) * ln1_ref[l]

        # --- fused QKV projection over all batch rows (M = B*Tp) ---
        qkv = jnp.dot(xn.astype(jnp.bfloat16), wqkv_ref[l],
                      preferred_element_type=jnp.float32)          # (B*Tp, 3H)

        # --- attention: static per-batch / per-head loops, contexts gathered
        #     into one (B*Tp, H) buffer so Wo runs as a single matmul ---
        ctx_rows = []
        for b in range(batch):
            base = b * seq_pad
            qkv_b = qkv[base:base + seq_pad]                       # (Tp, 3H)
            bias_b = mask_ref[b]                                   # (1, Tp)
            head_ctx = []
            for h in range(num_heads):
                s = h * head_dim
                qh = qkv_b[:, s:s + head_dim].astype(jnp.bfloat16)
                kh = qkv_b[:, hidden + s:hidden + s + head_dim].astype(jnp.bfloat16)
                vh = qkv_b[:, 2 * hidden + s:2 * hidden + s + head_dim].astype(jnp.bfloat16)
                # 1/sqrt(head_dim) is pre-folded into the Q weights.
                scores = jax.lax.dot_general(
                    qh, kh, (((1,), (1,)), ((), ())),
                    preferred_element_type=jnp.float32) + bias_b   # (Tp, Tp)
                m = jnp.max(scores, axis=-1, keepdims=True)
                p = jnp.exp(scores - m)
                probs = p * pl.reciprocal(jnp.sum(p, axis=-1, keepdims=True),
                                          approx=True)
                head_ctx.append(jnp.dot(probs.astype(jnp.bfloat16), vh,
                                        preferred_element_type=jnp.float32))
            ctx_rows.append(jnp.concatenate(head_ctx, axis=-1))    # (Tp, H)
        ctx = jnp.concatenate(ctx_rows, axis=0)                    # (B*Tp, H)

        # --- single output projection (K = H, one MXU push) ---
        attn = jnp.dot(ctx.astype(jnp.bfloat16), wo_ref[l],
                       preferred_element_type=jnp.float32)         # (B*Tp, H)
        h1 = x + attn

        # --- post-attention RMSNorm + SwiGLU MLP (fused gate/up) ---
        var2 = jnp.mean(h1 * h1, axis=-1, keepdims=True)
        hn = h1 * jax.lax.rsqrt(var2 + rms_eps) * ln2_ref[l]
        gu = jnp.dot(hn.astype(jnp.bfloat16), wgu_ref[l],
                     preferred_element_type=jnp.float32)           # (B*Tp, 2I)
        g = gu[:, :intermediate]
        u = gu[:, intermediate:]
        mlp = jnp.dot((jax.nn.silu(g) * u).astype(jnp.bfloat16), wd_ref[l],
                      preferred_element_type=jnp.float32)
        x = h1 + mlp

    # --- final encoder RMSNorm (fused into the same kernel) ---
    var = jnp.mean(x * x, axis=-1, keepdims=True)
    out_ref[...] = (x * jax.lax.rsqrt(var + rms_eps) * norm_f_ref[...]).astype(out_ref.dtype)


# ------------------------------ kernel wrapper ---------------------------------
def run_fused_encoder(hidden_padded, mask_bias_b1t, params):
    """hidden_padded: (B, T_pad, H) f32; mask_bias_b1t: (B, 1, T_pad) f32 additive bias."""
    B, Tp, H = hidden_padded.shape
    L = NUM_LAYERS
    I = INTERMEDIATE
    hidden_flat = hidden_padded.reshape(B * Tp, H)        # row-stack in the wrapper (free)
    kern = partial(fused_encoder_kernel, num_layers=L, num_heads=NUM_HEADS,
                   head_dim=HEAD_DIM, hidden=H, intermediate=I, rms_eps=RMS_EPS,
                   batch=B, seq_pad=Tp)
    out_flat = pl.pallas_call(
        kern,
        out_shape=jax.ShapeDtypeStruct((B * Tp, H), hidden_padded.dtype),
        grid=(1,),                                        # single grid step: whole batch
        in_specs=[
            pl.BlockSpec((B * Tp, H), lambda i: (0, 0)),          # row-stacked hidden
            pl.BlockSpec((B, 1, Tp), lambda i: (0, 0, 0)),        # (B,1,Tp) mask bias
            pl.BlockSpec((L, H, 3 * H), lambda i: (0, 0, 0)),     # fused QKV weights
            pl.BlockSpec((L, H, H), lambda i: (0, 0, 0)),         # Wo
            pl.BlockSpec((L, H, 2 * I), lambda i: (0, 0, 0)),     # fused gate/up
            pl.BlockSpec((L, I, H), lambda i: (0, 0, 0)),         # Wdown
            pl.BlockSpec((L, 1, H), lambda i: (0, 0, 0)),         # input RMSNorm w
            pl.BlockSpec((L, 1, H), lambda i: (0, 0, 0)),         # post-attn RMSNorm w
            pl.BlockSpec((1, H), lambda i: (0, 0)),               # final RMSNorm w
        ],
        out_specs=pl.BlockSpec((B * Tp, H), lambda i: (0, 0)),
        compiler_params=pltpu.CompilerParams(dimension_semantics=("arbitrary",)),
    )(hidden_flat, mask_bias_b1t, params['wqkv'], params['wo'], params['wgu'],
      params['wd'], params['ln1'], params['ln2'], params['encoder_norm_w'])
    return out_flat.reshape(B, Tp, H)


# ------------------------------- JAX glue ops ----------------------------------
def layer_norm(x, gamma, beta, eps=LN_EPS):
    m = jnp.mean(x, axis=-1, keepdims=True)
    v = jnp.mean(jnp.square(x - m), axis=-1, keepdims=True)
    return (x - m) * jax.lax.rsqrt(v + eps) * gamma + beta


def stable_embed(ids, table, gamma, beta):
    # StableEmbedding = Embedding gather + LayerNorm
    return layer_norm(table[ids], gamma, beta)


def condition_embed(values, selected_weight, gamma, beta):
    # ConditionStableEmbedding: einsum('bn,ne->bne', values, W) then LayerNorm.
    # Tiny (B,P,H) op — cheaper as XLA-fused glue than as a dedicated pallas_call.
    features = values[:, :, None] * selected_weight[None, :, :]
    return layer_norm(features, gamma, beta)


# ------------------------------ parameter init ---------------------------------
def init_params(key):
    keys = iter(jax.random.split(key, 128))

    def nrm(shape, scale=0.02):
        return jax.random.normal(next(keys), shape, jnp.float32) * scale

    p = {}
    tok_vocab = 2 + ATOM_VOCAB + BOND_VOCAB

    def ln_params():
        return jnp.ones((HIDDEN,), jnp.float32), jnp.zeros((HIDDEN,), jnp.float32)

    p['embed_tokens_w'] = nrm((tok_vocab, HIDDEN)).at[PAD_ID].set(0.0)
    p['embed_tokens_g'], p['embed_tokens_b'] = ln_params()
    p['embed_identifier_w'] = nrm((2, HIDDEN))
    p['embed_identifier_g'], p['embed_identifier_b'] = ln_params()
    p['embed_fingerprint_w'] = nrm((1, HIDDEN))
    p['embed_fingerprint_g'], p['embed_fingerprint_b'] = ln_params()
    p['embed_fp_pos_w'] = nrm((NUM_FINGERPRINTS, HIDDEN))
    p['embed_fp_pos_g'], p['embed_fp_pos_b'] = ln_params()
    p['embed_property_w'] = nrm((NUM_PROPERTIES, HIDDEN))
    p['embed_property_g'], p['embed_property_b'] = ln_params()
    p['embed_prop_pos_w'] = nrm((NUM_PROPERTIES, HIDDEN))
    p['embed_prop_pos_g'], p['embed_prop_pos_b'] = ln_params()

    # GraphPositionStableEmbedding (reconstructed): orthonormal node features,
    # gathered per bond endpoint, concatenated, linearly projected, LayerNorm'ed.
    # TODO(synk): exact use_random_id / adaptive_position_length id-shuffling of the
    # original GraphPositionStableEmbedding is not reproduced (deterministic id map used).
    p['ortho'] = jnp.linalg.qr(
        jax.random.normal(next(keys), (POS_FEAT, POS_FEAT), jnp.float32))[0]
    p['graph_pos_proj'] = nrm((2 * POS_FEAT, HIDDEN))
    p['graph_pos_g'], p['graph_pos_b'] = ln_params()

    # ---- encoder layer weights: stacked, fused, bf16, with the attention scale
    # folded into Wq at prep time ----
    scale = 1.0 / math.sqrt(HEAD_DIM)
    qkv_list, wo_list, gu_list, wd_list, ln1_list, ln2_list = [], [], [], [], [], []
    for _ in range(NUM_LAYERS):
        wq = nrm((HIDDEN, HIDDEN)) * scale       # fold 1/sqrt(head_dim) into Q proj
        wk = nrm((HIDDEN, HIDDEN))
        wv = nrm((HIDDEN, HIDDEN))
        wo = nrm((HIDDEN, HIDDEN))
        wg = nrm((HIDDEN, INTERMEDIATE))
        wu = nrm((HIDDEN, INTERMEDIATE))
        wd = nrm((INTERMEDIATE, HIDDEN))
        qkv_list.append(jnp.concatenate([wq, wk, wv], axis=1))   # (H, 3H)
        gu_list.append(jnp.concatenate([wg, wu], axis=1))        # (H, 2I)
        wo_list.append(wo)
        wd_list.append(wd)
        ln1_list.append(jnp.ones((1, HIDDEN), jnp.float32))
        ln2_list.append(jnp.ones((1, HIDDEN), jnp.float32))

    p['wqkv'] = jnp.stack(qkv_list).astype(jnp.bfloat16)   # (L, H, 3H)
    p['wo'] = jnp.stack(wo_list).astype(jnp.bfloat16)      # (L, H, H)
    p['wgu'] = jnp.stack(gu_list).astype(jnp.bfloat16)     # (L, H, 2I)
    p['wd'] = jnp.stack(wd_list).astype(jnp.bfloat16)      # (L, I, H)
    p['ln1'] = jnp.stack(ln1_list)                          # (L, 1, H) f32
    p['ln2'] = jnp.stack(ln2_list)                          # (L, 1, H) f32
    p['encoder_norm_w'] = jnp.ones((1, HIDDEN), jnp.float32)
    return p


# -------------------------------- forward pass ----------------------------------
def graphsgpt_encoder_conditioned_forward(params, input_ids,
                                          graph_position_ids_1, graph_position_ids_2,
                                          identifier_ids,
                                          values_qed, values_sa, values_logp,
                                          num_fingerprint_tokens=None,
                                          attention_mask=None):
    B, N = identifier_ids.shape

    # concat_properties
    values_properties = jnp.concatenate([values_qed, values_sa, values_logp], axis=1)
    indices_properties = jnp.array([0, 1, 2], dtype=jnp.int32)
    P = values_properties.shape[1]
    nfp = NUM_FINGERPRINTS if num_fingerprint_tokens is None else num_fingerprint_tokens

    # fingerprint tokens
    fp_embeds = stable_embed(jnp.zeros((B, nfp), jnp.int32),
                             params['embed_fingerprint_w'],
                             params['embed_fingerprint_g'], params['embed_fingerprint_b'])
    fp_pos_embeds = stable_embed(jnp.broadcast_to(jnp.arange(nfp), (B, nfp)),
                                 params['embed_fp_pos_w'],
                                 params['embed_fp_pos_g'], params['embed_fp_pos_b'])

    # property tokens (ConditionStableEmbedding: plain JAX — XLA fuses it for free)
    selected_prop_w = params['embed_property_w'][indices_properties]
    property_embeds = condition_embed(values_properties, selected_prop_w,
                                      params['embed_property_g'],
                                      params['embed_property_b'])
    property_pos_embeds = stable_embed(indices_properties, params['embed_prop_pos_w'],
                                       params['embed_prop_pos_g'], params['embed_prop_pos_b'])

    # molecule tokens
    inputs_embeds = stable_embed(input_ids, params['embed_tokens_w'],
                                 params['embed_tokens_g'], params['embed_tokens_b'])
    ortho = params['ortho']
    orthonormal_features = ortho
    graph_position_features = jnp.concatenate(
        [ortho[graph_position_ids_1], ortho[graph_position_ids_2]], axis=-1)  # (B,N,2F)
    graph_position_embeds = layer_norm(
        jnp.einsum('bnf,fe->bne', graph_position_features, params['graph_pos_proj']),
        params['graph_pos_g'], params['graph_pos_b'])
    identifier_embeds = stable_embed(identifier_ids.astype(jnp.int32),
                                     params['embed_identifier_w'],
                                     params['embed_identifier_g'],
                                     params['embed_identifier_b'])

    fingerprint_tokens = fp_embeds + fp_pos_embeds
    property_tokens = property_embeds + property_pos_embeds[None]
    molecule_tokens = inputs_embeds + graph_position_embeds + identifier_embeds
    hidden = jnp.concatenate([fingerprint_tokens, property_tokens, molecule_tokens], axis=1)
    T = nfp + P + N

    # attention mask (padding mask) -> (B, T) additive bias with a large FINITE
    # negative constant (avoids -inf saturation); broadcast to (T,T) in-kernel.
    if attention_mask is None:
        attention_mask = jnp.ones((B, T), dtype=bool)
    else:
        extra = T - attention_mask.shape[1]
        if extra > 0:
            attention_mask = jnp.concatenate(
                [jnp.ones((B, extra), dtype=bool), attention_mask], axis=1)
    mask_bias = jnp.where(attention_mask, 0.0, NEG_BIAS).astype(jnp.float32)   # (B, T)
    # expanded mask is returned for API parity only (tiny; computed lazily by XLA)
    expanded_mask = jnp.broadcast_to(mask_bias[:, None, None, :], (B, 1, T, T))

    # --- pad token axis to a multiple of 16 (exact sublane packing) and run the
    #     fused encoder: all layers + final RMSNorm in ONE single-step Pallas call ---
    T_pad = ((T + 15) // 16) * 16
    pad = T_pad - T
    hidden_p = jnp.pad(hidden, ((0, 0), (0, pad), (0, 0))) if pad > 0 else hidden
    mask_bias_p = (jnp.pad(mask_bias, ((0, 0), (0, pad)), constant_values=NEG_BIAS)
                   if pad > 0 else mask_bias)
    mask_bias_b1t = mask_bias_p.reshape(B, 1, T_pad)

    hidden_out = run_fused_encoder(hidden_p, mask_bias_b1t, params)[:, :T, :]

    fingerprint_tokens_out = hidden_out[:, :nfp, :]
    return {
        'fingerprint_tokens': fingerprint_tokens_out,
        'values_properties': values_properties,
        'indices_properties': indices_properties,
        'inputs_embeds': inputs_embeds,
        'identifier_embeds': identifier_embeds,
        'graph_position_embeds': graph_position_embeds,
        'graph_position_features': graph_position_features,
        'orthonormal_features': orthonormal_features,
        'graph_embedding_ids': None,  # TODO(synk): random node-id assignment not reproduced
        'attention_mask': expanded_mask,
    }


# ------------------------------------ main --------------------------------------
if __name__ == "__main__":
    key = jax.random.PRNGKey(0)
    k_par, k_tok, k_gp1, k_gp2, k_idn, k_q, k_s, k_l = jax.random.split(key, 8)

    params = init_params(k_par)

    tok_vocab = 2 + ATOM_VOCAB + BOND_VOCAB
    input_ids = jax.random.randint(k_tok, (BATCH, SEQ), 1, tok_vocab, dtype=jnp.int32)
    graph_position_ids_1 = jax.random.randint(k_gp1, (BATCH, SEQ), 0, POS_FEAT, dtype=jnp.int32)
    graph_position_ids_2 = jax.random.randint(k_gp2, (BATCH, SEQ), 0, POS_FEAT, dtype=jnp.int32)
    identifier_ids = jax.random.bernoulli(k_idn, 0.5, (BATCH, SEQ))
    values_qed = jax.random.uniform(k_q, (BATCH, 1), jnp.float32)
    values_sa = jax.random.uniform(k_s, (BATCH, 1), jnp.float32)
    values_logp = jax.random.uniform(k_l, (BATCH, 1), jnp.float32)

    out = graphsgpt_encoder_conditioned_forward(
        params, input_ids, graph_position_ids_1, graph_position_ids_2,
        identifier_ids, values_qed, values_sa, values_logp)

    jax.block_until_ready(out['fingerprint_tokens'])
    assert out['fingerprint_tokens'].shape == (BATCH, NUM_FINGERPRINTS, HIDDEN)
    assert bool(jnp.all(jnp.isfinite(out['fingerprint_tokens'])))
    print("KERNEL_OK")
</pallas_src>

<mosaic_0001>
module attributes {stable_mosaic.version = 11 : i64} {
  func.func @fused_encoder_kernel(%arg0: i32, %arg1: memref<32x64xf32, #tpu.memory_space<vmem>>, %arg2: memref<2x1x16xf32, #tpu.memory_space<vmem>>, %arg3: memref<2x64x192xbf16, #tpu.memory_space<vmem>>, %arg4: memref<2x64x64xbf16, #tpu.memory_space<vmem>>, %arg5: memref<2x64x256xbf16, #tpu.memory_space<vmem>>, %arg6: memref<2x128x64xbf16, #tpu.memory_space<vmem>>, %arg7: memref<2x1x64xf32, #tpu.memory_space<vmem>>, %arg8: memref<2x1x64xf32, #tpu.memory_space<vmem>>, %arg9: memref<1x64xf32, #tpu.memory_space<vmem>>, %arg10: memref<32x64xf32, #tpu.memory_space<vmem>>) attributes {dimension_semantics = [#tpu.dimension_semantics<arbitrary>], iteration_bounds = array<i64: 1>, scalar_prefetch = 0 : i64, scratch_operands = 0 : i64, tpu.core_type = #tpu.core_type<tc>, window_params = [{pipeline_mode = #tpu.pipeline_mode<synchronous>, transform_indices = @transform_0, window_bounds = array<i64: 32, 64>}, {pipeline_mode = #tpu.pipeline_mode<synchronous>, transform_indices = @transform_1, window_bounds = array<i64: 2, 1, 16>}, {pipeline_mode = #tpu.pipeline_mode<synchronous>, transform_indices = @transform_2, window_bounds = array<i64: 2, 64, 192>}, {pipeline_mode = #tpu.pipeline_mode<synchronous>, transform_indices = @transform_3, window_bounds = array<i64: 2, 64, 64>}, {pipeline_mode = #tpu.pipeline_mode<synchronous>, transform_indices = @transform_4, window_bounds = array<i64: 2, 64, 256>}, {pipeline_mode = #tpu.pipeline_mode<synchronous>, transform_indices = @transform_5, window_bounds = array<i64: 2, 128, 64>}, {pipeline_mode = #tpu.pipeline_mode<synchronous>, transform_indices = @transform_6, window_bounds = array<i64: 2, 1, 64>}, {pipeline_mode = #tpu.pipeline_mode<synchronous>, transform_indices = @transform_7, window_bounds = array<i64: 2, 1, 64>}, {pipeline_mode = #tpu.pipeline_mode<synchronous>, transform_indices = @transform_8, window_bounds = array<i64: 1, 64>}, {pipeline_mode = #tpu.pipeline_mode<synchronous>, transform_indices = @transform_9, window_bounds = array<i64: 32, 64>}]} {
    %c0 = arith.constant 0 : index
    %c0_0 = arith.constant 0 : index
    %0 = vector.load %arg1[%c0, %c0_0] : memref<32x64xf32, #tpu.memory_space<vmem>>, vector<32x64xf32>
    %1 = arith.mulf %0, %0 : vector<32x64xf32>
    %cst = arith.constant dense<0.000000e+00> : vector<32xf32>
    %2 = vector.multi_reduction <add>, %1, %cst [1] : vector<32x64xf32> to vector<32xf32>
    %3 = vector.shape_cast %2 : vector<32xf32> to vector<32x1xf32>
    %cst_1 = arith.constant 6.400000e+01 : f32
    %4 = vector.broadcast %cst_1 : f32 to vector<32x1xf32>
    %5 = arith.divf %3, %4 : vector<32x1xf32>
    %cst_2 = arith.constant 9.99999997E-7 : f32
    %6 = vector.broadcast %cst_2 : f32 to vector<32x1xf32>
    %7 = arith.addf %5, %6 : vector<32x1xf32>
    %8 = math.rsqrt %7 : vector<32x1xf32>
    %9 = vector.broadcast %8 : vector<32x1xf32> to vector<32x64xf32>
    %10 = arith.mulf %0, %9 : vector<32x64xf32>
    %c0_3 = arith.constant 0 : index
    %c0_4 = arith.constant 0 : index
    %c0_5 = arith.constant 0 : index
    %11 = vector.load %arg7[%c0_3, %c0_4, %c0_5] : memref<2x1x64xf32, #tpu.memory_space<vmem>>, vector<1x1x64xf32>
    %12 = vector.shape_cast %11 : vector<1x1x64xf32> to vector<1x64xf32>
    %13 = vector.broadcast %12 : vector<1x64xf32> to vector<32x64xf32>
    %14 = arith.mulf %10, %13 : vector<32x64xf32>
    %15 = arith.truncf %14 : vector<32x64xf32> to vector<32x64xbf16>
    %c0_6 = arith.constant 0 : index
    %c0_7 = arith.constant 0 : index
    %c0_8 = arith.constant 0 : index
    %16 = vector.load %arg3[%c0_6, %c0_7, %c0_8] : memref<2x64x192xbf16, #tpu.memory_space<vmem>>, vector<1x64x192xbf16>
    %17 = vector.shape_cast %16 : vector<1x64x192xbf16> to vector<64x192xbf16>
    %cst_9 = arith.constant dense<0.000000e+00> : vector<32x192xf32>
    %18 = tpu.matmul %15, %17, %cst_9 {dimension_numbers = #tpu.dot_dimension_numbers<[1], [0], [0], [1], [0, 0, 1, 1], [], []>} : vector<32x64xbf16>, vector<64x192xbf16>, vector<32x192xf32> -> vector<32x192xf32>
    %19 = vector.extract_strided_slice %18 {offsets = [0, 0], sizes = [16, 192], strides = [1, 1]} : vector<32x192xf32> to vector<16x192xf32>
    %c0_10 = arith.constant 0 : index
    %c0_11 = arith.constant 0 : index
    %c0_12 = arith.constant 0 : index
    %20 = vector.load %arg2[%c0_10, %c0_11, %c0_12] : memref<2x1x16xf32, #tpu.memory_space<vmem>>, vector<1x1x16xf32>
    %21 = vector.shape_cast %20 : vector<1x1x16xf32> to vector<1x16xf32>
    %22 = vector.extract_strided_slice %19 {offsets = [0, 0], sizes = [16, 16], strides = [1, 1]} : vector<16x192xf32> to vector<16x16xf32>
    %23 = arith.truncf %22 : vector<16x16xf32> to vector<16x16xbf16>
    %24 = vector.extract_strided_slice %19 {offsets = [0, 64], sizes = [16, 16], strides = [1, 1]} : vector<16x192xf32> to vector<16x16xf32>
    %25 = arith.truncf %24 : vector<16x16xf32> to vector<16x16xbf16>
    %26 = vector.extract_strided_slice %19 {offsets = [0, 128], sizes = [16, 16], strides = [1, 1]} : vector<16x192xf32> to vector<16x16xf32>
    %27 = arith.truncf %26 : vector<16x16xf32> to vector<16x16xbf16>
    %cst_13 = arith.constant dense<0.000000e+00> : vector<16x16xf32>
    %28 = tpu.matmul %23, %25, %cst_13 {dimension_numbers = #tpu.dot_dimension_numbers<[1], [1], [0], [0], [0, 0, 1, 0], [], []>} : vector<16x16xbf16>, vector<16x16xbf16>, vector<16x16xf32> -> vector<16x16xf32>
    %29 = vector.broadcast %21 : vector<1x16xf32> to vector<16x16xf32>
    %30 = arith.addf %28, %29 : vector<16x16xf32>
    %cst_14 = arith.constant dense<0xFF800000> : vector<16xf32>
    %31 = vector.multi_reduction <maximumf>, %30, %cst_14 [1] : vector<16x16xf32> to vector<16xf32>
    %32 = vector.shape_cast %31 : vector<16xf32> to vector<16x1xf32>
    %33 = vector.broadcast %32 : vector<16x1xf32> to vector<16x16xf32>
    %34 = arith.subf %30, %33 : vector<16x16xf32>
    %35 = math.exp %34 : vector<16x16xf32>
    %cst_15 = arith.constant dense<0.000000e+00> : vector<16xf32>
    %36 = vector.multi_reduction <add>, %35, %cst_15 [1] : vector<16x16xf32> to vector<16xf32>
    %37 = vector.shape_cast %36 : vector<16xf32> to vector<16x1xf32>
    %38 = tpu.reciprocal %37 {approx = true} : vector<16x1xf32> -> vector<16x1xf32>
    %39 = vector.broadcast %38 : vector<16x1xf32> to vector<16x16xf32>
    %40 = arith.mulf %35, %39 : vector<16x16xf32>
    %41 = arith.truncf %40 : vector<16x16xf32> to vector<16x16xbf16>
    %cst_16 = arith.constant dense<0.000000e+00> : vector<16x16xf32>
    %42 = tpu.matmul %41, %27, %cst_16 {dimension_numbers = #tpu.dot_dimension_numbers<[1], [0], [0], [1], [0, 0, 1, 1], [], []>} : vector<16x16xbf16>, vector<16x16xbf16>, vector<16x16xf32> -> vector<16x16xf32>
    %43 = vector.extract_strided_slice %19 {offsets = [0, 16], sizes = [16, 16], strides = [1, 1]} : vector<16x192xf32> to vector<16x16xf32>
    %44 = arith.truncf %43 : vector<16x16xf32> to vector<16x16xbf16>
    %45 = vector.extract_strided_slice %19 {offsets = [0, 80], sizes = [16, 16], strides = [1, 1]} : vector<16x192xf32> to vector<16x16xf32>
    %46 = arith.truncf %45 : vector<16x16xf32> to vector<16x16xbf16>
    %47 = vector.extract_strided_slice %19 {offsets = [0, 144], sizes = [16, 16], strides = [1, 1]} : vector<16x192xf32> to vector<16x16xf32>
    %48 = arith.truncf %47 : vector<16x16xf32> to vector<16x16xbf16>
    %cst_17 = arith.constant dense<0.000000e+00> : vector<16x16xf32>
    %49 = tpu.matmul %44, %46, %cst_17 {dimension_numbers = #tpu.dot_dimension_numbers<[1], [1], [0], [0], [0, 0, 1, 0], [], []>} : vector<16x16xbf16>, vector<16x16xbf16>, vector<16x16xf32> -> vector<16x16xf32>
    %50 = vector.broadcast %21 : vector<1x16xf32> to vector<16x16xf32>
    %51 = arith.addf %49, %50 : vector<16x16xf32>
    %cst_18 = arith.constant dense<0xFF800000> : vector<16xf32>
    %52 = vector.multi_reduction <maximumf>, %51, %cst_18 [1] : vector<16x16xf32> to vector<16xf32>
    %53 = vector.shape_cast %52 : vector<16xf32> to vector<16x1xf32>
    %54 = vector.broadcast %53 : vector<16x1xf32> to vector<16x16xf32>
    %55 = arith.subf %51, %54 : vector<16x16xf32>
    %56 = math.exp %55 : vector<16x16xf32>
    %cst_19 = arith.constant dense<0.000000e+00> : vector<16xf32>
    %57 = vector.multi_reduction <add>, %56, %cst_19 [1] : vector<16x16xf32> to vector<16xf32>
    %58 = vector.shape_cast %57 : vector<16xf32> to vector<16x1xf32>
    %59 = tpu.reciprocal %58 {approx = true} : vector<16x1xf32> -> vector<16x1xf32>
    %60 = vector.broadcast %59 : vector<16x1xf32> to vector<16x16xf32>
    %61 = arith.mulf %56, %60 : vector<16x16xf32>
    %62 = arith.truncf %61 : vector<16x16xf32> to vector<16x16xbf16>
    %cst_20 = arith.constant dense<0.000000e+00> : vector<16x16xf32>
    %63 = tpu.matmul %62, %48, %cst_20 {dimension_numbers = #tpu.dot_dimension_numbers<[1], [0], [0], [1], [0, 0, 1, 1], [], []>} : vector<16x16xbf16>, vector<16x16xbf16>, vector<16x16xf32> -> vector<16x16xf32>
    %64 = vector.extract_strided_slice %19 {offsets = [0, 32], sizes = [16, 16], strides = [1, 1]} : vector<16x192xf32> to vector<16x16xf32>
    %65 = arith.truncf %64 : vector<16x16xf32> to vector<16x16xbf16>
    %66 = vector.extract_strided_slice %19 {offsets = [0, 96], sizes = [16, 16], strides = [1, 1]} : vector<16x192xf32> to vector<16x16xf32>
    %67 = arith.truncf %66 : vector<16x16xf32> to vector<16x16xbf16>
    %68 = vector.extract_strided_slice %19 {offsets = [0, 160], sizes = [16, 16], strides = [1, 1]} : vector<16x192xf32> to vector<16x16xf32>
    %69 = arith.truncf %68 : vector<16x16xf32> to vector<16x16xbf16>
    %cst_21 = arith.constant dense<0.000000e+00> : vector<16x16xf32>
    %70 = tpu.matmul %65, %67, %cst_21 {dimension_numbers = #tpu.dot_dimension_numbers<[1], [1], [0], [0], [0, 0, 1, 0], [], []>} : vector<16x16xbf16>, vector<16x16xbf16>, vector<16x16xf32> -> vector<16x16xf32>
    %71 = vector.broadcast %21 : vector<1x16xf32> to vector<16x16xf32>
    %72 = arith.addf %70, %71 : vector<16x16xf32>
    %cst_22 = arith.constant dense<0xFF800000> : vector<16xf32>
    %73 = vector.multi_reduction <maximumf>, %72, %cst_22 [1] : vector<16x16xf32> to vector<16xf32>
    %74 = vector.shape_cast %73 : vector<16xf32> to vector<16x1xf32>
    %75 = vector.broadcast %74 : vector<16x1xf32> to vector<16x16xf32>
    %76 = arith.subf %72, %75 : vector<16x16xf32>
    %77 = math.exp %76 : vector<16x16xf32>
    %cst_23 = arith.constant dense<0.000000e+00> : vector<16xf32>
    %78 = vector.multi_reduction <add>, %77, %cst_23 [1] : vector<16x16xf32> to vector<16xf32>
    %79 = vector.shape_cast %78 : vector<16xf32> to vector<16x1xf32>
    %80 = tpu.reciprocal %79 {approx = true} : vector<16x1xf32> -> vector<16x1xf32>
    %81 = vector.broadcast %80 : vector<16x1xf32> to vector<16x16xf32>
    %82 = arith.mulf %77, %81 : vector<16x16xf32>
    %83 = arith.truncf %82 : vector<16x16xf32> to vector<16x16xbf16>
    %cst_24 = arith.constant dense<0.000000e+00> : vector<16x16xf32>
    %84 = tpu.matmul %83, %69, %cst_24 {dimension_numbers = #tpu.dot_dimension_numbers<[1], [0], [0], [1], [0, 0, 1, 1], [], []>} : vector<16x16xbf16>, vector<16x16xbf16>, vector<16x16xf32> -> vector<16x16xf32>
    %85 = vector.extract_strided_slice %19 {offsets = [0, 48], sizes = [16, 16], strides = [1, 1]} : vector<16x192xf32> to vector<16x16xf32>
    %86 = arith.truncf %85 : vector<16x16xf32> to vector<16x16xbf16>
    %87 = vector.extract_strided_slice %19 {offsets = [0, 112], sizes = [16, 16], strides = [1, 1]} : vector<16x192xf32> to vector<16x16xf32>
    %88 = arith.truncf %87 : vector<16x16xf32> to vector<16x16xbf16>
    %89 = vector.extract_strided_slice %19 {offsets = [0, 176], sizes = [16, 16], strides = [1, 1]} : vector<16x192xf32> to vector<16x16xf32>
    %90 = arith.truncf %89 : vector<16x16xf32> to vector<16x16xbf16>
    %cst_25 = arith.constant dense<0.000000e+00> : vector<16x16xf32>
    %91 = tpu.matmul %86, %88, %cst_25 {dimension_numbers = #tpu.dot_dimension_numbers<[1], [1], [0], [0], [0, 0, 1, 0], [], []>} : vector<16x16xbf16>, vector<16x16xbf16>, vector<16x16xf32> -> vector<16x16xf32>
    %92 = vector.broadcast %21 : vector<1x16xf32> to vector<16x16xf32>
    %93 = arith.addf %91, %92 : vector<16x16xf32>
    %cst_26 = arith.constant dense<0xFF800000> : vector<16xf32>
    %94 = vector.multi_reduction <maximumf>, %93, %cst_26 [1] : vector<16x16xf32> to vector<16xf32>
    %95 = vector.shape_cast %94 : vector<16xf32> to vector<16x1xf32>
    %96 = vector.broadcast %95 : vector<16x1xf32> to vector<16x16xf32>
    %97 = arith.subf %93, %96 : vector<16x16xf32>
    %98 = math.exp %97 : vector<16x16xf32>
    %cst_27 = arith.constant dense<0.000000e+00> : vector<16xf32>
    %99 = vector.multi_reduction <add>, %98, %cst_27 [1] : vector<16x16xf32> to vector<16xf32>
    %100 = vector.shape_cast %99 : vector<16xf32> to vector<16x1xf32>
    %101 = tpu.reciprocal %100 {approx = true} : vector<16x1xf32> -> vector<16x1xf32>
    %102 = vector.broadcast %101 : vector<16x1xf32> to vector<16x16xf32>
    %103 = arith.mulf %98, %102 : vector<16x16xf32>
    %104 = arith.truncf %103 : vector<16x16xf32> to vector<16x16xbf16>
    %cst_28 = arith.constant dense<0.000000e+00> : vector<16x16xf32>
    %105 = tpu.matmul %104, %90, %cst_28 {dimension_numbers = #tpu.dot_dimension_numbers<[1], [0], [0], [1], [0, 0, 1, 1], [], []>} : vector<16x16xbf16>, vector<16x16xbf16>, vector<16x16xf32> -> vector<16x16xf32>
    %106 = tpu.concatenate %42, %63, %84, %105 in 1 : vector<16x16xf32>, vector<16x16xf32>, vector<16x16xf32>, vector<16x16xf32> -> vector<16x64xf32>
    %107 = vector.extract_strided_slice %18 {offsets = [16, 0], sizes = [16, 192], strides = [1, 1]} : vector<32x192xf32> to vector<16x192xf32>
    %c1 = arith.constant 1 : index
    %c0_29 = arith.constant 0 : index
    %c0_30 = arith.constant 0 : index
    %108 = vector.load %arg2[%c1, %c0_29, %c0_30] : memref<2x1x16xf32, #tpu.memory_space<vmem>>, vector<1x1x16xf32>
    %109 = vector.shape_cast %108 : vector<1x1x16xf32> to vector<1x16xf32>
    %110 = vector.extract_strided_slice %107 {offsets = [0, 0], sizes = [16, 16], strides = [1, 1]} : vector<16x192xf32> to vector<16x16xf32>
    %111 = arith.truncf %110 : vector<16x16xf32> to vector<16x16xbf16>
    %112 = vector.extract_strided_slice %107 {offsets = [0, 64], sizes = [16, 16], strides = [1, 1]} : vector<16x192xf32> to vector<16x16xf32>
    %113 = arith.truncf %112 : vector<16x16xf32> to vector<16x16xbf16>
    %114 = vector.extract_strided_slice %107 {offsets = [0, 128], sizes = [16, 16], strides = [1, 1]} : vector<16x192xf32> to vector<16x16xf32>
    %115 = arith.truncf %114 : vector<16x16xf32> to vector<16x16xbf16>
    %cst_31 = arith.constant dense<0.000000e+00> : vector<16x16xf32>
    %116 = tpu.matmul %111, %113, %cst_31 {dimension_numbers = #tpu.dot_dimension_numbers<[1], [1], [0], [0], [0, 0, 1, 0], [], []>} : vector<16x16xbf16>, vector<16x16xbf16>, vector<16x16xf32> -> vector<16x16xf32>
    %117 = vector.broadcast %109 : vector<1x16xf32> to vector<16x16xf32>
    %118 = arith.addf %116, %117 : vector<16x16xf32>
    %cst_32 = arith.constant dense<0xFF800000> : vector<16xf32>
    %119 = vector.multi_reduction <maximumf>, %118, %cst_32 [1] : vector<16x16xf32> to vector<16xf32>
    %120 = vector.shape_cast %119 : vector<16xf32> to vector<16x1xf32>
    %121 = vector.broadcast %120 : vector<16x1xf32> to vector<16x16xf32>
    %122 = arith.subf %118, %121 : vector<16x16xf32>
    %123 = math.exp %122 : vector<16x16xf32>
    %cst_33 = arith.constant dense<0.000000e+00> : vector<16xf32>
    %124 = vector.multi_reduction <add>, %123, %cst_33 [1] : vector<16x16xf32> to vector<16xf32>
    %125 = vector.shape_cast %124 : vector<16xf32> to vector<16x1xf32>
    %126 = tpu.reciprocal %125 {approx = true} : vector<16x1xf32> -> vector<16x1xf32>
    %127 = vector.broadcast %126 : vector<16x1xf32> to vector<16x16xf32>
    %128 = arith.mulf %123, %127 : vector<16x16xf32>
    %129 = arith.truncf %128 : vector<16x16xf32> to vector<16x16xbf16>
    %cst_34 = arith.constant dense<0.000000e+00> : vector<16x16xf32>
    %130 = tpu.matmul %129, %115, %cst_34 {dimension_numbers = #tpu.dot_dimension_numbers<[1], [0], [0], [1], [0, 0, 1, 1], [], []>} : vector<16x16xbf16>, vector<16x16xbf16>, vector<16x16xf32> -> vector<16x16xf32>
    %131 = vector.extract_strided_slice %107 {offsets = [0, 16], sizes = [16, 16], strides = [1, 1]} : vector<16x192xf32> to vector<16x16xf32>
    %132 = arith.truncf %131 : vector<16x16xf32> to vector<16x16xbf16>
    %133 = vector.extract_strided_slice %107 {offsets = [0, 80], sizes = [16, 16], strides = [1, 1]} : vector<16x192xf32> to vector<16x16xf32>
    %134 = arith.truncf %133 : vector<16x16xf32> to vector<16x16xbf16>
    %135 = vector.extract_strided_slice %107 {offsets = [0, 144], sizes = [16, 16], strides = [1, 1]} : vector<16x192xf32> to vector<16x16xf32>
    %136 = arith.truncf %135 : vector<16x16xf32> to vector<16x16xbf16>
    %cst_35 = arith.constant dense<0.000000e+00> : vector<16x16xf32>
    %137 = tpu.matmul %132, %134, %cst_35 {dimension_numbers = #tpu.dot_dimension_numbers<[1], [1], [0], [0], [0, 0, 1, 0], [], []>} : vector<16x16xbf16>, vector<16x16xbf16>, vector<16x16xf32> -> vector<16x16xf32>
    %138 = vector.broadcast %109 : vector<1x16xf32> to vector<16x16xf32>
    %139 = arith.addf %137, %138 : vector<16x16xf32>
    %cst_36 = arith.constant dense<0xFF800000> : vector<16xf32>
    %140 = vector.multi_reduction <maximumf>, %139, %cst_36 [1] : vector<16x16xf32> to vector<16xf32>
    %141 = vector.shape_cast %140 : vector<16xf32> to vector<16x1xf32>
    %142 = vector.broadcast %141 : vector<16x1xf32> to vector<16x16xf32>
    %143 = arith.subf %139, %142 : vector<16x16xf32>
    %144 = math.exp %143 : vector<16x16xf32>
    %cst_37 = arith.constant dense<0.000000e+00> : vector<16xf32>
    %145 = vector.multi_reduction <add>, %144, %cst_37 [1] : vector<16x16xf32> to vector<16xf32>
    %146 = vector.shape_cast %145 : vector<16xf32> to vector<16x1xf32>
    %147 = tpu.reciprocal %146 {approx = true} : vector<16x1xf32> -> vector<16x1xf32>
    %148 = vector.broadcast %147 : vector<16x1xf32> to vector<16x16xf32>
    %149 = arith.mulf %144, %148 : vector<16x16xf32>
    %150 = arith.truncf %149 : vector<16x16xf32> to vector<16x16xbf16>
    %cst_38 = arith.constant dense<0.000000e+00> : vector<16x16xf32>
    %151 = tpu.matmul %150, %136, %cst_38 {dimension_numbers = #tpu.dot_dimension_numbers<[1], [0], [0], [1], [0, 0, 1, 1], [], []>} : vector<16x16xbf16>, vector<16x16xbf16>, vector<16x16xf32> -> vector<16x16xf32>
    %152 = vector.extract_strided_slice %107 {offsets = [0, 32], sizes = [16, 16], strides = [1, 1]} : vector<16x192xf32> to vector<16x16xf32>
    %153 = arith.truncf %152 : vector<16x16xf32> to vector<16x16xbf16>
    %154 = vector.extract_strided_slice %107 {offsets = [0, 96], sizes = [16, 16], strides = [1, 1]} : vector<16x192xf32> to vector<16x16xf32>
    %155 = arith.truncf %154 : vector<16x16xf32> to vector<16x16xbf16>
    %156 = vector.extract_strided_slice %107 {offsets = [0, 160], sizes = [16, 16], strides = [1, 1]} : vector<16x192xf32> to vector<16x16xf32>
    %157 = arith.truncf %156 : vector<16x16xf32> to vector<16x16xbf16>
    %cst_39 = arith.constant dense<0.000000e+00> : vector<16x16xf32>
    %158 = tpu.matmul %153, %155, %cst_39 {dimension_numbers = #tpu.dot_dimension_numbers<[1], [1], [0], [0], [0, 0, 1, 0], [], []>} : vector<16x16xbf16>, vector<16x16xbf16>, vector<16x16xf32> -> vector<16x16xf32>
    %159 = vector.broadcast %109 : vector<1x16xf32> to vector<16x16xf32>
    %160 = arith.addf %158, %159 : vector<16x16xf32>
    %cst_40 = arith.constant dense<0xFF800000> : vector<16xf32>
    %161 = vector.multi_reduction <maximumf>, %160, %cst_40 [1] : vector<16x16xf32> to vector<16xf32>
    %162 = vector.shape_cast %161 : vector<16xf32> to vector<16x1xf32>
    %163 = vector.broadcast %162 : vector<16x1xf32> to vector<16x16xf32>
    %164 = arith.subf %160, %163 : vector<16x16xf32>
    %165 = math.exp %164 : vector<16x16xf32>
    %cst_41 = arith.constant dense<0.000000e+00> : vector<16xf32>
    %166 = vector.multi_reduction <add>, %165, %cst_41 [1] : vector<16x16xf32> to vector<16xf32>
    %167 = vector.shape_cast %166 : vector<16xf32> to vector<16x1xf32>
    %168 = tpu.reciprocal %167 {approx = true} : vector<16x1xf32> -> vector<16x1xf32>
    %169 = vector.broadcast %168 : vector<16x1xf32> to vector<16x16xf32>
    %170 = arith.mulf %165, %169 : vector<16x16xf32>
    %171 = arith.truncf %170 : vector<16x16xf32> to vector<16x16xbf16>
    %cst_42 = arith.constant dense<0.000000e+00> : vector<16x16xf32>
    %172 = tpu.matmul %171, %157, %cst_42 {dimension_numbers = #tpu.dot_dimension_numbers<[1], [0], [0], [1], [0, 0, 1, 1], [], []>} : vector<16x16xbf16>, vector<16x16xbf16>, vector<16x16xf32> -> vector<16x16xf32>
    %173 = vector.extract_strided_slice %107 {offsets = [0, 48], sizes = [16, 16], strides = [1, 1]} : vector<16x192xf32> to vector<16x16xf32>
    %174 = arith.truncf %173 : vector<16x16xf32> to vector<16x16xbf16>
    %175 = vector.extract_strided_slice %107 {offsets = [0, 112], sizes = [16, 16], strides = [1, 1]} : vector<16x192xf32> to vector<16x16xf32>
    %176 = arith.truncf %175 : vector<16x16xf32> to vector<16x16xbf16>
    %177 = vector.extract_strided_slice %107 {offsets = [0, 176], sizes = [16, 16], strides = [1, 1]} : vector<16x192xf32> to vector<16x16xf32>
    %178 = arith.truncf %177 : vector<16x16xf32> to vector<16x16xbf16>
    %cst_43 = arith.constant dense<0.000000e+00> : vector<16x16xf32>
    %179 = tpu.matmul %174, %176, %cst_43 {dimension_numbers = #tpu.dot_dimension_numbers<[1], [1], [0], [0], [0, 0, 1, 0], [], []>} : vector<16x16xbf16>, vector<16x16xbf16>, vector<16x16xf32> -> vector<16x16xf32>
    %180 = vector.broadcast %109 : vector<1x16xf32> to vector<16x16xf32>
    %181 = arith.addf %179, %180 : vector<16x16xf32>
    %cst_44 = arith.constant dense<0xFF800000> : vector<16xf32>
    %182 = vector.multi_reduction <maximumf>, %181, %cst_44 [1] : vector<16x16xf32> to vector<16xf32>
    %183 = vector.shape_cast %182 : vector<16xf32> to vector<16x1xf32>
    %184 = vector.broadcast %183 : vector<16x1xf32> to vector<16x16xf32>
    %185 = arith.subf %181, %184 : vector<16x16xf32>
    %186 = math.exp %185 : vector<16x16xf32>
    %cst_45 = arith.constant dense<0.000000e+00> : vector<16xf32>
    %187 = vector.multi_reduction <add>, %186, %cst_45 [1] : vector<16x16xf32> to vector<16xf32>
    %188 = vector.shape_cast %187 : vector<16xf32> to vector<16x1xf32>
    %189 = tpu.reciprocal %188 {approx = true} : vector<16x1xf32> -> vector<16x1xf32>
    %190 = vector.broadcast %189 : vector<16x1xf32> to vector<16x16xf32>
    %191 = arith.mulf %186, %190 : vector<16x16xf32>
    %192 = arith.truncf %191 : vector<16x16xf32> to vector<16x16xbf16>
    %cst_46 = arith.constant dense<0.000000e+00> : vector<16x16xf32>
    %193 = tpu.matmul %192, %178, %cst_46 {dimension_numbers = #tpu.dot_dimension_numbers<[1], [0], [0], [1], [0, 0, 1, 1], [], []>} : vector<16x16xbf16>, vector<16x16xbf16>, vector<16x16xf32> -> vector<16x16xf32>
    %194 = tpu.concatenate %130, %151, %172, %193 in 1 : vector<16x16xf32>, vector<16x16xf32>, vector<16x16xf32>, vector<16x16xf32> -> vector<16x64xf32>
    %195 = tpu.concatenate %106, %194 in 0 : vector<16x64xf32>, vector<16x64xf32> -> vector<32x64xf32>
    %196 = arith.truncf %195 : vector<32x64xf32> to vector<32x64xbf16>
    %c0_47 = arith.constant 0 : index
    %c0_48 = arith.constant 0 : index
    %c0_49 = arith.constant 0 : index
    %197 = vector.load %arg4[%c0_47, %c0_48, %c0_49] : memref<2x64x64xbf16, #tpu.memory_space<vmem>>, vector<1x64x64xbf16>
    %198 = vector.shape_cast %197 : vector<1x64x64xbf16> to vector<64x64xbf16>
    %cst_50 = arith.constant dense<0.000000e+00> : vector<32x64xf32>
    %199 = tpu.matmul %196, %198, %cst_50 {dimension_numbers = #tpu.dot_dimension_numbers<[1], [0], [0], [1], [0, 0, 1, 1], [], []>} : vector<32x64xbf16>, vector<64x64xbf16>, vector<32x64xf32> -> vector<32x64xf32>
    %200 = arith.addf %0, %199 : vector<32x64xf32>
    %201 = arith.mulf %200, %200 : vector<32x64xf32>
    %cst_51 = arith.constant dense<0.000000e+00> : vector<32xf32>
    %202 = vector.multi_reduction <add>, %201, %cst_51 [1] : vector<32x64xf32> to vector<32xf32>
    %203 = vector.shape_cast %202 : vector<32xf32> to vector<32x1xf32>
    %cst_52 = arith.constant 6.400000e+01 : f32
    %204 = vector.broadcast %cst_52 : f32 to vector<32x1xf32>
    %205 = arith.divf %203, %204 : vector<32x1xf32>
    %cst_53 = arith.constant 9.99999997E-7 : f32
    %206 = vector.broadcast %cst_53 : f32 to vector<32x1xf32>
    %207 = arith.addf %205, %206 : vector<32x1xf32>
    %208 = math.rsqrt %207 : vector<32x1xf32>
    %209 = vector.broadcast %208 : vector<32x1xf32> to vector<32x64xf32>
    %210 = arith.mulf %200, %209 : vector<32x64xf32>
    %c0_54 = arith.constant 0 : index
    %c0_55 = arith.constant 0 : index
    %c0_56 = arith.constant 0 : index
    %211 = vector.load %arg8[%c0_54, %c0_55, %c0_56] : memref<2x1x64xf32, #tpu.memory_space<vmem>>, vector<1x1x64xf32>
    %212 = vector.shape_cast %211 : vector<1x1x64xf32> to vector<1x64xf32>
    %213 = vector.broadcast %212 : vector<1x64xf32> to vector<32x64xf32>
    %214 = arith.mulf %210, %213 : vector<32x64xf32>
    %215 = arith.truncf %214 : vector<32x64xf32> to vector<32x64xbf16>
    %c0_57 = arith.constant 0 : index
    %c0_58 = arith.constant 0 : index
    %c0_59 = arith.constant 0 : index
    %216 = vector.load %arg5[%c0_57, %c0_58, %c0_59] : memref<2x64x256xbf16, #tpu.memory_space<vmem>>, vector<1x64x256xbf16>
    %217 = vector.shape_cast %216 : vector<1x64x256xbf16> to vector<64x256xbf16>
    %cst_60 = arith.constant dense<0.000000e+00> : vector<32x256xf32>
    %218 = tpu.matmul %215, %217, %cst_60 {dimension_numbers = #tpu.dot_dimension_numbers<[1], [0], [0], [1], [0, 0, 1, 1], [], []>} : vector<32x64xbf16>, vector<64x256xbf16>, vector<32x256xf32> -> vector<32x256xf32>
    %219 = vector.extract_strided_slice %218 {offsets = [0, 0], sizes = [32, 128], strides = [1, 1]} : vector<32x256xf32> to vector<32x128xf32>
    %220 = vector.extract_strided_slice %218 {offsets = [0, 128], sizes = [32, 128], strides = [1, 1]} : vector<32x256xf32> to vector<32x128xf32>
    %221 = arith.negf %219 : vector<32x128xf32>
    %222 = math.exp %221 : vector<32x128xf32>
    %cst_61 = arith.constant 1.000000e+00 : f32
    %223 = vector.broadcast %cst_61 : f32 to vector<32x128xf32>
    %224 = arith.addf %223, %222 : vector<32x128xf32>
    %225 = arith.divf %223, %224 : vector<32x128xf32>
    %226 = arith.mulf %219, %225 : vector<32x128xf32>
    %227 = arith.mulf %226, %220 : vector<32x128xf32>
    %228 = arith.truncf %227 : vector<32x128xf32> to vector<32x128xbf16>
    %c0_62 = arith.constant 0 : index
    %c0_63 = arith.constant 0 : index
    %c0_64 = arith.constant 0 : index
    %229 = vector.load %arg6[%c0_62, %c0_63, %c0_64] : memref<2x128x64xbf16, #tpu.memory_space<vmem>>, vector<1x128x64xbf16>
    %230 = vector.shape_cast %229 : vector<1x128x64xbf16> to vector<128x64xbf16>
    %cst_65 = arith.constant dense<0.000000e+00> : vector<32x64xf32>
    %231 = tpu.matmul %228, %230, %cst_65 {dimension_numbers = #tpu.dot_dimension_numbers<[1], [0], [0], [1], [0, 0, 1, 1], [], []>} : vector<32x128xbf16>, vector<128x64xbf16>, vector<32x64xf32> -> vector<32x64xf32>
    %232 = arith.addf %200, %231 : vector<32x64xf32>
    %233 = arith.mulf %232, %232 : vector<32x64xf32>
    %cst_66 = arith.constant dense<0.000000e+00> : vector<32xf32>
    %234 = vector.multi_reduction <add>, %233, %cst_66 [1] : vector<32x64xf32> to vector<32xf32>
    %235 = vector.shape_cast %234 : vector<32xf32> to vector<32x1xf32>
    %cst_67 = arith.constant 6.400000e+01 : f32
    %236 = vector.broadcast %cst_67 : f32 to vector<32x1xf32>
    %237 = arith.divf %235, %236 : vector<32x1xf32>
    %cst_68 = arith.constant 9.99999997E-7 : f32
    %238 = vector.broadcast %cst_68 : f32 to vector<32x1xf32>
    %239 = arith.addf %237, %238 : vector<32x1xf32>
    %240 = math.rsqrt %239 : vector<32x1xf32>
    %241 = vector.broadcast %240 : vector<32x1xf32> to vector<32x64xf32>
    %242 = arith.mulf %232, %241 : vector<32x64xf32>
    %c1_69 = arith.constant 1 : index
    %c0_70 = arith.constant 0 : index
    %c0_71 = arith.constant 0 : index
    %243 = vector.load %arg7[%c1_69, %c0_70, %c0_71] : memref<2x1x64xf32, #tpu.memory_space<vmem>>, vector<1x1x64xf32>
    %244 = vector.shape_cast %243 : vector<1x1x64xf32> to vector<1x64xf32>
    %245 = vector.broadcast %244 : vector<1x64xf32> to vector<32x64xf32>
    %246 = arith.mulf %242, %245 : vector<32x64xf32>
    %247 = arith.truncf %246 : vector<32x64xf32> to vector<32x64xbf16>
    %c1_72 = arith.constant 1 : index
    %c0_73 = arith.constant 0 : index
    %c0_74 = arith.constant 0 : index
    %248 = vector.load %arg3[%c1_72, %c0_73, %c0_74] : memref<2x64x192xbf16, #tpu.memory_space<vmem>>, vector<1x64x192xbf16>
    %249 = vector.shape_cast %248 : vector<1x64x192xbf16> to vector<64x192xbf16>
    %cst_75 = arith.constant dense<0.000000e+00> : vector<32x192xf32>
    %250 = tpu.matmul %247, %249, %cst_75 {dimension_numbers = #tpu.dot_dimension_numbers<[1], [0], [0], [1], [0, 0, 1, 1], [], []>} : vector<32x64xbf16>, vector<64x192xbf16>, vector<32x192xf32> -> vector<32x192xf32>
    %251 = vector.extract_strided_slice %250 {offsets = [0, 0], sizes = [16, 192], strides = [1, 1]} : vector<32x192xf32> to vector<16x192xf32>
    %c0_76 = arith.constant 0 : index
    %c0_77 = arith.constant 0 : index
    %c0_78 = arith.constant 0 : index
    %252 = vector.load %arg2[%c0_76, %c0_77, %c0_78] : memref<2x1x16xf32, #tpu.memory_space<vmem>>, vector<1x1x16xf32>
    %253 = vector.shape_cast %252 : vector<1x1x16xf32> to vector<1x16xf32>
    %254 = vector.extract_strided_slice %251 {offsets = [0, 0], sizes = [16, 16], strides = [1, 1]} : vector<16x192xf32> to vector<16x16xf32>
    %255 = arith.truncf %254 : vector<16x16xf32> to vector<16x16xbf16>
    %256 = vector.extract_strided_slice %251 {offsets = [0, 64], sizes = [16, 16], strides = [1, 1]} : vector<16x192xf32> to vector<16x16xf32>
    %257 = arith.truncf %256 : vector<16x16xf32> to vector<16x16xbf16>
    %258 = vector.extract_strided_slice %251 {offsets = [0, 128], sizes = [16, 16], strides = [1, 1]} : vector<16x192xf32> to vector<16x16xf32>
    %259 = arith.truncf %258 : vector<16x16xf32> to vector<16x16xbf16>
    %cst_79 = arith.constant dense<0.000000e+00> : vector<16x16xf32>
    %260 = tpu.matmul %255, %257, %cst_79 {dimension_numbers = #tpu.dot_dimension_numbers<[1], [1], [0], [0], [0, 0, 1, 0], [], []>} : vector<16x16xbf16>, vector<16x16xbf16>, vector<16x16xf32> -> vector<16x16xf32>
    %261 = vector.broadcast %253 : vector<1x16xf32> to vector<16x16xf32>
    %262 = arith.addf %260, %261 : vector<16x16xf32>
    %cst_80 = arith.constant dense<0xFF800000> : vector<16xf32>
    %263 = vector.multi_reduction <maximumf>, %262, %cst_80 [1] : vector<16x16xf32> to vector<16xf32>
    %264 = vector.shape_cast %263 : vector<16xf32> to vector<16x1xf32>
    %265 = vector.broadcast %264 : vector<16x1xf32> to vector<16x16xf32>
    %266 = arith.subf %262, %265 : vector<16x16xf32>
    %267 = math.exp %266 : vector<16x16xf32>
    %cst_81 = arith.constant dense<0.000000e+00> : vector<16xf32>
    %268 = vector.multi_reduction <add>, %267, %cst_81 [1] : vector<16x16xf32> to vector<16xf32>
    %269 = vector.shape_cast %268 : vector<16xf32> to vector<16x1xf32>
    %270 = tpu.reciprocal %269 {approx = true} : vector<16x1xf32> -> vector<16x1xf32>
    %271 = vector.broadcast %270 : vector<16x1xf32> to vector<16x16xf32>
    %272 = arith.mulf %267, %271 : vector<16x16xf32>
    %273 = arith.truncf %272 : vector<16x16xf32> to vector<16x16xbf16>
    %cst_82 = arith.constant dense<0.000000e+00> : vector<16x16xf32>
    %274 = tpu.matmul %273, %259, %cst_82 {dimension_numbers = #tpu.dot_dimension_numbers<[1], [0], [0], [1], [0, 0, 1, 1], [], []>} : vector<16x16xbf16>, vector<16x16xbf16>, vector<16x16xf32> -> vector<16x16xf32>
    %275 = vector.extract_strided_slice %251 {offsets = [0, 16], sizes = [16, 16], strides = [1, 1]} : vector<16x192xf32> to vector<16x16xf32>
    %276 = arith.truncf %275 : vector<16x16xf32> to vector<16x16xbf16>
    %277 = vector.extract_strided_slice %251 {offsets = [0, 80], sizes = [16, 16], strides = [1, 1]} : vector<16x192xf32> to vector<16x16xf32>
    %278 = arith.truncf %277 : vector<16x16xf32> to vector<16x16xbf16>
    %279 = vector.extract_strided_slice %251 {offsets = [0, 144], sizes = [16, 16], strides = [1, 1]} : vector<16x192xf32> to vector<16x16xf32>
    %280 = arith.truncf %279 : vector<16x16xf32> to vector<16x16xbf16>
    %cst_83 = arith.constant dense<0.000000e+00> : vector<16x16xf32>
    %281 = tpu.matmul %276, %278, %cst_83 {dimension_numbers = #tpu.dot_dimension_numbers<[1], [1], [0], [0], [0, 0, 1, 0], [], []>} : vector<16x16xbf16>, vector<16x16xbf16>, vector<16x16xf32> -> vector<16x16xf32>
    %282 = vector.broadcast %253 : vector<1x16xf32> to vector<16x16xf32>
    %283 = arith.addf %281, %282 : vector<16x16xf32>
    %cst_84 = arith.constant dense<0xFF800000> : vector<16xf32>
    %284 = vector.multi_reduction <maximumf>, %283, %cst_84 [1] : vector<16x16xf32> to vector<16xf32>
    %285 = vector.shape_cast %284 : vector<16xf32> to vector<16x1xf32>
    %286 = vector.broadcast %285 : vector<16x1xf32> to vector<16x16xf32>
    %287 = arith.subf %283, %286 : vector<16x16xf32>
    %288 = math.exp %287 : vector<16x16xf32>
    %cst_85 = arith.constant dense<0.000000e+00> : vector<16xf32>
    %289 = vector.multi_reduction <add>, %288, %cst_85 [1] : vector<16x16xf32> to vector<16xf32>
    %290 = vector.shape_cast %289 : vector<16xf32> to vector<16x1xf32>
    %291 = tpu.reciprocal %290 {approx = true} : vector<16x1xf32> -> vector<16x1xf32>
    %292 = vector.broadcast %291 : vector<16x1xf32> to vector<16x16xf32>
    %293 = arith.mulf %288, %292 : vector<16x16xf32>
    %294 = arith.truncf %293 : vector<16x16xf32> to vector<16x16xbf16>
    %cst_86 = arith.constant dense<0.000000e+00> : vector<16x16xf32>
    %295 = tpu.matmul %294, %280, %cst_86 {dimension_numbers = #tpu.dot_dimension_numbers<[1], [0], [0], [1], [0, 0, 1, 1], [], []>} : vector<16x16xbf16>, vector<16x16xbf16>, vector<16x16xf32> -> vector<16x16xf32>
    %296 = vector.extract_strided_slice %251 {offsets = [0, 32], sizes = [16, 16], strides = [1, 1]} : vector<16x192xf32> to vector<16x16xf32>
    %297 = arith.truncf %296 : vector<16x16xf32> to vector<16x16xbf16>
    %298 = vector.extract_strided_slice %251 {offsets = [0, 96], sizes = [16, 16], strides = [1, 1]} : vector<16x192xf32> to vector<16x16xf32>
    %299 = arith.truncf %298 : vector<16x16xf32> to vector<16x16xbf16>
    %300 = vector.extract_strided_slice %251 {offsets = [0, 160], sizes = [16, 16], strides = [1, 1]} : vector<16x192xf32> to vector<16x16xf32>
    %301 = arith.truncf %300 : vector<16x16xf32> to vector<16x16xbf16>
    %cst_87 = arith.constant dense<0.000000e+00> : vector<16x16xf32>
    %302 = tpu.matmul %297, %299, %cst_87 {dimension_numbers = #tpu.dot_dimension_numbers<[1], [1], [0], [0], [0, 0, 1, 0], [], []>} : vector<16x16xbf16>, vector<16x16xbf16>, vector<16x16xf32> -> vector<16x16xf32>
    %303 = vector.broadcast %253 : vector<1x16xf32> to vector<16x16xf32>
    %304 = arith.addf %302, %303 : vector<16x16xf32>
    %cst_88 = arith.constant dense<0xFF800000> : vector<16xf32>
    %305 = vector.multi_reduction <maximumf>, %304, %cst_88 [1] : vector<16x16xf32> to vector<16xf32>
    %306 = vector.shape_cast %305 : vector<16xf32> to vector<16x1xf32>
    %307 = vector.broadcast %306 : vector<16x1xf32> to vector<16x16xf32>
    %308 = arith.subf %304, %307 : vector<16x16xf32>
    %309 = math.exp %308 : vector<16x16xf32>
    %cst_89 = arith.constant dense<0.000000e+00> : vector<16xf32>
    %310 = vector.multi_reduction <add>, %309, %cst_89 [1] : vector<16x16xf32> to vector<16xf32>
    %311 = vector.shape_cast %310 : vector<16xf32> to vector<16x1xf32>
    %312 = tpu.reciprocal %311 {approx = true} : vector<16x1xf32> -> vector<16x1xf32>
    %313 = vector.broadcast %312 : vector<16x1xf32> to vector<16x16xf32>
    %314 = arith.mulf %309, %313 : vector<16x16xf32>
    %315 = arith.truncf %314 : vector<16x16xf32> to vector<16x16xbf16>
    %cst_90 = arith.constant dense<0.000000e+00> : vector<16x16xf32>
    %316 = tpu.matmul %315, %301, %cst_90 {dimension_numbers = #tpu.dot_dimension_numbers<[1], [0], [0], [1], [0, 0, 1, 1], [], []>} : vector<16x16xbf16>, vector<16x16xbf16>, vector<16x16xf32> -> vector<16x16xf32>
    %317 = vector.extract_strided_slice %251 {offsets = [0, 48], sizes = [16, 16], strides = [1, 1]} : vector<16x192xf32> to vector<16x16xf32>
    %318 = arith.truncf %317 : vector<16x16xf32> to vector<16x16xbf16>
    %319 = vector.extract_strided_slice %251 {offsets = [0, 112], sizes = [16, 16], strides = [1, 1]} : vector<16x192xf32> to vector<16x16xf32>
    %320 = arith.truncf %319 : vector<16x16xf32> to vector<16x16xbf16>
    %321 = vector.extract_strided_slice %251 {offsets = [0, 176], sizes = [16, 16], strides = [1, 1]} : vector<16x192xf32> to vector<16x16xf32>
    %322 = arith.truncf %321 : vector<16x16xf32> to vector<16x16xbf16>
    %cst_91 = arith.constant dense<0.000000e+00> : vector<16x16xf32>
    %323 = tpu.matmul %318, %320, %cst_91 {dimension_numbers = #tpu.dot_dimension_numbers<[1], [1], [0], [0], [0, 0, 1, 0], [], []>} : vector<16x16xbf16>, vector<16x16xbf16>, vector<16x16xf32> -> vector<16x16xf32>
    %324 = vector.broadcast %253 : vector<1x16xf32> to vector<16x16xf32>
    %325 = arith.addf %323, %324 : vector<16x16xf32>
    %cst_92 = arith.constant dense<0xFF800000> : vector<16xf32>
    %326 = vector.multi_reduction <maximumf>, %325, %cst_92 [1] : vector<16x16xf32> to vector<16xf32>
    %327 = vector.shape_cast %326 : vector<16xf32> to vector<16x1xf32>
    %328 = vector.broadcast %327 : vector<16x1xf32> to vector<16x16xf32>
    %329 = arith.subf %325, %328 : vector<16x16xf32>
    %330 = math.exp %329 : vector<16x16xf32>
    %cst_93 = arith.constant dense<0.000000e+00> : vector<16xf32>
    %331 = vector.multi_reduction <add>, %330, %cst_93 [1] : vector<16x16xf32> to vector<16xf32>
    %332 = vector.shape_cast %331 : vector<16xf32> to vector<16x1xf32>
    %333 = tpu.reciprocal %332 {approx = true} : vector<16x1xf32> -> vector<16x1xf32>
    %334 = vector.broadcast %333 : vector<16x1xf32> to vector<16x16xf32>
    %335 = arith.mulf %330, %334 : vector<16x16xf32>
    %336 = arith.truncf %335 : vector<16x16xf32> to vector<16x16xbf16>
    %cst_94 = arith.constant dense<0.000000e+00> : vector<16x16xf32>
    %337 = tpu.matmul %336, %322, %cst_94 {dimension_numbers = #tpu.dot_dimension_numbers<[1], [0], [0], [1], [0, 0, 1, 1], [], []>} : vector<16x16xbf16>, vector<16x16xbf16>, vector<16x16xf32> -> vector<16x16xf32>
    %338 = tpu.concatenate %274, %295, %316, %337 in 1 : vector<16x16xf32>, vector<16x16xf32>, vector<16x16xf32>, vector<16x16xf32> -> vector<16x64xf32>
    %339 = vector.extract_strided_slice %250 {offsets = [16, 0], sizes = [16, 192], strides = [1, 1]} : vector<32x192xf32> to vector<16x192xf32>
    %c1_95 = arith.constant 1 : index
    %c0_96 = arith.constant 0 : index
    %c0_97 = arith.constant 0 : index
    %340 = vector.load %arg2[%c1_95, %c0_96, %c0_97] : memref<2x1x16xf32, #tpu.memory_space<vmem>>, vector<1x1x16xf32>
    %341 = vector.shape_cast %340 : vector<1x1x16xf32> to vector<1x16xf32>
    %342 = vector.extract_strided_slice %339 {offsets = [0, 0], sizes = [16, 16], strides = [1, 1]} : vector<16x192xf32> to vector<16x16xf32>
    %343 = arith.truncf %342 : vector<16x16xf32> to vector<16x16xbf16>
    %344 = vector.extract_strided_slice %339 {offsets = [0, 64], sizes = [16, 16], strides = [1, 1]} : vector<16x192xf32> to vector<16x16xf32>
    %345 = arith.truncf %344 : vector<16x16xf32> to vector<16x16xbf16>
    %346 = vector.extract_strided_slice %339 {offsets = [0, 128], sizes = [16, 16], strides = [1, 1]} : vector<16x192xf32> to vector<16x16xf32>
    %347 = arith.truncf %346 : vector<16x16xf32> to vector<16x16xbf16>
    %cst_98 = arith.constant dense<0.000000e+00> : vector<16x16xf32>
    %348 = tpu.matmul %343, %345, %cst_98 {dimension_numbers = #tpu.dot_dimension_numbers<[1], [1], [0], [0], [0, 0, 1, 0], [], []>} : vector<16x16xbf16>, vector<16x16xbf16>, vector<16x16xf32> -> vector<16x16xf32>
    %349 = vector.broadcast %341 : vector<1x16xf32> to vector<16x16xf32>
    %350 = arith.addf %348, %349 : vector<16x16xf32>
    %cst_99 = arith.constant dense<0xFF800000> : vector<16xf32>
    %351 = vector.multi_reduction <maximumf>, %350, %cst_99 [1] : vector<16x16xf32> to vector<16xf32>
    %352 = vector.shape_cast %351 : vector<16xf32> to vector<16x1xf32>
    %353 = vector.broadcast %352 : vector<16x1xf32> to vector<16x16xf32>
    %354 = arith.subf %350, %353 : vector<16x16xf32>
    %355 = math.exp %354 : vector<16x16xf32>
    %cst_100 = arith.constant dense<0.000000e+00> : vector<16xf32>
    %356 = vector.multi_reduction <add>, %355, %cst_100 [1] : vector<16x16xf32> to vector<16xf32>
    %357 = vector.shape_cast %356 : vector<16xf32> to vector<16x1xf32>
    %358 = tpu.reciprocal %357 {approx = true} : vector<16x1xf32> -> vector<16x1xf32>
    %359 = vector.broadcast %358 : vector<16x1xf32> to vector<16x16xf32>
    %360 = arith.mulf %355, %359 : vector<16x16xf32>
    %361 = arith.truncf %360 : vector<16x16xf32> to vector<16x16xbf16>
    %cst_101 = arith.constant dense<0.000000e+00> : vector<16x16xf32>
    %362 = tpu.matmul %361, %347, %cst_101 {dimension_numbers = #tpu.dot_dimension_numbers<[1], [0], [0], [1], [0, 0, 1, 1], [], []>} : vector<16x16xbf16>, vector<16x16xbf16>, vector<16x16xf32> -> vector<16x16xf32>
    %363 = vector.extract_strided_slice %339 {offsets = [0, 16], sizes = [16, 16], strides = [1, 1]} : vector<16x192xf32> to vector<16x16xf32>
    %364 = arith.truncf %363 : vector<16x16xf32> to vector<16x16xbf16>
    %365 = vector.extract_strided_slice %339 {offsets = [0, 80], sizes = [16, 16], strides = [1, 1]} : vector<16x192xf32> to vector<16x16xf32>
    %366 = arith.truncf %365 : vector<16x16xf32> to vector<16x16xbf16>
    %367 = vector.extract_strided_slice %339 {offsets = [0, 144], sizes = [16, 16], strides = [1, 1]} : vector<16x192xf32> to vector<16x16xf32>
    %368 = arith.truncf %367 : vector<16x16xf32> to vector<16x16xbf16>
    %cst_102 = arith.constant dense<0.000000e+00> : vector<16x16xf32>
    %369 = tpu.matmul %364, %366, %cst_102 {dimension_numbers = #tpu.dot_dimension_numbers<[1], [1], [0], [0], [0, 0, 1, 0], [], []>} : vector<16x16xbf16>, vector<16x16xbf16>, vector<16x16xf32> -> vector<16x16xf32>
    %370 = vector.broadcast %341 : vector<1x16xf32> to vector<16x16xf32>
    %371 = arith.addf %369, %370 : vector<16x16xf32>
    %cst_103 = arith.constant dense<0xFF800000> : vector<16xf32>
    %372 = vector.multi_reduction <maximumf>, %371, %cst_103 [1] : vector<16x16xf32> to vector<16xf32>
    %373 = vector.shape_cast %372 : vector<16xf32> to vector<16x1xf32>
    %374 = vector.broadcast %373 : vector<16x1xf32> to vector<16x16xf32>
    %375 = arith.subf %371, %374 : vector<16x16xf32>
    %376 = math.exp %375 : vector<16x16xf32>
    %cst_104 = arith.constant dense<0.000000e+00> : vector<16xf32>
    %377 = vector.multi_reduction <add>, %376, %cst_104 [1] : vector<16x16xf32> to vector<16xf32>
    %378 = vector.shape_cast %377 : vector<16xf32> to vector<16x1xf32>
    %379 = tpu.reciprocal %378 {approx = true} : vector<16x1xf32> -> vector<16x1xf32>
    %380 = vector.broadcast %379 : vector<16x1xf32> to vector<16x16xf32>
    %381 = arith.mulf %376, %380 : vector<16x16xf32>
    %382 = arith.truncf %381 : vector<16x16xf32> to vector<16x16xbf16>
    %cst_105 = arith.constant dense<0.000000e+00> : vector<16x16xf32>
    %383 = tpu.matmul %382, %368, %cst_105 {dimension_numbers = #tpu.dot_dimension_numbers<[1], [0], [0], [1], [0, 0, 1, 1], [], []>} : vector<16x16xbf16>, vector<16x16xbf16>, vector<16x16xf32> -> vector<16x16xf32>
    %384 = vector.extract_strided_slice %339 {offsets = [0, 32], sizes = [16, 16], strides = [1, 1]} : vector<16x192xf32> to vector<16x16xf32>
    %385 = arith.truncf %384 : vector<16x16xf32> to vector<16x16xbf16>
    %386 = vector.extract_strided_slice %339 {offsets = [0, 96], sizes = [16, 16], strides = [1, 1]} : vector<16x192xf32> to vector<16x16xf32>
    %387 = arith.truncf %386 : vector<16x16xf32> to vector<16x16xbf16>
    %388 = vector.extract_strided_slice %339 {offsets = [0, 160], sizes = [16, 16], strides = [1, 1]} : vector<16x192xf32> to vector<16x16xf32>
    %389 = arith.truncf %388 : vector<16x16xf32> to vector<16x16xbf16>
    %cst_106 = arith.constant dense<0.000000e+00> : vector<16x16xf32>
    %390 = tpu.matmul %385, %387, %cst_106 {dimension_numbers = #tpu.dot_dimension_numbers<[1], [1], [0], [0], [0, 0, 1, 0], [], []>} : vector<16x16xbf16>, vector<16x16xbf16>, vector<16x16xf32> -> vector<16x16xf32>
    %391 = vector.broadcast %341 : vector<1x16xf32> to vector<16x16xf32>
    %392 = arith.addf %390, %391 : vector<16x16xf32>
    %cst_107 = arith.constant dense<0xFF800000> : vector<16xf32>
    %393 = vector.multi_reduction <maximumf>, %392, %cst_107 [1] : vector<16x16xf32> to vector<16xf32>
    %394 = vector.shape_cast %393 : vector<16xf32> to vector<16x1xf32>
    %395 = vector.broadcast %394 : vector<16x1xf32> to vector<16x16xf32>
    %396 = arith.subf %392, %395 : vector<16x16xf32>
    %397 = math.exp %396 : vector<16x16xf32>
    %cst_108 = arith.constant dense<0.000000e+00> : vector<16xf32>
    %398 = vector.multi_reduction <add>, %397, %cst_108 [1] : vector<16x16xf32> to vector<16xf32>
    %399 = vector.shape_cast %398 : vector<16xf32> to vector<16x1xf32>
    %400 = tpu.reciprocal %399 {approx = true} : vector<16x1xf32> -> vector<16x1xf32>
    %401 = vector.broadcast %400 : vector<16x1xf32> to vector<16x16xf32>
    %402 = arith.mulf %397, %401 : vector<16x16xf32>
    %403 = arith.truncf %402 : vector<16x16xf32> to vector<16x16xbf16>
    %cst_109 = arith.constant dense<0.000000e+00> : vector<16x16xf32>
    %404 = tpu.matmul %403, %389, %cst_109 {dimension_numbers = #tpu.dot_dimension_numbers<[1], [0], [0], [1], [0, 0, 1, 1], [], []>} : vector<16x16xbf16>, vector<16x16xbf16>, vector<16x16xf32> -> vector<16x16xf32>
    %405 = vector.extract_strided_slice %339 {offsets = [0, 48], sizes = [16, 16], strides = [1, 1]} : vector<16x192xf32> to vector<16x16xf32>
    %406 = arith.truncf %405 : vector<16x16xf32> to vector<16x16xbf16>
    %407 = vector.extract_strided_slice %339 {offsets = [0, 112], sizes = [16, 16], strides = [1, 1]} : vector<16x192xf32> to vector<16x16xf32>
    %408 = arith.truncf %407 : vector<16x16xf32> to vector<16x16xbf16>
    %409 = vector.extract_strided_slice %339 {offsets = [0, 176], sizes = [16, 16], strides = [1, 1]} : vector<16x192xf32> to vector<16x16xf32>
    %410 = arith.truncf %409 : vector<16x16xf32> to vector<16x16xbf16>
    %cst_110 = arith.constant dense<0.000000e+00> : vector<16x16xf32>
    %411 = tpu.matmul %406, %408, %cst_110 {dimension_numbers = #tpu.dot_dimension_numbers<[1], [1], [0], [0], [0, 0, 1, 0], [], []>} : vector<16x16xbf16>, vector<16x16xbf16>, vector<16x16xf32> -> vector<16x16xf32>
    %412 = vector.broadcast %341 : vector<1x16xf32> to vector<16x16xf32>
    %413 = arith.addf %411, %412 : vector<16x16xf32>
    %cst_111 = arith.constant dense<0xFF800000> : vector<16xf32>
    %414 = vector.multi_reduction <maximumf>, %413, %cst_111 [1] : vector<16x16xf32> to vector<16xf32>
    %415 = vector.shape_cast %414 : vector<16xf32> to vector<16x1xf32>
    %416 = vector.broadcast %415 : vector<16x1xf32> to vector<16x16xf32>
    %417 = arith.subf %413, %416 : vector<16x16xf32>
    %418 = math.exp %417 : vector<16x16xf32>
    %cst_112 = arith.constant dense<0.000000e+00> : vector<16xf32>
    %419 = vector.multi_reduction <add>, %418, %cst_112 [1] : vector<16x16xf32> to vector<16xf32>
    %420 = vector.shape_cast %419 : vector<16xf32> to vector<16x1xf32>
    %421 = tpu.reciprocal %420 {approx = true} : vector<16x1xf32> -> vector<16x1xf32>
    %422 = vector.broadcast %421 : vector<16x1xf32> to vector<16x16xf32>
    %423 = arith.mulf %418, %422 : vector<16x16xf32>
    %424 = arith.truncf %423 : vector<16x16xf32> to vector<16x16xbf16>
    %cst_113 = arith.constant dense<0.000000e+00> : vector<16x16xf32>
    %425 = tpu.matmul %424, %410, %cst_113 {dimension_numbers = #tpu.dot_dimension_numbers<[1], [0], [0], [1], [0, 0, 1, 1], [], []>} : vector<16x16xbf16>, vector<16x16xbf16>, vector<16x16xf32> -> vector<16x16xf32>
    %426 = tpu.concatenate %362, %383, %404, %425 in 1 : vector<16x16xf32>, vector<16x16xf32>, vector<16x16xf32>, vector<16x16xf32> -> vector<16x64xf32>
    %427 = tpu.concatenate %338, %426 in 0 : vector<16x64xf32>, vector<16x64xf32> -> vector<32x64xf32>
    %428 = arith.truncf %427 : vector<32x64xf32> to vector<32x64xbf16>
    %c1_114 = arith.constant 1 : index
    %c0_115 = arith.constant 0 : index
    %c0_116 = arith.constant 0 : index
    %429 = vector.load %arg4[%c1_114, %c0_115, %c0_116] : memref<2x64x64xbf16, #tpu.memory_space<vmem>>, vector<1x64x64xbf16>
    %430 = vector.shape_cast %429 : vector<1x64x64xbf16> to vector<64x64xbf16>
    %cst_117 = arith.constant dense<0.000000e+00> : vector<32x64xf32>
    %431 = tpu.matmul %428, %430, %cst_117 {dimension_numbers = #tpu.dot_dimension_numbers<[1], [0], [0], [1], [0, 0, 1, 1], [], []>} : vector<32x64xbf16>, vector<64x64xbf16>, vector<32x64xf32> -> vector<32x64xf32>
    %432 = arith.addf %232, %431 : vector<32x64xf32>
    %433 = arith.mulf %432, %432 : vector<32x64xf32>
    %cst_118 = arith.constant dense<0.000000e+00> : vector<32xf32>
    %434 = vector.multi_reduction <add>, %433, %cst_118 [1] : vector<32x64xf32> to vector<32xf32>
    %435 = vector.shape_cast %434 : vector<32xf32> to vector<32x1xf32>
    %cst_119 = arith.constant 6.400000e+01 : f32
    %436 = vector.broadcast %cst_119 : f32 to vector<32x1xf32>
    %437 = arith.divf %435, %436 : vector<32x1xf32>
    %cst_120 = arith.constant 9.99999997E-7 : f32
    %438 = vector.broadcast %cst_120 : f32 to vector<32x1xf32>
    %439 = arith.addf %437, %438 : vector<32x1xf32>
    %440 = math.rsqrt %439 : vector<32x1xf32>
    %441 = vector.broadcast %440 : vector<32x1xf32> to vector<32x64xf32>
    %442 = arith.mulf %432, %441 : vector<32x64xf32>
    %c1_121 = arith.constant 1 : index
    %c0_122 = arith.constant 0 : index
    %c0_123 = arith.constant 0 : index
    %443 = vector.load %arg8[%c1_121, %c0_122, %c0_123] : memref<2x1x64xf32, #tpu.memory_space<vmem>>, vector<1x1x64xf32>
    %444 = vector.shape_cast %443 : vector<1x1x64xf32> to vector<1x64xf32>
    %445 = vector.broadcast %444 : vector<1x64xf32> to vector<32x64xf32>
    %446 = arith.mulf %442, %445 : vector<32x64xf32>
    %447 = arith.truncf %446 : vector<32x64xf32> to vector<32x64xbf16>
    %c1_124 = arith.constant 1 : index
    %c0_125 = arith.constant 0 : index
    %c0_126 = arith.constant 0 : index
    %448 = vector.load %arg5[%c1_124, %c0_125, %c0_126] : memref<2x64x256xbf16, #tpu.memory_space<vmem>>, vector<1x64x256xbf16>
    %449 = vector.shape_cast %448 : vector<1x64x256xbf16> to vector<64x256xbf16>
    %cst_127 = arith.constant dense<0.000000e+00> : vector<32x256xf32>
    %450 = tpu.matmul %447, %449, %cst_127 {dimension_numbers = #tpu.dot_dimension_numbers<[1], [0], [0], [1], [0, 0, 1, 1], [], []>} : vector<32x64xbf16>, vector<64x256xbf16>, vector<32x256xf32> -> vector<32x256xf32>
    %451 = vector.extract_strided_slice %450 {offsets = [0, 0], sizes = [32, 128], strides = [1, 1]} : vector<32x256xf32> to vector<32x128xf32>
    %452 = vector.extract_strided_slice %450 {offsets = [0, 128], sizes = [32, 128], strides = [1, 1]} : vector<32x256xf32> to vector<32x128xf32>
    %453 = arith.negf %451 : vector<32x128xf32>
    %454 = math.exp %453 : vector<32x128xf32>
    %cst_128 = arith.constant 1.000000e+00 : f32
    %455 = vector.broadcast %cst_128 : f32 to vector<32x128xf32>
    %456 = arith.addf %455, %454 : vector<32x128xf32>
    %457 = arith.divf %455, %456 : vector<32x128xf32>
    %458 = arith.mulf %451, %457 : vector<32x128xf32>
    %459 = arith.mulf %458, %452 : vector<32x128xf32>
    %460 = arith.truncf %459 : vector<32x128xf32> to vector<32x128xbf16>
    %c1_129 = arith.constant 1 : index
    %c0_130 = arith.constant 0 : index
    %c0_131 = arith.constant 0 : index
    %461 = vector.load %arg6[%c1_129, %c0_130, %c0_131] : memref<2x128x64xbf16, #tpu.memory_space<vmem>>, vector<1x128x64xbf16>
    %462 = vector.shape_cast %461 : vector<1x128x64xbf16> to vector<128x64xbf16>
    %cst_132 = arith.constant dense<0.000000e+00> : vector<32x64xf32>
    %463 = tpu.matmul %460, %462, %cst_132 {dimension_numbers = #tpu.dot_dimension_numbers<[1], [0], [0], [1], [0, 0, 1, 1], [], []>} : vector<32x128xbf16>, vector<128x64xbf16>, vector<32x64xf32> -> vector<32x64xf32>
    %464 = arith.addf %432, %463 : vector<32x64xf32>
    %465 = arith.mulf %464, %464 : vector<32x64xf32>
    %cst_133 = arith.constant dense<0.000000e+00> : vector<32xf32>
    %466 = vector.multi_reduction <add>, %465, %cst_133 [1] : vector<32x64xf32> to vector<32xf32>
    %467 = vector.shape_cast %466 : vector<32xf32> to vector<32x1xf32>
    %cst_134 = arith.constant 6.400000e+01 : f32
    %468 = vector.broadcast %cst_134 : f32 to vector<32x1xf32>
    %469 = arith.divf %467, %468 : vector<32x1xf32>
    %cst_135 = arith.constant 9.99999997E-7 : f32
    %470 = vector.broadcast %cst_135 : f32 to vector<32x1xf32>
    %471 = arith.addf %469, %470 : vector<32x1xf32>
    %472 = math.rsqrt %471 : vector<32x1xf32>
    %473 = vector.broadcast %472 : vector<32x1xf32> to vector<32x64xf32>
    %474 = arith.mulf %464, %473 : vector<32x64xf32>
    %c0_136 = arith.constant 0 : index
    %c0_137 = arith.constant 0 : index
    %475 = vector.load %arg9[%c0_136, %c0_137] : memref<1x64xf32, #tpu.memory_space<vmem>>, vector<1x64xf32>
    %476 = vector.broadcast %475 : vector<1x64xf32> to vector<32x64xf32>
    %477 = arith.mulf %474, %476 : vector<32x64xf32>
    %c0_138 = arith.constant 0 : index
    %c0_139 = arith.constant 0 : index
    %478 = vector.load %arg10[%c0_138, %c0_139] : memref<32x64xf32, #tpu.memory_space<vmem>>, vector<32x64xf32>
    tpu.vector_store %arg10[%c0_138, %c0_139], %477 {strides = array<i32>} : memref<32x64xf32, #tpu.memory_space<vmem>>, vector<32x64xf32>,
    return
  }
  func.func @transform_0(%arg0: i32) -> (i32, i32) {
    %c0_i32 = arith.constant 0 : i32
    %c0_i32_0 = arith.constant 0 : i32
    %c0_i32_1 = arith.constant 0 : i32
    return %c0_i32, %c0_i32_0 : i32, i32
  }
  func.func @transform_1(%arg0: i32) -> (i32, i32, i32) {
    %c0_i32 = arith.constant 0 : i32
    %c0_i32_0 = arith.constant 0 : i32
    %c0_i32_1 = arith.constant 0 : i32
    %c0_i32_2 = arith.constant 0 : i32
    return %c0_i32, %c0_i32_0, %c0_i32_1 : i32, i32, i32
  }
  func.func @transform_2(%arg0: i32) -> (i32, i32, i32) {
    %c0_i32 = arith.constant 0 : i32
    %c0_i32_0 = arith.constant 0 : i32
    %c0_i32_1 = arith.constant 0 : i32
    %c0_i32_2 = arith.constant 0 : i32
    return %c0_i32, %c0_i32_0, %c0_i32_1 : i32, i32, i32
  }
  func.func @transform_3(%arg0: i32) -> (i32, i32, i32) {
    %c0_i32 = arith.constant 0 : i32
    %c0_i32_0 = arith.constant 0 : i32
    %c0_i32_1 = arith.constant 0 : i32
    %c0_i32_2 = arith.constant 0 : i32
    return %c0_i32, %c0_i32_0, %c0_i32_1 : i32, i32, i32
  }
  func.func @transform_4(%arg0: i32) -> (i32, i32, i32) {
    %c0_i32 = arith.constant 0 : i32
    %c0_i32_0 = arith.constant 0 : i32
    %c0_i32_1 = arith.constant 0 : i32
    %c0_i32_2 = arith.constant 0 : i32
    return %c0_i32, %c0_i32_0, %c0_i32_1 : i32, i32, i32
  }
  func.func @transform_5(%arg0: i32) -> (i32, i32, i32) {
    %c0_i32 = arith.constant 0 : i32
    %c0_i32_0 = arith.constant 0 : i32
    %c0_i32_1 = arith.constant 0 : i32
    %c0_i32_2 = arith.constant 0 : i32
    return %c0_i32, %c0_i32_0, %c0_i32_1 : i32, i32, i32
  }
  func.func @transform_6(%arg0: i32) -> (i32, i32, i32) {
    %c0_i32 = arith.constant 0 : i32
    %c0_i32_0 = arith.constant 0 : i32
    %c0_i32_1 = arith.constant 0 : i32
    %c0_i32_2 = arith.constant 0 : i32
    return %c0_i32, %c0_i32_0, %c0_i32_1 : i32, i32, i32
  }
  func.func @transform_7(%arg0: i32) -> (i32, i32, i32) {
    %c0_i32 = arith.constant 0 : i32
    %c0_i32_0 = arith.constant 0 : i32
    %c0_i32_1 = arith.constant 0 : i32
    %c0_i32_2 = arith.constant 0 : i32
    return %c0_i32, %c0_i32_0, %c0_i32_1 : i32, i32, i32
  }
  func.func @transform_8(%arg0: i32) -> (i32, i32) {
    %c0_i32 = arith.constant 0 : i32
    %c0_i32_0 = arith.constant 0 : i32
    %c0_i32_1 = arith.constant 0 : i32
    return %c0_i32, %c0_i32_0 : i32, i32
  }
  func.func @transform_9(%arg0: i32) -> (i32, i32) {
    %c0_i32 = arith.constant 0 : i32
    %c0_i32_0 = arith.constant 0 : i32
    %c0_i32_1 = arith.constant 0 : i32
    return %c0_i32, %c0_i32_0 : i32, i32
  }
}

</mosaic_0001>

<bundles_post_ra>
// kernel: tpu_custom_call.1
= control target key start
LH: loop header
LB: loop body
LE: loop exit
PB: predicated region body
PF: predicated region fallthrough
CT: control target
= control target key end

     0   :  { %14 = vsyncpa [#allocation3], 0  ;;  %s5163_s0 = inlined_call_operand.hbm [shape: f32[32,64], index: 0, kind: input, shape index: {}]   ;;  %s5164_s1 = inlined_call_operand.vmem [shape: f32[2,1,16], index: 1, kind: input, shape index: {}]   ;;  %s5165_s2 = inlined_call_operand.vmem [shape: bf16[2,64,192], index: 2, kind: input, shape index: {}]   ;;  %s5166_s3 = inlined_call_operand.vmem [shape: bf16[2,64,64], index: 3, kind: input, shape index: {}]   ;;  %s5167_s4 = inlined_call_operand.hbm [shape: bf16[2,64,256], index: 4, kind: input, shape index: {}]   ;;  %s5168_s5 = inlined_call_operand.vmem [shape: bf16[2,128,64], index: 5, kind: input, shape index: {}]   ;;  %s5169_s6 = inlined_call_operand.vmem [shape: f32[2,1,64], index: 6, kind: input, shape index: {}]   ;;  %s5170_s7 = inlined_call_operand.vmem [shape: f32[2,1,64], index: 7, kind: input, shape index: {}]   ;;  %s5171_s8 = inlined_call_operand.vmem [shape: f32[1,64], index: 8, kind: input, shape index: {}]   ;;  %s5172_s9 = inlined_call_operand.hbm [shape: f32[32,64], index: 9, kind: output, shape index: {}]  }
   0x1   :  { %15 = vsyncpa [#allocation6], 0 }
   0x2   :  { %16 = vsyncpa [#allocation4], 0  ;;  %s4234_s30 = smov [#allocation2]  }
   0x3   :  { %s22_s10 = sshll.u32 %s4234_s30, 4  ;;  %s23_s10 = int_to_ptr.vmem [resolvable:$true] %s22_s10 }
   0x4   :  { %s4176_s11 = scalar_lea.vmem %s23_s10, 512  ;;  %p4181_p1 = scmp.lt.s32.totalorder %s23_s10, %s23_s10 }
   0x5   :  { %p4177_p0 = scmp.ne.s32.totalorder %s23_s10, %s4176_s11  ;;  %p4182_p2 = scmp.lt.s32.totalorder %s4176_s11, %s4176_s11 }
   0x7   :  { %p4183_p3 = por %p4182_p2, %p4181_p1 }
   0x9   :  { %p4184_p4 = pnand %p4183_p3, %p4177_p0 }
   0xb   :  { %4187 = shalt.err (!%p4184_p4)
}
   0xc   :  { %s4235_s12 = smov 128   ;;  %s4236_s13 = smov 8  }
   0xd   :  { %28 = dma.hbm_to_vmem [thread:$0]  %s5163_s0, 512, %s23_s10, [#allocation3], %s4235_s12, %s4235_s12, %s4236_s13  }
   0xe   :  { %s4237_s16 = smov [#allocation5]  }
   0xf   :  { %s40_s17 = sshll.u32 %s4237_s16, 4  ;;  %s41_s17 = int_to_ptr.vmem [resolvable:$true] %s40_s17 }
  0x10   :  { %s4196_s18 = scalar_lea.vmem %s41_s17, 2048  ;;  %p4201_p6 = scmp.lt.s32.totalorder %s41_s17, %s41_s17 }
  0x11   :  { %p4197_p5 = scmp.ne.s32.totalorder %s41_s17, %s4196_s18  ;;  %p4202_p7 = scmp.lt.s32.totalorder %s4196_s18, %s4196_s18 }
  0x13   :  { %p4203_p8 = por %p4202_p7, %p4201_p6 }
  0x15   :  { %p4204_p9 = pnand %p4203_p8, %p4197_p5 }
  0x17   :  { %4207 = shalt.err (!%p4204_p9)
}
  0x18   :  { %46 = dma.hbm_to_vmem [thread:$0]  %s5167_s4, 2048, %s41_s17, [#allocation6], %s4235_s12, %s4235_s12, %s4236_s13  }
  0x19   :  { %4228 = dma.done.wait [#allocation3], 512  }
  0x1a   :  { %4229 = vsyncadd [#allocation3], 4294966784 }
  0x1b   :  { %4230 = dma.done.wait [#allocation6], 2048  }
  0x1c   :  { %4231 = vsyncadd [#allocation6], 4294965248  ;;  %v62_v0 = vld [vmem:[#allocation2] sm:$0xff]  ;;  %vm70_vm0 = vcmask 523264   ;;  %v63_v1 = vld [vmem:[#allocation2 + $0x8] sm:$0xff]  ;;  %v4238_v11 = vmov 0  }
  0x1d   :  { %v66_v2 = vmul.f32 %v62_v0, %v62_v0  ;;  %v67_v3 = vmul.f32 %v63_v1, %v63_v1  ;;  %v3890_v6 = vld [vmem:[%s5165_s2 + $0x34] ss:$8 sps:$4 sm:$0xff]   ;;  %v3892_v7 = vld [vmem:[%s5165_s2 + $0x30] ss:$8 sps:$4 sm:$0xff]   ;;  %v3893_v8 = vld [vmem:[%s5165_s2 + $0x24] ss:$8 sps:$4 sm:$0xff]   ;;  %199 = vmatprep.mubr.bf16.mxu0 %v4238_v11  ;;  %209 = vmatprep.mubr.bf16.mxu1 %v4238_v11 }
  0x1e   :  { %175 = vmatprep.subr.bf16.mxu0 %v3890_v6  ;;  %v3895_v9 = vld [vmem:[%s5165_s2 + $0x20] ss:$8 sps:$4 sm:$0xff]   ;;  %v3896_v10 = vld [vmem:[%s5165_s2 + $0x14] ss:$8 sps:$4 sm:$0xff]   ;;  %3807 = vmatprep.subr.bf16.mxu1 %v3890_v6  ;;  %v3898_v12 = vld [vmem:[%s5165_s2 + $0x10] ss:$8 sps:$4 sm:$0xff]  }
  0x1f   :  { %v71_v4 = vsel %vm70_vm0, %v66_v2, 0.0  ;;  %v74_v5 = vsel %vm70_vm0, %v67_v3, 0.0  ;;  %176 = vmatpush1.bf16.msra.mxu0 %v3892_v7  ;;  %3811 = vmatpush1.bf16.msra.mxu1 %v3892_v7  ;;  %v3899_v13 = vld [vmem:[%s5165_s2 + $0x4] ss:$8 sps:$4 sm:$0xff]   ;;  %v3901_v14 = vld [vmem:[%s5165_s2] ss:$8 sps:$4 sm:$0xff]  }
  0x20   :  { %72 = vadd.xlane.f32.xlu0 %v71_v4  ;;  %177 = vmatprep.subr.bf16.mxu0 %v3893_v8  ;;  %v64_v15 = vld [vmem:[#allocation2 + $0x10] sm:$0xff]  ;;  %v65_v16 = vld [vmem:[#allocation2 + $0x18] sm:$0xff]  ;;  %v3305_v30 = vld [vmem:[%s5169_s6] ss:$0 sm:$0xff]  ;;  %v4239_v48 = vmov 0.0   ;;  %vm4240_vm1 = vmmov 0  }
  0x21   :  { %3808 = vmatprep.subr.bf16.mxu1 %v3893_v8  ;;  %v68_v17 = vmul.f32 %v64_v15, %v64_v15  ;;  %v69_v18 = vmul.f32 %v65_v16, %v65_v16  ;;  %s4241_s18 = smov 64   ;;  %s4242_s19 = smov 112   ;;  %vm232_vm2 = vcmask 130048   ;;  %v4381_v62 = vld [vmem:[%s5164_s1] ss:$0 sm:$0xff]  ;;  %vm737_vm3 = vcmask 261120  }
  0x22   :  { %s4243_s20 = smov 32   ;;  %s4244_s0 = smov 96   ;;  %vm740_vm4 = vcmask 392192  }
  0x23   :  { %178 = vmatpush1.bf16.msra.mxu0 %v3895_v9  ;;  %3812 = vmatpush1.bf16.msra.mxu1 %v3895_v9  ;;  %v77_v19 = vsel %vm70_vm0, %v68_v17, 0.0  ;;  %v80_v20 = vsel %vm70_vm0, %v69_v18, 0.0  ;;  %s4245_s21 = smov 80   ;;  %s4246_s4 = smov 48  }
  0x24   :  { %75 = vadd.xlane.f32.xlu0 %v74_v5  ;;  %179 = vmatprep.subr.bf16.mxu0 %v3896_v10  ;;  %s4247_s22 = smov 16  }
  0x25   :  { %3809 = vmatprep.subr.bf16.mxu1 %v3896_v10  ;;  %78 = vadd.xlane.f32.xlu1 %v77_v19 }
  0x27   :  { %180 = vmatpush1.bf16.msra.mxu0 %v3898_v12  ;;  %3813 = vmatpush1.bf16.msra.mxu1 %v3898_v12 }
  0x28   :  { %181 = vmatprep.subr.bf16.mxu0 %v3899_v13  ;;  %3810 = vmatprep.subr.bf16.mxu1 %v3899_v13 }
  0x29   :  { %81 = vadd.xlane.f32.xlu1 %v80_v20 }
  0x2b   :  { %182 = vmatpush1.bf16.msra.mxu0 %v3901_v14  ;;  %3814 = vmatpush1.bf16.msra.mxu1 %v3901_v14 }
  0x2c   :  { %3551 = vmatprep.subr.bf16.mxu1 %v4239_v48  ;;  %3569 = vmatprep.subr.bf16.mxu0 %v4239_v48 }
  0xa9   :  { %v73_v21 = vpop.xlane.xlu0 %72 }
  0xaa   :  { %v84_v22 = vmul.f32 0.015625, %v73_v21 }
  0xac   :  { %v88_v23 = vadd.f32 1e-06, %v84_v22 }
  0xad   :  { %v76_v24 = vpop.xlane.xlu0 %75 }
  0xae   :  { %3962 = vrsqrt.f32 %v88_v23  ;;  %v85_v25 = vmul.f32 0.015625, %v76_v24  ;;  %v79_v35 = vpop.xlane.xlu1 %78 }
  0xaf   :  { %v86_v36 = vmul.f32 0.015625, %v79_v35 }
  0xb0   :  { %v89_v26 = vadd.f32 1e-06, %v85_v25 }
  0xb1   :  { %v90_v37 = vadd.f32 1e-06, %v86_v36 }
  0xb2   :  { %3964 = vrsqrt.f32 %v89_v26  ;;  %v82_v38 = vpop.xlane.xlu1 %81 }
  0xb3   :  { %3966 = vrsqrt.f32 %v90_v37  ;;  %v87_v39 = vmul.f32 0.015625, %v82_v38 }
  0xb5   :  { %v91_v40 = vadd.f32 1e-06, %v87_v39 }
  0xb7   :  { %3968 = vrsqrt.f32 %v91_v40 }
  0xbb   :  { %v3963_v27 = vpop.eup %3962 }
  0xbc   :  { %v96_v28 = vmul.f32 %v3963_v27, %v62_v0 }
  0xbe   :  { %v107_v32 = vmul.f32 %v3305_v30, %v96_v28 }
  0xbf   :  { %v3965_v29 = vpop.eup %3964 }
  0xc0   :  { %v97_v31 = vmul.f32 %v3965_v29, %v63_v1  ;;  %v3967_v41 = vpop.eup %3966 }
  0xc1   :  { %v98_v42 = vmul.f32 %v3967_v41, %v64_v15 }
  0xc2   :  { %v108_v33 = vmul.f32 %v3305_v30, %v97_v31 }
  0xc3   :  { %v109_v45 = vmul.f32 %v3305_v30, %v98_v42 }
  0xc4   :  { %v111_v34 = vpack.c.bf16 %v108_v33, %v107_v32  ;;  %v3969_v43 = vpop.eup %3968 }
  0xc5   :  { %v99_v44 = vmul.f32 %v3969_v43, %v65_v16 }
  0xc6   :  { %3314 = vmatmul.mubr.msk.bf16.vlgmr.msra.gmra.mxu0 %vm70_vm0, %v111_v34 }
  0xc7   :  { %v110_v46 = vmul.f32 %v3305_v30, %v99_v44  ;;  %3571 = vmatprep.mubr.msk.bf16.mxu0 %vm4240_vm1, %v4239_v48 }
  0xc9   :  { %v112_v47 = vpack.c.bf16 %v110_v46, %v109_v45 }
  0xcb   :  { %3315 = vmatmul.mubr.msk.bf16.vlgmr.msra.gmra.mxu1 %vm70_vm0, %v112_v47 }
  0xcc   :  { %3553 = vmatprep.mubr.msk.bf16.mxu1 %vm4240_vm1, %v4239_v48 }
 0x186   :  { %v201_v49 = vpop.f32.mrf.mxu0 }
 0x188   :  { %v203_v50 = vpop.f32.mrf.mxu0 }
 0x18a   :  { %v205_v51 = vpop.f32.mrf.mxu0 }
 0x18b   :  { %v221_v52 = vpack.c.bf16 %v205_v51, %v201_v49  ;;  %v211_v53 = vpop.f32.mrf.mxu1 }
 0x18c   :  { %v207_v59 = vpop.f32.mrf.mxu0 }
 0x18d   :  { %230 = vrot.lane.b32.xlu0 %v221_v52, %s4241_s18  ;;  %v4357_v54 = vpop.f32.mrf.mxu1  ;;  %v4367_v60 = vpack.c.bf16 %v207_v59, %v203_v50 }
 0x18f   :  { %v215_v55 = vpop.f32.mrf.mxu1 }
 0x190   :  { %v4359_v57 = vpack.c.bf16 %v215_v55, %v211_v53 }
 0x191   :  { %347 = vrot.lane.b32.xlu0 %v221_v52, %s4242_s19  ;;  %v4376_v61 = vpop.f32.mrf.mxu1 }
 0x195   :  { %471 = vrot.lane.b32.xlu0 %v221_v52, %s4243_s20 }
 0x199   :  { %469 = vrot.lane.b32.xlu0 %v221_v52, %s4244_s0 }
 0x19d   :  { %590 = vrot.lane.b32.xlu0 %v221_v52, %s4245_s21 }
 0x1a1   :  { %872 = vrot.lane.b32.xlu0 %v4359_v57, %s4246_s4 }
 0x1a5   :  { %994 = vrot.lane.b32.xlu0 %v4359_v57, %s4243_s20 }
 0x1a9   :  { %1115 = vrot.lane.b32.xlu0 %v4359_v57, %s4247_s22 }
 0x1ff   :  { %v231_v56 = vpop.permute.xlu0 %230 }
 0x200   :  { %v237_v58 = vsel %vm232_vm2, %v231_v56, 0 }
 0x201   :  { %3552 = vmatpush3.bf16.xpose.msra.mxu1 %v237_v58 }
 0x202   :  { %3557 = vmatprep.subr.bf16.mxu1 %v4239_v48 }
 0x203   :  { %v348_v26 = vpop.permute.xlu0 %347 }
 0x207   :  { %v472_v28 = vpop.permute.xlu0 %471 }
 0x208   :  { %3554 = vmatmul.mubr.msk.bf16.vlgmr.msra.gmra.mxu1 %vm232_vm2, %v221_v52  ;;  %v477_v29 = vsel %vm232_vm2, %v472_v28, 0 }
 0x209   :  { %3558 = vmatpush3.bf16.msra.mxu1 %v4367_v60  ;;  %3559 = vmatprep.mubr.msk.bf16.mxu1 %vm4240_vm1, %v4239_v48 }
 0x20a   :  { %3563 = vmatprep.subr.bf16.mxu1 %v4239_v48 }
 0x20b   :  { %v470_v31 = vpop.permute.xlu0 %469 }
 0x20f   :  { %v591_v34 = vpop.permute.xlu0 %590 }
 0x213   :  { %v873_v36 = vpop.permute.xlu0 %872 }
 0x214   :  { %v878_v37 = vsel %vm232_vm2, %v873_v36, 0 }
 0x217   :  { %v995_v38 = vpop.permute.xlu0 %994 }
 0x218   :  { %v1000_v40 = vsel %vm232_vm2, %v995_v38, 0 }
 0x21b   :  { %v1116_v41 = vpop.permute.xlu0 %1115 }
 0x21c   :  { %v1121_v43 = vsel %vm232_vm2, %v1116_v41, 0 }
 0x2c8   :  { %v273_v63 = vpop.f32.mrf.mxu1 }
 0x2c9   :  { %v274_v0 = vadd.f32 %v4381_v62, %v273_v63 }
 0x2ca   :  { %v3555_v1 = vpop.f32.mrf.mxu1 }
 0x2cb   :  { %v280_v2 = vsel %vm232_vm2, %v274_v0, -inf }
 0x2cc   :  { %281 = vmax.xlane.f32.xlu1 %v280_v2  ;;  %v276_v3 = vpop.f32.mrf.mxu1 }
 0x2cd   :  { %v277_v4 = vadd.f32 %v4381_v62, %v276_v3 }
 0x2ce   :  { %v3556_v5 = vpop.f32.mrf.mxu1 }
 0x2cf   :  { %v283_v6 = vsel %vm232_vm2, %v277_v4, -inf }
 0x2d0   :  { %284 = vmax.xlane.f32.xlu1 %v283_v6 }
 0x355   :  { %v282_v7 = vpop.xlane.xlu1 %281 }
 0x356   :  { %v286_v8 = vsub.f32 %v274_v0, %v282_v7 }
 0x358   :  { %v288_v9 = vmul.f32 1.442695, %v286_v8 }
 0x359   :  { %v285_v10 = vpop.xlane.xlu1 %284 }
 0x35a   :  { %3970 = vpow2.f32 %v288_v9  ;;  %v287_v12 = vsub.f32 %v277_v4, %v285_v10 }
 0x35c   :  { %v290_v13 = vmul.f32 1.442695, %v287_v12 }
 0x35e   :  { %3972 = vpow2.f32 %v290_v13 }
 0x367   :  { %v3971_v14 = vpop.eup %3970 }
 0x368   :  { %v292_v15 = vsel %vm232_vm2, %v3971_v14, 0.0 }
 0x369   :  { %293 = vadd.xlane.f32.xlu1 %v292_v15 }
 0x36b   :  { %v3973_v16 = vpop.eup %3972 }
 0x36c   :  { %v295_v17 = vsel %vm232_vm2, %v3973_v16, 0.0 }
 0x36d   :  { %296 = vadd.xlane.f32.xlu1 %v295_v17 }
 0x37e   :  { %349 = vrot.lane.b32.xlu1 %v221_v52, %s4246_s4 }
 0x382   :  { %592 = vrot.lane.b32.xlu1 %v221_v52, %s4247_s22 }
 0x386   :  { %754 = vrot.lane.b32.xlu1 %v4359_v57, %s4241_s18 }
 0x38a   :  { %870 = vrot.lane.b32.xlu1 %v4359_v57, %s4242_s19 }
 0x38e   :  { %992 = vrot.lane.b32.xlu1 %v4359_v57, %s4244_s0 }
 0x392   :  { %1113 = vrot.lane.b32.xlu1 %v4359_v57, %s4245_s21 }
 0x3f2   :  { %v294_v18 = vpop.xlane.xlu1 %293 }
 0x3f3   :  { %3974 = vrcp.f32 %v294_v18 }
 0x3f6   :  { %v297_v19 = vpop.xlane.xlu1 %296 }
 0x3f7   :  { %3976 = vrcp.f32 %v297_v19 }
 0x3fa   :  { %v350_v24 = vpop.permute.xlu1 %349 }
 0x3fb   :  { %v355_v27 = vsel %vm232_vm2, %v350_v24, 0 }
 0x3fe   :  { %v593_v30 = vpop.permute.xlu1 %592 }
 0x3ff   :  { %v598_v32 = vsel %vm232_vm2, %v593_v30, 0 }
 0x400   :  { %v3975_v20 = vpop.eup %3974 }
 0x401   :  { %v300_v22 = vmul.f32 %v3975_v20, %v3971_v14  ;;  %v3326_v14 = vld [vmem:[%s5164_s1 + $0x1] ss:$0 sm:$0xff] }
 0x402   :  { %v755_v33 = vpop.permute.xlu1 %754 }
 0x403   :  { %v760_v35 = vsel %vm232_vm2, %v755_v33, 0 }
 0x404   :  { %v3977_v21 = vpop.eup %3976 }
 0x405   :  { %v301_v23 = vmul.f32 %v3977_v21, %v3973_v16 }
 0x406   :  { %v871_v39 = vpop.permute.xlu1 %870 }
 0x407   :  { %v302_v25 = vpack.c.bf16 %v301_v23, %v300_v22 }
 0x409   :  { %3560 = vmatmul.mubr.msk.bf16.vlgmr.msra.gmra.mxu1 %vm232_vm2, %v302_v25 }
 0x40a   :  { %3564 = vmatpush3.bf16.xpose.msra.mxu1 %v355_v27  ;;  %3565 = vmatprep.mubr.msk.bf16.mxu1 %vm4240_vm1, %v4239_v48  ;;  %v993_v42 = vpop.permute.xlu1 %992 }
 0x40b   :  { %3575 = vmatprep.subr.bf16.mxu1 %v4239_v48 }
 0x40e   :  { %v1114_v44 = vpop.permute.xlu1 %1113 }
 0x411   :  { %3566 = vmatmul.mubr.msk.bf16.vlgmr.msra.gmra.mxu1 %vm232_vm2, %v348_v26 }
 0x412   :  { %3576 = vmatpush3.bf16.xpose.msra.mxu1 %v477_v29  ;;  %3577 = vmatprep.mubr.msk.bf16.mxu1 %vm4240_vm1, %v4239_v48 }
 0x413   :  { %3587 = vmatprep.subr.bf16.mxu1 %v4239_v48 }
 0x419   :  { %3578 = vmatmul.mubr.msk.bf16.vlgmr.msra.gmra.mxu1 %vm232_vm2, %v470_v31 }
 0x41a   :  { %3588 = vmatpush3.bf16.xpose.msra.mxu1 %v598_v32  ;;  %3589 = vmatprep.mubr.msk.bf16.mxu1 %vm4240_vm1, %v4239_v48 }
 0x41b   :  { %3599 = vmatprep.subr.bf16.mxu1 %v4239_v48 }
 0x421   :  { %3590 = vmatmul.mubr.msk.bf16.vlgmr.msra.gmra.mxu1 %vm232_vm2, %v591_v34 }
 0x422   :  { %3600 = vmatpush3.bf16.xpose.msra.mxu1 %v760_v35  ;;  %3601 = vmatprep.mubr.msk.bf16.mxu1 %vm4240_vm1, %v4239_v48 }
 0x423   :  { %3611 = vmatprep.subr.bf16.mxu1 %v4239_v48 }
 0x429   :  { %3602 = vmatmul.mubr.msk.bf16.vlgmr.msra.gmra.mxu1 %vm232_vm2, %v4359_v57 }
 0x42a   :  { %3612 = vmatpush3.bf16.xpose.msra.mxu1 %v878_v37  ;;  %3613 = vmatprep.mubr.msk.bf16.mxu1 %vm4240_vm1, %v4239_v48 }
 0x42b   :  { %3623 = vmatprep.subr.bf16.mxu1 %v4239_v48 }
 0x431   :  { %3614 = vmatmul.mubr.msk.bf16.vlgmr.msra.gmra.mxu1 %vm232_vm2, %v871_v39 }
 0x432   :  { %3624 = vmatpush3.bf16.xpose.msra.mxu1 %v1000_v40  ;;  %3625 = vmatprep.mubr.msk.bf16.mxu1 %vm4240_vm1, %v4239_v48 }
 0x433   :  { %3635 = vmatprep.subr.bf16.mxu1 %v4239_v48 }
 0x439   :  { %3626 = vmatmul.mubr.msk.bf16.vlgmr.msra.gmra.mxu1 %vm232_vm2, %v993_v42 }
 0x43a   :  { %3636 = vmatpush3.bf16.xpose.msra.mxu1 %v1121_v43  ;;  %3637 = vmatprep.mubr.msk.bf16.mxu1 %vm4240_vm1, %v4239_v48 }
 0x441   :  { %3638 = vmatmul.mubr.msk.bf16.vlgmr.msra.gmra.mxu1 %vm232_vm2, %v1114_v44 }
 0x4c9   :  { %v4435_v45 = vpop.f32.mrf.mxu1 }
 0x4cb   :  { %v3561_v46 = vpop.f32.mrf.mxu1 }
 0x4cd   :  { %v4437_v47 = vpop.f32.mrf.mxu1 }
 0x4cf   :  { %v3562_v49 = vpop.f32.mrf.mxu1 }
 0x4d1   :  { %v391_v50 = vpop.f32.mrf.mxu1 }
 0x4d2   :  { %v4440_v51 = vadd.f32 %v4381_v62, %v391_v50 }
 0x4d3   :  { %v3567_v52 = vpop.f32.mrf.mxu1 }
 0x4d4   :  { %v398_v53 = vsel %vm232_vm2, %v4440_v51, -inf }
 0x4d5   :  { %399 = vmax.xlane.f32.xlu0 %v398_v53  ;;  %v394_v55 = vpop.f32.mrf.mxu1 }
 0x4d6   :  { %v4445_v56 = vadd.f32 %v4381_v62, %v394_v55 }
 0x4d7   :  { %v3568_v57 = vpop.f32.mrf.mxu1 }
 0x4d8   :  { %v401_v58 = vsel %vm232_vm2, %v4445_v56, -inf }
 0x4d9   :  { %402 = vmax.xlane.f32.xlu1 %v401_v58  ;;  %v513_v59 = vpop.f32.mrf.mxu1 }
 0x4da   :  { %v4450_v63 = vadd.f32 %v4381_v62, %v513_v59 }
 0x4db   :  { %v3579_v0 = vpop.f32.mrf.mxu1 }
 0x4dc   :  { %v520_v1 = vsel %vm232_vm2, %v4450_v63, -inf }
 0x4dd   :  { %521 = vmax.xlane.f32.xlu0 %v520_v1  ;;  %v516_v2 = vpop.f32.mrf.mxu1 }
 0x4de   :  { %v4455_v3 = vadd.f32 %v4381_v62, %v516_v2 }
 0x4df   :  { %v3580_v4 = vpop.f32.mrf.mxu1 }
 0x4e0   :  { %v523_v5 = vsel %vm232_vm2, %v4455_v3, -inf }
 0x4e1   :  { %524 = vmax.xlane.f32.xlu0 %v523_v5  ;;  %v634_v6 = vpop.f32.mrf.mxu1 }
 0x4e2   :  { %v4460_v7 = vadd.f32 %v4381_v62, %v634_v6 }
 0x4e3   :  { %v3591_v8 = vpop.f32.mrf.mxu1 }
 0x4e4   :  { %v641_v9 = vsel %vm232_vm2, %v4460_v7, -inf }
 0x4e5   :  { %642 = vmax.xlane.f32.xlu0 %v641_v9  ;;  %v637_v10 = vpop.f32.mrf.mxu1 }
 0x4e6   :  { %v4465_v12 = vadd.f32 %v4381_v62, %v637_v10 }
 0x4e7   :  { %v3592_v13 = vpop.f32.mrf.mxu1 }
 0x4e8   :  { %v644_v15 = vsel %vm232_vm2, %v4465_v12, -inf }
 0x4e9   :  { %645 = vmax.xlane.f32.xlu1 %v644_v15  ;;  %v796_v16 = vpop.f32.mrf.mxu1 }
 0x4ea   :  { %v4472_v17 = vadd.f32 %v3326_v14, %v796_v16 }
 0x4eb   :  { %v3603_v18 = vpop.f32.mrf.mxu1 }
 0x4ec   :  { %v803_v19 = vsel %vm232_vm2, %v4472_v17, -inf }
 0x4ed   :  { %804 = vmax.xlane.f32.xlu0 %v803_v19  ;;  %v799_v20 = vpop.f32.mrf.mxu1 }
 0x4ee   :  { %v4476_v62 = vadd.f32 %v3326_v14, %v799_v20 }
 0x4ef   :  { %v3604_v21 = vpop.f32.mrf.mxu1 }
 0x4f0   :  { %v806_v22 = vsel %vm232_vm2, %v4476_v62, -inf }
 0x4f1   :  { %807 = vmax.xlane.f32.xlu1 %v806_v22  ;;  %v914_v23 = vpop.f32.mrf.mxu1 }
 0x4f2   :  { %v4480_v24 = vadd.f32 %v3326_v14, %v914_v23 }
 0x4f3   :  { %v3615_v25 = vpop.f32.mrf.mxu1 }
 0x4f4   :  { %v921_v26 = vsel %vm232_vm2, %v4480_v24, -inf }
 0x4f5   :  { %922 = vmax.xlane.f32.xlu0 %v921_v26  ;;  %v917_v27 = vpop.f32.mrf.mxu1 }
 0x4f6   :  { %v4484_v28 = vadd.f32 %v3326_v14, %v917_v27 }
 0x4f7   :  { %v3616_v29 = vpop.f32.mrf.mxu1 }
 0x4f8   :  { %v924_v30 = vsel %vm232_vm2, %v4484_v28, -inf }
 0x4f9   :  { %925 = vmax.xlane.f32.xlu1 %v924_v30  ;;  %v1036_v31 = vpop.f32.mrf.mxu1 }
 0x4fa   :  { %v4488_v32 = vadd.f32 %v3326_v14, %v1036_v31 }
 0x4fb   :  { %v3627_v33 = vpop.f32.mrf.mxu1 }
 0x4fc   :  { %v1043_v34 = vsel %vm232_vm2, %v4488_v32, -inf }
 0x4fd   :  { %1044 = vmax.xlane.f32.xlu0 %v1043_v34  ;;  %v1039_v35 = vpop.f32.mrf.mxu1 }
 0x4fe   :  { %v4492_v36 = vadd.f32 %v3326_v14, %v1039_v35 }
 0x4ff   :  { %v3628_v37 = vpop.f32.mrf.mxu1 }
 0x500   :  { %v1046_v38 = vsel %vm232_vm2, %v4492_v36, -inf }
 0x501   :  { %1047 = vmax.xlane.f32.xlu1 %v1046_v38  ;;  %v1157_v39 = vpop.f32.mrf.mxu1 }
 0x502   :  { %v4496_v40 = vadd.f32 %v3326_v14, %v1157_v39 }
 0x503   :  { %v3639_v41 = vpop.f32.mrf.mxu1 }
 0x504   :  { %v1164_v42 = vsel %vm232_vm2, %v4496_v40, -inf }
 0x505   :  { %1165 = vmax.xlane.f32.xlu0 %v1164_v42  ;;  %v1160_v43 = vpop.f32.mrf.mxu1 }
 0x506   :  { %v4500_v44 = vadd.f32 %v3326_v14, %v1160_v43 }
 0x507   :  { %v3640_v46 = vpop.f32.mrf.mxu1 }
 0x508   :  { %v1167_v49 = vsel %vm232_vm2, %v4500_v44, -inf }
 0x509   :  { %1168 = vmax.xlane.f32.xlu1 %v1167_v49 }
 0x51a   :  { %543 = vrot.lane.b32.xlu1 %v4367_v60, %s4244_s0 }
 0x51b   :  { %422 = vrot.lane.b32.xlu0 %v4367_v60, %s4242_s19 }
 0x55e   :  { %v400_v50 = vpop.xlane.xlu0 %399 }
 0x55f   :  { %v404_v52 = vsub.f32 %v4440_v51, %v400_v50 }
 0x561   :  { %v406_v53 = vmul.f32 1.442695, %v404_v52 }
 0x562   :  { %v403_v55 = vpop.xlane.xlu1 %402 }
 0x563   :  { %3978 = vpow2.f32 %v406_v53  ;;  %v405_v57 = vsub.f32 %v4445_v56, %v403_v55 }
 0x565   :  { %v408_v58 = vmul.f32 1.442695, %v405_v57 }
 0x566   :  { %v522_v59 = vpop.xlane.xlu0 %521 }
 0x567   :  { %3980 = vpow2.f32 %v408_v58  ;;  %v526_v0 = vsub.f32 %v4450_v63, %v522_v59 }
 0x569   :  { %v528_v1 = vmul.f32 1.442695, %v526_v0 }
 0x56a   :  { %v525_v2 = vpop.xlane.xlu0 %524 }
 0x56b   :  { %3982 = vpow2.f32 %v528_v1  ;;  %v527_v4 = vsub.f32 %v4455_v3, %v525_v2 }
 0x56d   :  { %v530_v5 = vmul.f32 1.442695, %v527_v4 }
 0x56e   :  { %v643_v6 = vpop.xlane.xlu0 %642 }
 0x56f   :  { %3984 = vpow2.f32 %v530_v5  ;;  %v647_v51 = vsub.f32 %v4460_v7, %v643_v6 }
 0x570   :  { %v4513_v8 = vpop.eup %3978 }
 0x571   :  { %v649_v9 = vmul.f32 1.442695, %v647_v51  ;;  %v410_v56 = vsel %vm232_vm2, %v4513_v8, 0.0  ;;  %v746_v51 = vpack.c.bf16 %v4376_v61, %v4357_v54 }
 0x572   :  { %v646_v10 = vpop.xlane.xlu1 %645  ;;  %411 = vadd.xlane.f32.xlu0 %v410_v56 }
 0x573   :  { %3986 = vpow2.f32 %v649_v9  ;;  %v648_v63 = vsub.f32 %v4465_v12, %v646_v10 }
 0x574   :  { %v4518_v13 = vpop.eup %3980 }
 0x575   :  { %v651_v14 = vmul.f32 1.442695, %v648_v63  ;;  %v413_v3 = vsel %vm232_vm2, %v4518_v13, 0.0 }
 0x576   :  { %v805_v15 = vpop.xlane.xlu0 %804  ;;  %414 = vadd.xlane.f32.xlu1 %v413_v3 }
 0x577   :  { %3988 = vpow2.f32 %v651_v14  ;;  %v809_v7 = vsub.f32 %v4472_v17, %v805_v15 }
 0x578   :  { %v4523_v16 = vpop.eup %3982 }
 0x579   :  { %v811_v18 = vmul.f32 1.442695, %v809_v7  ;;  %v532_v19 = vsel %vm232_vm2, %v4523_v16, 0.0 }
 0x57a   :  { %v808_v20 = vpop.xlane.xlu1 %807  ;;  %533 = vadd.xlane.f32.xlu0 %v532_v19 }
 0x57b   :  { %3990 = vpow2.f32 %v811_v18  ;;  %v810_v12 = vsub.f32 %v4476_v62, %v808_v20 }
 0x57c   :  { %v4528_v21 = vpop.eup %3984 }
 0x57d   :  { %v813_v22 = vmul.f32 1.442695, %v810_v12  ;;  %v535_v23 = vsel %vm232_vm2, %v4528_v21, 0.0 }
 0x57e   :  { %v923_v25 = vpop.xlane.xlu0 %922  ;;  %536 = vadd.xlane.f32.xlu1 %v535_v23 }
 0x57f   :  { %3992 = vpow2.f32 %v813_v22  ;;  %v927_v17 = vsub.f32 %v4480_v24, %v923_v25 }
 0x580   :  { %v4533_v26 = vpop.eup %3986 }
 0x581   :  { %v929_v27 = vmul.f32 1.442695, %v927_v17  ;;  %v653_v29 = vsel %vm232_vm2, %v4533_v26, 0.0 }
 0x582   :  { %v926_v30 = vpop.xlane.xlu1 %925  ;;  %654 = vadd.xlane.f32.xlu0 %v653_v29 }
 0x583   :  { %3994 = vpow2.f32 %v929_v27  ;;  %v928_v62 = vsub.f32 %v4484_v28, %v926_v30 }
 0x584   :  { %v4538_v31 = vpop.eup %3988 }
 0x585   :  { %v931_v33 = vmul.f32 1.442695, %v928_v62  ;;  %v656_v34 = vsel %vm232_vm2, %v4538_v31, 0.0 }
 0x586   :  { %657 = vadd.xlane.f32.xlu1 %v656_v34  ;;  %v1045_v37 = vpop.xlane.xlu0 %1044 }
 0x587   :  { %3996 = vpow2.f32 %v931_v33  ;;  %v1049_v5 = vsub.f32 %v4488_v32, %v1045_v37 }
 0x588   :  { %v4542_v24 = vpop.eup %3990 }
 0x589   :  { %v815_v35 = vsel %vm232_vm2, %v4542_v24, 0.0  ;;  %v1051_v6 = vmul.f32 1.442695, %v1049_v5 }
 0x58a   :  { %v1048_v38 = vpop.xlane.xlu1 %1047  ;;  %816 = vadd.xlane.f32.xlu0 %v815_v35 }
 0x58b   :  { %v1050_v39 = vsub.f32 %v4492_v36, %v1048_v38 }
 0x58c   :  { %v4547_v41 = vpop.eup %3992 }
 0x58d   :  { %v1053_v28 = vmul.f32 1.442695, %v1050_v39  ;;  %v818_v42 = vsel %vm232_vm2, %v4547_v41, 0.0 }
 0x58e   :  { %v1166_v43 = vpop.xlane.xlu0 %1165  ;;  %819 = vadd.xlane.f32.xlu1 %v818_v42 }
 0x58f   :  { %3998 = vpow2.f32 %v1053_v28  ;;  %v1170_v46 = vsub.f32 %v4496_v40, %v1166_v43 }
 0x590   :  { %v4552_v49 = vpop.eup %3994 }
 0x591   :  { %v1172_v50 = vmul.f32 1.442695, %v1170_v46  ;;  %v933_v52 = vsel %vm232_vm2, %v4552_v49, 0.0 }
 0x592   :  { %v423_v53 = vpop.permute.xlu0 %422  ;;  %934 = vadd.xlane.f32.xlu1 %v933_v52  ;;  %v1169_v36 = vpop.xlane.xlu1 %1168 }
 0x593   :  { %4000 = vpow2.f32 %v1172_v50  ;;  %v1171_v55 = vsub.f32 %v4500_v44, %v1169_v36  ;;  %3570 = vmatpush3.bf16.msra.mxu0 %v423_v53 }
 0x594   :  { %v4557_v57 = vpop.eup %3996  ;;  %3581 = vmatprep.subr.bf16.mxu0 %v4239_v48 }
 0x595   :  { %v1174_v58 = vmul.f32 1.442695, %v1171_v55  ;;  %v936_v40 = vsel %vm232_vm2, %v4557_v57, 0.0 }
 0x596   :  { %937 = vadd.xlane.f32.xlu1 %v936_v40  ;;  %v544_v56 = vpop.permute.xlu1 %543 }
 0x597   :  { %4002 = vpow2.f32 %v1174_v58 }
 0x598   :  { %4004 = vpow2.f32 %v1051_v6 }
 0x59c   :  { %v4562_v59 = vpop.eup %3998 }
 0x59d   :  { %v1058_v0 = vsel %vm232_vm2, %v4562_v59, 0.0 }
 0x59e   :  { %1059 = vadd.xlane.f32.xlu1 %v1058_v0 }
 0x5a0   :  { %v4566_v1 = vpop.eup %4000  ;;  %664 = vrot.lane.b32.xlu0 %v4367_v60, %s4245_s21 }
 0x5a1   :  { %v1176_v44 = vsel %vm232_vm2, %v4566_v1, 0.0 }
 0x5a2   :  { %1177 = vadd.xlane.f32.xlu1 %v1176_v44 }
 0x5a4   :  { %v4572_v2 = vpop.eup %4002 }
 0x5a5   :  { %v1179_v4 = vsel %vm232_vm2, %v4572_v2, 0.0  ;;  %v4580_v60 = vpop.eup %4004 }
 0x5a6   :  { %1180 = vadd.xlane.f32.xlu1 %v1179_v4  ;;  %v1055_v9 = vsel %vm232_vm2, %v4580_v60, 0.0 }
 0x5b7   :  { %945 = vrot.lane.b32.xlu1 %v746_v51, %s4242_s19 }
 0x5bf   :  { %1056 = vadd.xlane.f32.xlu0 %v1055_v9 }
 0x5d5   :  { %1066 = vrot.lane.b32.xlu0 %v746_v51, %s4244_s0 }
 0x5d9   :  { %1187 = vrot.lane.b32.xlu0 %v746_v51, %s4245_s21 }
 0x5fb   :  { %v412_v32 = vpop.xlane.xlu0 %411 }
 0x5fc   :  { %4006 = vrcp.f32 %v412_v32 }
 0x5ff   :  { %v415_v10 = vpop.xlane.xlu1 %414 }
 0x600   :  { %4008 = vrcp.f32 %v415_v10 }
 0x603   :  { %v534_v63 = vpop.xlane.xlu0 %533 }
 0x604   :  { %4010 = vrcp.f32 %v534_v63 }
 0x607   :  { %v537_v54 = vpop.xlane.xlu1 %536 }
 0x608   :  { %4012 = vrcp.f32 %v537_v54 }
 0x609   :  { %v4007_v61 = vpop.eup %4006 }
 0x60a   :  { %v418_v15 = vmul.f32 %v4007_v61, %v4513_v8 }
 0x60b   :  { %v655_v14 = vpop.xlane.xlu0 %654 }
 0x60c   :  { %4014 = vrcp.f32 %v655_v14 }
 0x60d   :  { %v4009_v3 = vpop.eup %4008 }
 0x60e   :  { %v419_v7 = vmul.f32 %v4009_v3, %v4518_v13 }
 0x60f   :  { %v658_v18 = vpop.xlane.xlu1 %657 }
 0x610   :  { %4016 = vrcp.f32 %v658_v18  ;;  %v420_v19 = vpack.c.bf16 %v419_v7, %v418_v15 }
 0x611   :  { %v4011_v20 = vpop.eup %4010 }
 0x612   :  { %3572 = vmatmul.mubr.msk.bf16.vlgmr.msra.gmra.mxu0 %vm232_vm2, %v420_v19  ;;  %v540_v23 = vmul.f32 %v4011_v20, %v4523_v16 }
 0x613   :  { %3582 = vmatpush3.bf16.msra.mxu0 %v544_v56  ;;  %v817_v12 = vpop.xlane.xlu0 %816  ;;  %3583 = vmatprep.mubr.msk.bf16.mxu0 %vm4240_vm1, %v4239_v48 }
 0x614   :  { %3593 = vmatprep.subr.bf16.mxu0 %v4239_v48  ;;  %4018 = vrcp.f32 %v817_v12  ;;  %v3902_v12 = vld [vmem:[%s5166_s3 + $0x18] sm:$0xff]  }
 0x615   :  { %v4013_v22 = vpop.eup %4012  ;;  %3647 = vmatprep.subr.bf16.mxu1 %v3902_v12 }
 0x616   :  { %v541_v8 = vmul.f32 %v4013_v22, %v4528_v21  ;;  %3648 = vmatpush3.bf16.msra.mxu1 %v3902_v12  ;;  %v4165_v12 = vld [vmem:[#allocation2 + $0x8] sm:$0xff] }
 0x617   :  { %v820_v13 = vpop.xlane.xlu1 %819  ;;  %v665_v17 = vpop.permute.xlu0 %664 }
 0x618   :  { %4020 = vrcp.f32 %v820_v13  ;;  %v542_v25 = vpack.c.bf16 %v541_v8, %v540_v23 }
 0x619   :  { %v4015_v27 = vpop.eup %4014 }
 0x61a   :  { %3584 = vmatmul.mubr.msk.bf16.vlgmr.msra.gmra.mxu0 %vm232_vm2, %v542_v25  ;;  %v661_v62 = vmul.f32 %v4015_v27, %v4533_v26  ;;  %v3904_v27 = vld [vmem:[%s5166_s3 + $0x8] sm:$0xff]  }
 0x61b   :  { %3594 = vmatpush3.bf16.msra.mxu0 %v665_v17  ;;  %v935_v29 = vpop.xlane.xlu1 %934  ;;  %3595 = vmatprep.mubr.msk.bf16.mxu0 %vm4240_vm1, %v4239_v48  ;;  %v3903_v17 = vld [vmem:[%s5166_s3 + $0x10] sm:$0xff]  }
 0x61c   :  { %3605 = vmatprep.subr.bf16.mxu0 %v4239_v48  ;;  %3649 = vmatprep.subr.bf16.mxu1 %v3903_v17 }
 0x61d   :  { %v4017_v30 = vpop.eup %4016  ;;  %3650 = vmatpush3.bf16.msra.mxu1 %v3903_v17 }
 0x61e   :  { %v662_v16 = vmul.f32 %v4017_v30, %v4538_v31  ;;  %3651 = vmatprep.subr.bf16.mxu1 %v3904_v27 }
 0x61f   :  { %v938_v21 = vpop.xlane.xlu1 %937 }
 0x620   :  { %v663_v33 = vpack.c.bf16 %v662_v16, %v661_v62  ;;  %4022 = vrcp.f32 %v938_v21  ;;  %v3905_v62 = vld [vmem:[%s5166_s3] sm:$0xff]  }
 0x621   :  { %v4019_v34 = vpop.eup %4018  ;;  %4024 = vrcp.f32 %v935_v29  ;;  %3652 = vmatpush3.bf16.msra.mxu1 %v3904_v27 }
 0x622   :  { %3596 = vmatmul.mubr.msk.bf16.vlgmr.msra.gmra.mxu0 %vm232_vm2, %v663_v33  ;;  %v823_v37 = vmul.f32 %v4019_v34, %v4542_v24  ;;  %3653 = vmatprep.subr.bf16.mxu1 %v3905_v62 }
 0x623   :  { %3606 = vmatpush3.bf16.msra.mxu0 %v746_v51  ;;  %3607 = vmatprep.mubr.msk.bf16.mxu0 %vm4240_vm1, %v4239_v48 }
 0x624   :  { %3617 = vmatprep.subr.bf16.mxu0 %v4239_v48 }
 0x625   :  { %v4021_v35 = vpop.eup %4020  ;;  %3654 = vmatpush3.bf16.msra.mxu1 %v3905_v62  ;;  %v3906_v62 = vld [vmem:[#allocation5 + $0x30] ss:$8 sps:$4 sm:$0xff]  }
 0x626   :  { %v824_v26 = vmul.f32 %v4021_v35, %v4547_v41 }
 0x627   :  { %v1060_v38 = vpop.xlane.xlu1 %1059 }
 0x628   :  { %v825_v31 = vpack.c.bf16 %v824_v26, %v823_v37  ;;  %4026 = vrcp.f32 %v1060_v38 }
 0x62a   :  { %3608 = vmatmul.mubr.msk.bf16.vlgmr.msra.gmra.mxu0 %vm232_vm2, %v825_v31 }
 0x62b   :  { %v1178_v39 = vpop.xlane.xlu1 %1177  ;;  %3619 = vmatprep.mubr.msk.bf16.mxu0 %vm4240_vm1, %v4239_v48 }
 0x62d   :  { %v4023_v28 = vpop.eup %4022 }
 0x62e   :  { %v4025_v43 = vpop.eup %4024  ;;  %v942_v46 = vmul.f32 %v4023_v28, %v4557_v57 }
 0x62f   :  { %v1181_v42 = vpop.xlane.xlu1 %1180  ;;  %v941_v52 = vmul.f32 %v4025_v43, %v4552_v49 }
 0x631   :  { %v943_v24 = vpack.c.bf16 %v942_v46, %v941_v52 }
 0x633   :  { %v946_v50 = vpop.permute.xlu1 %945 }
 0x634   :  { %3618 = vmatpush3.bf16.msra.mxu0 %v946_v50 }
 0x635   :  { %3629 = vmatprep.subr.bf16.mxu0 %v4239_v48  ;;  %v4027_v36 = vpop.eup %4026 }
 0x636   :  { %v1064_v57 = vmul.f32 %v4027_v36, %v4562_v59 }
 0x637   :  { %3620 = vmatmul.mubr.msk.bf16.vlgmr.msra.gmra.mxu0 %vm232_vm2, %v943_v24 }
 0x638   :  { %3631 = vmatprep.mubr.msk.bf16.mxu0 %vm4240_vm1, %v4239_v48 }
 0x648   :  { %v1057_v41 = vpop.xlane.xlu0 %1056 }
 0x649   :  { %4028 = vrcp.f32 %v1057_v41 }
 0x64a   :  { %4030 = vrcp.f32 %v1181_v42 }
 0x64b   :  { %4032 = vrcp.f32 %v1178_v39 }
 0x64c   :  { %v1067_v53 = vpop.permute.xlu0 %1066 }
 0x64d   :  { %3630 = vmatpush3.bf16.msra.mxu0 %v1067_v53 }
 0x64e   :  { %3641 = vmatprep.subr.bf16.mxu0 %v4239_v48 }
 0x650   :  { %v1188_v0 = vpop.permute.xlu0 %1187 }
 0x656   :  { %v4029_v49 = vpop.eup %4028 }
 0x657   :  { %v1063_v55 = vmul.f32 %v4029_v49, %v4580_v60  ;;  %v4031_v40 = vpop.eup %4030 }
 0x658   :  { %v4033_v44 = vpop.eup %4032  ;;  %v1185_v4 = vmul.f32 %v4031_v40, %v4572_v2 }
 0x659   :  { %v1065_v58 = vpack.c.bf16 %v1064_v57, %v1063_v55  ;;  %v1184_v5 = vmul.f32 %v4033_v44, %v4566_v1 }
 0x65b   :  { %3632 = vmatmul.mubr.msk.bf16.vlgmr.msra.gmra.mxu0 %vm232_vm2, %v1065_v58  ;;  %v1186_v6 = vpack.c.bf16 %v1185_v4, %v1184_v5 }
 0x65c   :  { %3642 = vmatpush3.bf16.msra.mxu0 %v1188_v0  ;;  %3643 = vmatprep.mubr.msk.bf16.mxu0 %vm4240_vm1, %v4239_v48 }
 0x663   :  { %3644 = vmatmul.mubr.msk.bf16.vlgmr.msra.gmra.mxu0 %vm232_vm2, %v1186_v6 }
 0x664   :  { %1488 = vmatprep.mubr.bf16.mxu0 %v4238_v11 }
 0x6d2   :  { %v462_v59 = vpop.f32.mrf.mxu0 }
 0x6d4   :  { %v3573_v51 = vpop.f32.mrf.mxu0 }
 0x6d6   :  { %v465_v60 = vpop.f32.mrf.mxu0 }
 0x6d7   :  { %v3830_v9 = vpack.i.bf16 %v465_v60, %v462_v59 }
 0x6d8   :  { %v3574_v56 = vpop.f32.mrf.mxu0 }
 0x6d9   :  { %3831 = vrot.lane.b32.xlu0 %v3830_v9, %s4247_s22 }
 0x6da   :  { %v583_v32 = vpop.f32.mrf.mxu0 }
 0x6dc   :  { %v3585_v10 = vpop.f32.mrf.mxu0 }
 0x6de   :  { %v586_v63 = vpop.f32.mrf.mxu0 }
 0x6df   :  { %v3835_v54 = vpack.i.bf16 %v586_v63, %v583_v32 }
 0x6e0   :  { %v3586_v61 = vpop.f32.mrf.mxu0 }
 0x6e1   :  { %3836 = vrot.lane.b32.xlu1 %v3835_v54, %s4243_s20 }
 0x6e2   :  { %v704_v1 = vpop.f32.mrf.mxu0 }
 0x6e4   :  { %v3597_v2 = vpop.f32.mrf.mxu0 }
 0x6e6   :  { %v707_v14 = vpop.f32.mrf.mxu0 }
 0x6e7   :  { %v3840_v3 = vpack.i.bf16 %v707_v14, %v704_v1  ;;  %v4162_v1 = vld [vmem:[#allocation2 + $0x10] sm:$0xff]  ;;  %v4163_v14 = vld [vmem:[#allocation2] sm:$0xff] }
 0x6e8   :  { %v3598_v15 = vpop.f32.mrf.mxu0 }
 0x6e9   :  { %3841 = vrot.lane.b32.xlu1 %v3840_v3, %s4246_s4 }
 0x6ea   :  { %v863_v7 = vpop.f32.mrf.mxu0 }
 0x6ec   :  { %v3609_v18 = vpop.f32.mrf.mxu0 }
 0x6ee   :  { %v866_v19 = vpop.f32.mrf.mxu0 }
 0x6f0   :  { %v3610_v20 = vpop.f32.mrf.mxu0 }
 0x6f7   :  { %v985_v22 = vpop.f32.mrf.mxu0 }
 0x6f9   :  { %v3621_v23 = vpop.f32.mrf.mxu0 }
 0x6fb   :  { %v988_v8 = vpop.f32.mrf.mxu0 }
 0x6fc   :  { %v3845_v13 = vpack.i.bf16 %v988_v8, %v985_v22 }
 0x6fd   :  { %v3622_v25 = vpop.f32.mrf.mxu0 }
 0x6fe   :  { %3846 = vrot.lane.b32.xlu0 %v3845_v13, %s4247_s22 }
 0x71b   :  { %v1106_v29 = vpop.f32.mrf.mxu0 }
 0x71d   :  { %v3633_v30 = vpop.f32.mrf.mxu0 }
 0x71e   :  { %v3908_v30 = vld [vmem:[#allocation5 + $0x34] ss:$8 sps:$4 sm:$0xff]  }
 0x71f   :  { %v1109_v16 = vpop.f32.mrf.mxu0  ;;  %1464 = vmatprep.subr.bf16.mxu0 %v3908_v30 }
 0x720   :  { %v3850_v21 = vpack.i.bf16 %v1109_v16, %v1106_v29  ;;  %1465 = vmatpush1.bf16.msra.mxu0 %v3906_v62  ;;  %v3911_v16 = vld [vmem:[#allocation5 + $0x24] ss:$8 sps:$4 sm:$0xff]  }
 0x721   :  { %v3634_v33 = vpop.f32.mrf.mxu0  ;;  %1466 = vmatprep.subr.bf16.mxu0 %v3911_v16 }
 0x722   :  { %3851 = vrot.lane.b32.xlu0 %v3850_v21, %s4243_s20  ;;  %v3909_v21 = vld [vmem:[#allocation5 + $0x20] ss:$8 sps:$4 sm:$0xff]   ;;  %v3914_v33 = vld [vmem:[#allocation5 + $0x14] ss:$8 sps:$4 sm:$0xff]  }
 0x723   :  { %v1227_v34 = vpop.f32.mrf.mxu0 }
 0x724   :  { %1467 = vmatpush1.bf16.msra.mxu0 %v3909_v21 }
 0x725   :  { %v3645_v35 = vpop.f32.mrf.mxu0  ;;  %1468 = vmatprep.subr.bf16.mxu0 %v3914_v33 }
 0x726   :  { %v3915_v35 = vld [vmem:[#allocation5] ss:$8 sps:$4 sm:$0xff]  }
 0x727   :  { %v1230_v37 = vpop.f32.mrf.mxu0 }
 0x728   :  { %v3855_v26 = vpack.i.bf16 %v1230_v37, %v1227_v34  ;;  %v3912_v34 = vld [vmem:[#allocation5 + $0x10] ss:$8 sps:$4 sm:$0xff]   ;;  %v3917_v37 = vld [vmem:[#allocation5 + $0x4] ss:$8 sps:$4 sm:$0xff]  }
 0x729   :  { %v3646_v38 = vpop.f32.mrf.mxu0  ;;  %1469 = vmatpush1.bf16.msra.mxu0 %v3912_v34 }
 0x72a   :  { %3856 = vrot.lane.b32.xlu1 %v3855_v26, %s4246_s4  ;;  %1470 = vmatprep.subr.bf16.mxu0 %v3917_v37 }
 0x72d   :  { %1471 = vmatpush1.bf16.msra.mxu0 %v3915_v35 }
 0x74b   :  { %v3832_v31 = vpop.permute.xlu0 %3831 }
 0x74c   :  { %v3834_v28 = vunpack.i.h.bf16 %v3832_v31  ;;  %v3833_v42 = vunpack.i.l.bf16 %v3832_v31 }
 0x74e   :  { %v736_v52 = vsel %vm232_vm2, %v4437_v47, %v3834_v28  ;;  %v735_v24 = vsel %vm232_vm2, %v4435_v45, %v3833_v42 }
 0x753   :  { %v3837_v39 = vpop.permute.xlu1 %3836 }
 0x754   :  { %v3839_v43 = vunpack.i.h.bf16 %v3837_v39  ;;  %v3838_v46 = vunpack.i.l.bf16 %v3837_v39 }
 0x756   :  { %v739_v36 = vsel %vm737_vm3, %v736_v52, %v3839_v43  ;;  %v738_v49 = vsel %vm737_vm3, %v735_v24, %v3838_v46 }
 0x75b   :  { %v3842_v50 = vpop.permute.xlu1 %3841 }
 0x75c   :  { %v3844_v41 = vunpack.i.h.bf16 %v3842_v50  ;;  %v3843_v53 = vunpack.i.l.bf16 %v3842_v50 }
 0x75e   :  { %v741_v55 = vsel %vm740_vm4, %v738_v49, %v3843_v53  ;;  %v742_v57 = vsel %vm740_vm4, %v739_v36, %v3844_v41 }
 0x75f   :  { %v1264_v58 = vpack.c.bf16 %v742_v57, %v741_v55  ;;  %v3341_v55 = vld [vmem:[%s5170_s7] ss:$0 sm:$0xff] }
 0x761   :  { %3655 = vmatprep.mubr.msk.bf16.mxu1 %vm70_vm0, %v1264_v58 }
 0x770   :  { %v3847_v40 = vpop.permute.xlu0 %3846 }
 0x771   :  { %v3849_v44 = vunpack.i.h.bf16 %v3847_v40  ;;  %v3848_v47 = vunpack.i.l.bf16 %v3847_v40 }
 0x773   :  { %v1259_v6 = vsel %vm232_vm2, %v866_v19, %v3849_v44  ;;  %v1258_v59 = vsel %vm232_vm2, %v863_v7, %v3848_v47  ;;  %v4164_v19 = vld [vmem:[#allocation2 + $0x18] sm:$0xff] }
 0x794   :  { %v3852_v0 = vpop.permute.xlu0 %3851 }
 0x795   :  { %v3854_v4 = vunpack.i.h.bf16 %v3852_v0  ;;  %v3853_v5 = vunpack.i.l.bf16 %v3852_v0 }
 0x797   :  { %v1261_v9 = vsel %vm737_vm3, %v1259_v6, %v3854_v4  ;;  %v1260_v56 = vsel %vm737_vm3, %v1258_v59, %v3853_v5 }
 0x79c   :  { %v3857_v45 = vpop.permute.xlu1 %3856 }
 0x79d   :  { %v3859_v51 = vunpack.i.h.bf16 %v3857_v45  ;;  %v3858_v60 = vunpack.i.l.bf16 %v3857_v45 }
 0x79f   :  { %v1263_v32 = vsel %vm740_vm4, %v1261_v9, %v3859_v51  ;;  %v1262_v10 = vsel %vm740_vm4, %v1260_v56, %v3858_v60  ;;  %v3918_v51 = vld [vmem:[%s5168_s5 + $0x38] sm:$0xff]   ;;  %v3919_v60 = vld [vmem:[%s5168_s5 + $0x30] sm:$0xff]   ;;  %v3920_v9 = vld [vmem:[%s5168_s5 + $0x28] sm:$0xff]  }
 0x7a0   :  { %v1265_v63 = vpack.c.bf16 %v1263_v32, %v1262_v10  ;;  %3659 = vmatprep.subr.bf16.mxu1 %v3918_v51  ;;  %v3921_v56 = vld [vmem:[%s5168_s5 + $0x20] sm:$0xff]   ;;  %v3922_v32 = vld [vmem:[%s5168_s5 + $0x18] sm:$0xff]   ;;  %v3923_v10 = vld [vmem:[%s5168_s5 + $0x10] sm:$0xff]  }
 0x7a2   :  { %3656 = vmatmul.mubr.msk.bf16.vlgmr.msra.gmra.mxu1 %vm70_vm0, %v1265_v63  ;;  %v3924_v63 = vld [vmem:[%s5168_s5 + $0x8] sm:$0xff]  }
 0x7a3   :  { %3660 = vmatpush3.bf16.msra.mxu1 %v3918_v51  ;;  %v3934_v51 = vld [vmem:[%s5165_s2 + $0x54] ss:$8 sps:$4 sm:$0xff]  }
 0x7a4   :  { %3661 = vmatprep.subr.bf16.mxu1 %v3919_v60 }
 0x7a7   :  { %3662 = vmatpush3.bf16.msra.mxu1 %v3919_v60  ;;  %v3932_v60 = vld [vmem:[%s5165_s2 + $0x50] ss:$8 sps:$4 sm:$0xff]  }
 0x7a8   :  { %3663 = vmatprep.subr.bf16.mxu1 %v3920_v9 }
 0x7ab   :  { %3664 = vmatpush3.bf16.msra.mxu1 %v3920_v9  ;;  %v3937_v9 = vld [vmem:[%s5165_s2 + $0x44] ss:$8 sps:$4 sm:$0xff]  }
 0x7ac   :  { %3665 = vmatprep.subr.bf16.mxu1 %v3921_v56 }
 0x7af   :  { %3666 = vmatpush3.bf16.msra.mxu1 %v3921_v56  ;;  %v3935_v56 = vld [vmem:[%s5165_s2 + $0x40] ss:$8 sps:$4 sm:$0xff]  }
 0x7b0   :  { %3667 = vmatprep.subr.bf16.mxu1 %v3922_v32 }
 0x7b3   :  { %3668 = vmatpush3.bf16.msra.mxu1 %v3922_v32 }
 0x7b4   :  { %3669 = vmatprep.subr.bf16.mxu1 %v3923_v10 }
 0x7b7   :  { %3670 = vmatpush3.bf16.msra.mxu1 %v3923_v10 }
 0x7b8   :  { %3671 = vmatprep.subr.bf16.mxu1 %v3924_v63 }
 0x7bb   :  { %3672 = vmatpush3.bf16.msra.mxu1 %v3924_v63 }
 0x862   :  { %v3657_v54 = vpop.f32.mrf.mxu1 }
 0x863   :  { %v4659_v2 = vadd.f32 %v4162_v1, %v3657_v54  ;;  %v3925_v54 = vld [vmem:[%s5168_s5] sm:$0xff]  }
 0x864   :  { %v1338_v61 = vpop.f32.mrf.mxu1  ;;  %3673 = vmatprep.subr.bf16.mxu1 %v3925_v54 }
 0x865   :  { %v4661_v3 = vadd.f32 %v4163_v14, %v1338_v61  ;;  %v1359_v8 = vmul.f32 %v4659_v2, %v4659_v2  ;;  %3674 = vmatpush3.bf16.msra.mxu1 %v3925_v54 }
 0x866   :  { %v3658_v15 = vpop.f32.mrf.mxu1  ;;  %3685 = vmatprep.subr.bf16.mxu1 %v4239_v48 }
 0x867   :  { %v1357_v7 = vmul.f32 %v4661_v3, %v4661_v3  ;;  %v4665_v20 = vadd.f32 %v4164_v19, %v3658_v15  ;;  %v1367_v25 = vsel %vm70_vm0, %v1359_v8, 0.0 }
 0x868   :  { %v1341_v18 = vpop.f32.mrf.mxu1 }
 0x869   :  { %v4667_v22 = vadd.f32 %v4165_v12, %v1341_v18  ;;  %v1361_v23 = vsel %vm70_vm0, %v1357_v7, 0.0  ;;  %v1360_v27 = vmul.f32 %v4665_v20, %v4665_v20 }
 0x86a   :  { %1362 = vadd.xlane.f32.xlu0 %v1361_v23 }
 0x86b   :  { %v1358_v13 = vmul.f32 %v4667_v22, %v4667_v22  ;;  %v1370_v29 = vsel %vm70_vm0, %v1360_v27, 0.0 }
 0x86d   :  { %v1364_v17 = vsel %vm70_vm0, %v1358_v13, 0.0 }
 0x86e   :  { %1368 = vadd.xlane.f32.xlu0 %v1367_v25  ;;  %1365 = vadd.xlane.f32.xlu1 %v1364_v17 }
 0x872   :  { %1371 = vadd.xlane.f32.xlu0 %v1370_v29 }
 0x8f3   :  { %v1363_v26 = vpop.xlane.xlu0 %1362 }
 0x8f4   :  { %v1373_v38 = vmul.f32 0.015625, %v1363_v26 }
 0x8f6   :  { %v1377_v31 = vadd.f32 1e-06, %v1373_v38 }
 0x8f7   :  { %v1369_v39 = vpop.xlane.xlu0 %1368  ;;  %v1366_v28 = vpop.xlane.xlu1 %1365 }
 0x8f8   :  { %v1374_v42 = vmul.f32 0.015625, %v1366_v28  ;;  %4034 = vrsqrt.f32 %v1377_v31  ;;  %v1375_v43 = vmul.f32 0.015625, %v1369_v39 }
 0x8fa   :  { %v1378_v46 = vadd.f32 1e-06, %v1374_v42  ;;  %v1379_v24 = vadd.f32 1e-06, %v1375_v43 }
 0x8fb   :  { %v1372_v50 = vpop.xlane.xlu0 %1371 }
 0x8fc   :  { %v1376_v52 = vmul.f32 0.015625, %v1372_v50  ;;  %4036 = vrsqrt.f32 %v1378_v46 }
 0x8fe   :  { %v1380_v41 = vadd.f32 1e-06, %v1376_v52 }
 0x900   :  { %4038 = vrsqrt.f32 %v1380_v41 }
 0x901   :  { %4040 = vrsqrt.f32 %v1379_v24 }
 0x905   :  { %v4035_v53 = vpop.eup %4034 }
 0x906   :  { %v1385_v36 = vmul.f32 %v4035_v53, %v4661_v3 }
 0x908   :  { %v1396_v40 = vmul.f32 %v3341_v55, %v1385_v36 }
 0x909   :  { %v4037_v49 = vpop.eup %4036 }
 0x90a   :  { %v1386_v57 = vmul.f32 %v4037_v49, %v4667_v22 }
 0x90c   :  { %v1397_v0 = vmul.f32 %v3341_v55, %v1386_v57 }
 0x90d   :  { %v4039_v58 = vpop.eup %4038 }
 0x90e   :  { %v4041_v44 = vpop.eup %4040  ;;  %v1400_v47 = vpack.c.bf16 %v1397_v0, %v1396_v40  ;;  %v1388_v4 = vmul.f32 %v4039_v58, %v4665_v20 }
 0x90f   :  { %v1387_v5 = vmul.f32 %v4041_v44, %v4659_v2 }
 0x910   :  { %3350 = vmatmul.mubr.msk.bf16.vlgmr.msra.gmra.mxu0 %vm70_vm0, %v1400_v47  ;;  %v1399_v45 = vmul.f32 %v3341_v55, %v1388_v4 }
 0x911   :  { %1498 = vmatprep.mubr.bf16.mxu0 %v4238_v11  ;;  %v1398_v6 = vmul.f32 %v3341_v55, %v1387_v5  ;;  %v3928_v5 = vld [vmem:[%s5165_s2 + $0x74] ss:$8 sps:$4 sm:$0xff]  }
 0x912   :  { %1769 = vmatprep.subr.bf16.mxu0 %v3928_v5 }
 0x913   :  { %v1401_v59 = vpack.c.bf16 %v1399_v45, %v1398_v6  ;;  %v3926_v45 = vld [vmem:[%s5165_s2 + $0x70] ss:$8 sps:$4 sm:$0xff]   ;;  %v3931_v6 = vld [vmem:[%s5165_s2 + $0x64] ss:$8 sps:$4 sm:$0xff]  }
 0x914   :  { %1770 = vmatpush1.bf16.msra.mxu0 %v3926_v45 }
 0x915   :  { %1771 = vmatprep.subr.bf16.mxu0 %v3931_v6 }
 0x918   :  { %3351 = vmatmul.mubr.msk.bf16.gmra.mxu0 %vm70_vm0, %v1401_v59  ;;  %v3929_v59 = vld [vmem:[%s5165_s2 + $0x60] ss:$8 sps:$4 sm:$0xff]  }
 0x919   :  { %1793 = vmatprep.mubr.bf16.mxu0 %v4238_v11  ;;  %1772 = vmatpush1.bf16.msra.mxu0 %v3929_v59 }
 0x91a   :  { %1773 = vmatprep.subr.bf16.mxu0 %v3934_v51 }
 0x91d   :  { %1774 = vmatpush1.bf16.msra.mxu0 %v3932_v60 }
 0x91e   :  { %1775 = vmatprep.subr.bf16.mxu0 %v3937_v9 }
 0x921   :  { %1776 = vmatpush1.bf16.msra.mxu0 %v3935_v56 }
 0x922   :  { %3679 = vmatprep.subr.bf16.mxu0 %v4239_v48 }
 0x9d0   :  { %v1490_v61 = vpop.f32.mrf.mxu0 }
 0x9d1   :  { %v3352_v1 = vmul.f32 -1.442695, %v1490_v61 }
 0x9d2   :  { %v1492_v14 = vpop.f32.mrf.mxu0 }
 0x9d3   :  { %4042 = vpow2.f32 %v3352_v1 }
 0x9d4   :  { %v1494_v15 = vpop.f32.mrf.mxu0 }
 0x9d5   :  { %v3353_v7 = vmul.f32 -1.442695, %v1494_v15 }
 0x9d6   :  { %v1496_v18 = vpop.f32.mrf.mxu0 }
 0x9d7   :  { %4044 = vpow2.f32 %v3353_v7 }
 0x9d8   :  { %v1500_v19 = vpop.f32.mrf.mxu0 }
 0x9d9   :  { %v3354_v12 = vmul.f32 -1.442695, %v1500_v19 }
 0x9da   :  { %v1502_v23 = vpop.f32.mrf.mxu0 }
 0x9db   :  { %4046 = vpow2.f32 %v3354_v12 }
 0x9dc   :  { %v1504_v8 = vpop.f32.mrf.mxu0 }
 0x9dd   :  { %v3355_v13 = vmul.f32 -1.442695, %v1504_v8 }
 0x9de   :  { %v1506_v46 = vpop.f32.mrf.mxu0 }
 0x9df   :  { %4048 = vpow2.f32 %v3355_v13 }
 0x9e0   :  { %v4043_v25 = vpop.eup %4042 }
 0x9e1   :  { %v1521_v17 = vadd.f32 1.0, %v4043_v25  ;;  %v3365_v25 = vld [vmem:[%s5169_s6 + $0x1] ss:$0 sm:$0xff] }
 0x9e3   :  { %4050 = vrcp.f32 %v1521_v17 }
 0x9e4   :  { %v4045_v27 = vpop.eup %4044 }
 0x9e5   :  { %v1522_v29 = vadd.f32 1.0, %v4045_v27 }
 0x9e7   :  { %4052 = vrcp.f32 %v1522_v29 }
 0x9e8   :  { %v4047_v30 = vpop.eup %4046 }
 0x9e9   :  { %v1523_v62 = vadd.f32 1.0, %v4047_v30 }
 0x9eb   :  { %4054 = vrcp.f32 %v1523_v62 }
 0x9ec   :  { %v4049_v16 = vpop.eup %4048 }
 0x9ed   :  { %v1524_v21 = vadd.f32 1.0, %v4049_v16 }
 0x9ef   :  { %4056 = vrcp.f32 %v1524_v21 }
 0x9f0   :  { %v4051_v33 = vpop.eup %4050 }
 0x9f1   :  { %v1533_v34 = vmul.f32 %v4051_v33, %v1490_v61 }
 0x9f3   :  { %v1537_v26 = vmul.f32 %v1533_v34, %v1492_v14 }
 0x9f4   :  { %v4053_v35 = vpop.eup %4052 }
 0x9f5   :  { %v1534_v37 = vmul.f32 %v4053_v35, %v1494_v15 }
 0x9f7   :  { %v1538_v38 = vmul.f32 %v1534_v37, %v1496_v18 }
 0x9f8   :  { %v4055_v31 = vpop.eup %4054 }
 0x9f9   :  { %v1541_v39 = vpack.c.bf16 %v1538_v38, %v1537_v26  ;;  %v1535_v28 = vmul.f32 %v4055_v31, %v1500_v19 }
 0x9fb   :  { %3675 = vmatprep.mubr.bf16.mxu1 %v1541_v39  ;;  %v1539_v50 = vmul.f32 %v1535_v28, %v1502_v23 }
 0x9fc   :  { %v4057_v42 = vpop.eup %4056 }
 0x9fd   :  { %v1536_v43 = vmul.f32 %v4057_v42, %v1504_v8 }
 0x9ff   :  { %v1540_v52 = vmul.f32 %v1536_v43, %v1506_v46 }
 0xa01   :  { %v1542_v24 = vpack.c.bf16 %v1540_v52, %v1539_v50 }
 0xa03   :  { %3676 = vmatmul.mubr.bf16.vlgmr.msra.gmra.mxu1 %v1542_v24 }
 0xa04   :  { %3687 = vmatprep.mubr.msk.bf16.mxu1 %vm4240_vm1, %v4239_v48 }
 0xac3   :  { %v3677_v41 = vpop.f32.mrf.mxu1 }
 0xac4   :  { %v4718_v36 = vadd.f32 %v3677_v41, %v4659_v2 }
 0xac5   :  { %v1641_v53 = vpop.f32.mrf.mxu1 }
 0xac6   :  { %v4721_v49 = vadd.f32 %v1641_v53, %v4661_v3  ;;  %v1662_v2 = vmul.f32 %v4718_v36, %v4718_v36 }
 0xac7   :  { %v3678_v55 = vpop.f32.mrf.mxu1 }
 0xac8   :  { %v1660_v57 = vmul.f32 %v4721_v49, %v4721_v49  ;;  %v4726_v40 = vadd.f32 %v3678_v55, %v4665_v20  ;;  %v1670_v47 = vsel %vm70_vm0, %v1662_v2, 0.0 }
 0xac9   :  { %v1644_v58 = vpop.f32.mrf.mxu1 }
 0xaca   :  { %v4729_v0 = vadd.f32 %v1644_v58, %v4667_v22  ;;  %v1664_v44 = vsel %vm70_vm0, %v1660_v57, 0.0  ;;  %v1663_v20 = vmul.f32 %v4726_v40, %v4726_v40 }
 0xacb   :  { %1665 = vadd.xlane.f32.xlu0 %v1664_v44 }
 0xacc   :  { %v1661_v3 = vmul.f32 %v4729_v0, %v4729_v0  ;;  %v1673_v22 = vsel %vm70_vm0, %v1663_v20, 0.0 }
 0xace   :  { %v1667_v4 = vsel %vm70_vm0, %v1661_v3, 0.0 }
 0xacf   :  { %1671 = vadd.xlane.f32.xlu0 %v1670_v47  ;;  %1668 = vadd.xlane.f32.xlu1 %v1667_v4 }
 0xad3   :  { %1674 = vadd.xlane.f32.xlu1 %v1673_v22 }
 0xb54   :  { %v1666_v32 = vpop.xlane.xlu0 %1665 }
 0xb55   :  { %v1676_v10 = vmul.f32 0.015625, %v1666_v32 }
 0xb57   :  { %v1680_v63 = vadd.f32 1e-06, %v1676_v10 }
 0xb58   :  { %v1672_v54 = vpop.xlane.xlu0 %1671  ;;  %v1669_v61 = vpop.xlane.xlu1 %1668 }
 0xb59   :  { %v1677_v1 = vmul.f32 0.015625, %v1669_v61  ;;  %4058 = vrsqrt.f32 %v1680_v63  ;;  %v1678_v14 = vmul.f32 0.015625, %v1672_v54  ;;  %v4166_v54 = vld [vmem:[%s5164_s1] ss:$0 sm:$0xff] }
 0xb5b   :  { %v1681_v15 = vadd.f32 1e-06, %v1677_v1  ;;  %v1682_v19 = vadd.f32 1e-06, %v1678_v14 }
 0xb5c   :  { %v1675_v7 = vpop.xlane.xlu1 %1674 }
 0xb5d   :  { %v1679_v18 = vmul.f32 0.015625, %v1675_v7  ;;  %4060 = vrsqrt.f32 %v1681_v15 }
 0xb5f   :  { %v1683_v12 = vadd.f32 1e-06, %v1679_v18 }
 0xb61   :  { %4062 = vrsqrt.f32 %v1683_v12 }
 0xb62   :  { %4064 = vrsqrt.f32 %v1682_v19 }
 0xb66   :  { %v4059_v23 = vpop.eup %4058 }
 0xb67   :  { %v1688_v8 = vmul.f32 %v4059_v23, %v4721_v49 }
 0xb69   :  { %v1700_v29 = vmul.f32 %v3365_v25, %v1688_v8 }
 0xb6a   :  { %v4061_v13 = vpop.eup %4060 }
 0xb6b   :  { %v1689_v17 = vmul.f32 %v4061_v13, %v4729_v0 }
 0xb6d   :  { %v1701_v30 = vmul.f32 %v3365_v25, %v1689_v17 }
 0xb6e   :  { %v4063_v27 = vpop.eup %4062 }
 0xb6f   :  { %v4065_v62 = vpop.eup %4064  ;;  %v1704_v16 = vpack.c.bf16 %v1701_v30, %v1700_v29  ;;  %v1691_v21 = vmul.f32 %v4063_v27, %v4726_v40 }
 0xb70   :  { %v1690_v33 = vmul.f32 %v4065_v62, %v4718_v36 }
 0xb71   :  { %3382 = vmatmul.mubr.msk.bf16.vlgmr.msra.gmra.mxu0 %vm70_vm0, %v1704_v16  ;;  %v1703_v34 = vmul.f32 %v3365_v25, %v1691_v21 }
 0xb72   :  { %1803 = vmatprep.mubr.bf16.mxu0 %v4238_v11  ;;  %v1702_v35 = vmul.f32 %v3365_v25, %v1690_v33 }
 0xb74   :  { %v1705_v37 = vpack.c.bf16 %v1703_v34, %v1702_v35 }
 0xb79   :  { %3383 = vmatmul.mubr.msk.bf16.gmra.mxu0 %vm70_vm0, %v1705_v37 }
 0xb7a   :  { %3681 = vmatprep.mubr.msk.bf16.mxu0 %vm4240_vm1, %v4239_v48 }
 0xc31   :  { %v1795_v26 = vpop.f32.mrf.mxu0 }
 0xc33   :  { %v1797_v38 = vpop.f32.mrf.mxu0 }
 0xc35   :  { %v1799_v31 = vpop.f32.mrf.mxu0 }
 0xc36   :  { %v1814_v39 = vpack.c.bf16 %v1799_v31, %v1795_v26 }
 0xc37   :  { %v1801_v28 = vpop.f32.mrf.mxu0 }
 0xc38   :  { %v4778_v42 = vpack.c.bf16 %v1801_v28, %v1797_v38  ;;  %1935 = vrot.lane.b32.xlu1 %v1814_v39, %s4246_s4  ;;  %1817 = vrot.lane.b32.xlu0 %v1814_v39, %s4241_s18 }
 0xc39   :  { %v1805_v43 = vpop.f32.mrf.mxu0 }
 0xc3a   :  { %3686 = vmatpush3.bf16.msra.mxu1 %v4778_v42 }
 0xc3b   :  { %v4783_v46 = vpop.f32.mrf.mxu0  ;;  %3697 = vmatprep.subr.bf16.mxu1 %v4239_v48 }
 0xc3c   :  { %1933 = vrot.lane.b32.xlu1 %v1814_v39, %s4242_s19  ;;  %2055 = vrot.lane.b32.xlu0 %v1814_v39, %s4244_s0 }
 0xc3d   :  { %v1809_v50 = vpop.f32.mrf.mxu0 }
 0xc3e   :  { %v2327_v52 = vpack.c.bf16 %v1809_v50, %v1805_v43 }
 0xc3f   :  { %v4835_v10 = vpop.f32.mrf.mxu0 }
 0xc40   :  { %2057 = vrot.lane.b32.xlu1 %v1814_v39, %s4243_s20  ;;  %2176 = vrot.lane.b32.xlu0 %v1814_v39, %s4245_s21 }
 0xc44   :  { %2178 = vrot.lane.b32.xlu1 %v1814_v39, %s4247_s22  ;;  %2448 = vrot.lane.b32.xlu0 %v2327_v52, %s4246_s4 }
 0xc48   :  { %2570 = vrot.lane.b32.xlu0 %v2327_v52, %s4243_s20  ;;  %2330 = vrot.lane.b32.xlu1 %v2327_v52, %s4241_s18 }
 0xc4c   :  { %2691 = vrot.lane.b32.xlu0 %v2327_v52, %s4247_s22  ;;  %2446 = vrot.lane.b32.xlu1 %v2327_v52, %s4242_s19 }
 0xc50   :  { %2568 = vrot.lane.b32.xlu1 %v2327_v52, %s4244_s0 }
 0xc54   :  { %2689 = vrot.lane.b32.xlu1 %v2327_v52, %s4245_s21 }
 0xcaa   :  { %v1818_v24 = vpop.permute.xlu0 %1817  ;;  %v1936_v53 = vpop.permute.xlu1 %1935 }
 0xcab   :  { %v1823_v41 = vsel %vm232_vm2, %v1818_v24, 0  ;;  %v1941_v57 = vsel %vm232_vm2, %v1936_v53, 0 }
 0xcac   :  { %3680 = vmatpush3.bf16.xpose.msra.mxu0 %v1823_v41  ;;  %v4167_v41 = vld [vmem:[%s5164_s1 + $0x1] ss:$0 sm:$0xff] }
 0xcad   :  { %3691 = vmatprep.subr.bf16.mxu0 %v4239_v48 }
 0xcae   :  { %v1934_v55 = vpop.permute.xlu1 %1933  ;;  %v2056_v3 = vpop.permute.xlu0 %2055 }
 0xcb2   :  { %v2058_v58 = vpop.permute.xlu1 %2057  ;;  %v2177_v20 = vpop.permute.xlu0 %2176 }
 0xcb3   :  { %3682 = vmatmul.mubr.msk.bf16.vlgmr.msra.gmra.mxu0 %vm232_vm2, %v1814_v39  ;;  %v2063_v44 = vsel %vm232_vm2, %v2058_v58, 0 }
 0xcb4   :  { %3692 = vmatpush3.bf16.xpose.msra.mxu0 %v1941_v57  ;;  %3693 = vmatprep.mubr.msk.bf16.mxu0 %vm4240_vm1, %v4239_v48 }
 0xcb5   :  { %3703 = vmatprep.subr.bf16.mxu0 %v4239_v48 }
 0xcb6   :  { %v2179_v2 = vpop.permute.xlu1 %2178  ;;  %v2449_v5 = vpop.permute.xlu0 %2448 }
 0xcb7   :  { %v2184_v47 = vsel %vm232_vm2, %v2179_v2, 0  ;;  %v2454_v45 = vsel %vm232_vm2, %v2449_v5, 0 }
 0xcba   :  { %v2331_v4 = vpop.permute.xlu1 %2330  ;;  %v2571_v6 = vpop.permute.xlu0 %2570 }
 0xcbb   :  { %3694 = vmatmul.mubr.msk.bf16.vlgmr.msra.gmra.mxu0 %vm232_vm2, %v1934_v55  ;;  %v2336_v22 = vsel %vm232_vm2, %v2331_v4, 0  ;;  %v2576_v51 = vsel %vm232_vm2, %v2571_v6, 0 }
 0xcbc   :  { %3704 = vmatpush3.bf16.xpose.msra.mxu0 %v2063_v44  ;;  %3705 = vmatprep.mubr.msk.bf16.mxu0 %vm4240_vm1, %v4239_v48 }
 0xcbd   :  { %3715 = vmatprep.subr.bf16.mxu0 %v4239_v48 }
 0xcbe   :  { %v2447_v59 = vpop.permute.xlu1 %2446  ;;  %v2692_v60 = vpop.permute.xlu0 %2691 }
 0xcbf   :  { %v2697_v56 = vsel %vm232_vm2, %v2692_v60, 0 }
 0xcc2   :  { %v2569_v9 = vpop.permute.xlu1 %2568 }
 0xcc3   :  { %3706 = vmatmul.mubr.msk.bf16.vlgmr.msra.gmra.mxu0 %vm232_vm2, %v2056_v3 }
 0xcc4   :  { %3716 = vmatpush3.bf16.xpose.msra.mxu0 %v2184_v47  ;;  %3717 = vmatprep.mubr.msk.bf16.mxu0 %vm4240_vm1, %v4239_v48 }
 0xcc5   :  { %3727 = vmatprep.subr.bf16.mxu0 %v4239_v48 }
 0xcc6   :  { %v2690_v32 = vpop.permute.xlu1 %2689 }
 0xccb   :  { %3718 = vmatmul.mubr.msk.bf16.vlgmr.msra.gmra.mxu0 %vm232_vm2, %v2177_v20 }
 0xccc   :  { %3728 = vmatpush3.bf16.xpose.msra.mxu0 %v2336_v22  ;;  %3729 = vmatprep.mubr.msk.bf16.mxu0 %vm4240_vm1, %v4239_v48 }
 0xccd   :  { %3739 = vmatprep.subr.bf16.mxu0 %v4239_v48 }
 0xcd3   :  { %3730 = vmatmul.mubr.msk.bf16.vlgmr.msra.gmra.mxu0 %vm232_vm2, %v2327_v52 }
 0xcd4   :  { %3740 = vmatpush3.bf16.xpose.msra.mxu0 %v2454_v45  ;;  %3741 = vmatprep.mubr.msk.bf16.mxu0 %vm4240_vm1, %v4239_v48 }
 0xcd5   :  { %3751 = vmatprep.subr.bf16.mxu0 %v4239_v48 }
 0xcdb   :  { %3742 = vmatmul.mubr.msk.bf16.vlgmr.msra.gmra.mxu0 %vm232_vm2, %v2447_v59 }
 0xcdc   :  { %3752 = vmatpush3.bf16.xpose.msra.mxu0 %v2576_v51  ;;  %3753 = vmatprep.mubr.msk.bf16.mxu0 %vm4240_vm1, %v4239_v48 }
 0xcdd   :  { %3763 = vmatprep.subr.bf16.mxu0 %v4239_v48 }
 0xce3   :  { %3754 = vmatmul.mubr.msk.bf16.vlgmr.msra.gmra.mxu0 %vm232_vm2, %v2569_v9 }
 0xce4   :  { %3764 = vmatpush3.bf16.xpose.msra.mxu0 %v2697_v56  ;;  %3765 = vmatprep.mubr.msk.bf16.mxu0 %vm4240_vm1, %v4239_v48 }
 0xceb   :  { %3766 = vmatmul.mubr.msk.bf16.vlgmr.msra.gmra.mxu0 %vm232_vm2, %v2690_v32 }
 0xd73   :  { %v1859_v63 = vpop.f32.mrf.mxu0 }
 0xd74   :  { %v4840_v61 = vadd.f32 %v4166_v54, %v1859_v63 }
 0xd75   :  { %v3683_v1 = vpop.f32.mrf.mxu0 }
 0xd76   :  { %v1866_v14 = vsel %vm232_vm2, %v4840_v61, -inf }
 0xd77   :  { %1867 = vmax.xlane.f32.xlu0 %v1866_v14  ;;  %v1862_v15 = vpop.f32.mrf.mxu0 }
 0xd78   :  { %v4844_v7 = vadd.f32 %v4166_v54, %v1862_v15 }
 0xd79   :  { %v3684_v18 = vpop.f32.mrf.mxu0 }
 0xd7a   :  { %v1869_v19 = vsel %vm232_vm2, %v4844_v7, -inf }
 0xd7b   :  { %1870 = vmax.xlane.f32.xlu1 %v1869_v19  ;;  %v1977_v12 = vpop.f32.mrf.mxu0 }
 0xd7c   :  { %v4848_v23 = vadd.f32 %v4166_v54, %v1977_v12 }
 0xd7d   :  { %v3695_v8 = vpop.f32.mrf.mxu0 }
 0xd7e   :  { %v1984_v13 = vsel %vm232_vm2, %v4848_v23, -inf }
 0xd7f   :  { %1985 = vmax.xlane.f32.xlu0 %v1984_v13  ;;  %v1980_v25 = vpop.f32.mrf.mxu0 }
 0xd80   :  { %v4852_v17 = vadd.f32 %v4166_v54, %v1980_v25 }
 0xd81   :  { %v3696_v27 = vpop.f32.mrf.mxu0 }
 0xd82   :  { %v1987_v29 = vsel %vm232_vm2, %v4852_v17, -inf }
 0xd83   :  { %1988 = vmax.xlane.f32.xlu0 %v1987_v29  ;;  %v2099_v30 = vpop.f32.mrf.mxu0 }
 0xd84   :  { %v4856_v62 = vadd.f32 %v4166_v54, %v2099_v30 }
 0xd85   :  { %v3707_v16 = vpop.f32.mrf.mxu0 }
 0xd86   :  { %v2106_v21 = vsel %vm232_vm2, %v4856_v62, -inf }
 0xd87   :  { %2107 = vmax.xlane.f32.xlu0 %v2106_v21  ;;  %v2102_v33 = vpop.f32.mrf.mxu0 }
 0xd88   :  { %v4860_v34 = vadd.f32 %v4166_v54, %v2102_v33 }
 0xd89   :  { %v3708_v35 = vpop.f32.mrf.mxu0 }
 0xd8a   :  { %v2109_v37 = vsel %vm232_vm2, %v4860_v34, -inf }
 0xd8b   :  { %2110 = vmax.xlane.f32.xlu1 %v2109_v37  ;;  %v2220_v26 = vpop.f32.mrf.mxu0 }
 0xd8c   :  { %v4864_v38 = vadd.f32 %v4166_v54, %v2220_v26 }
 0xd8d   :  { %v3719_v31 = vpop.f32.mrf.mxu0 }
 0xd8e   :  { %v2227_v39 = vsel %vm232_vm2, %v4864_v38, -inf }
 0xd8f   :  { %2228 = vmax.xlane.f32.xlu0 %v2227_v39  ;;  %v2223_v28 = vpop.f32.mrf.mxu0 }
 0xd90   :  { %v4868_v43 = vadd.f32 %v4166_v54, %v2223_v28 }
 0xd91   :  { %v3720_v50 = vpop.f32.mrf.mxu0 }
 0xd92   :  { %v2230_v52 = vsel %vm232_vm2, %v4868_v43, -inf }
 0xd93   :  { %2231 = vmax.xlane.f32.xlu1 %v2230_v52  ;;  %v2372_v24 = vpop.f32.mrf.mxu0 }
 0xd94   :  { %v4875_v53 = vadd.f32 %v4167_v41, %v2372_v24 }
 0xd95   :  { %v3731_v55 = vpop.f32.mrf.mxu0 }
 0xd96   :  { %v2379_v57 = vsel %vm232_vm2, %v4875_v53, -inf }
 0xd97   :  { %2380 = vmax.xlane.f32.xlu0 %v2379_v57  ;;  %v2375_v58 = vpop.f32.mrf.mxu0 }
 0xd98   :  { %v4879_v44 = vadd.f32 %v4167_v41, %v2375_v58 }
 0xd99   :  { %v3732_v2 = vpop.f32.mrf.mxu0 }
 0xd9a   :  { %v2382_v3 = vsel %vm232_vm2, %v4879_v44, -inf }
 0xd9b   :  { %2383 = vmax.xlane.f32.xlu1 %v2382_v3  ;;  %v2490_v47 = vpop.f32.mrf.mxu0 }
 0xd9c   :  { %v4883_v4 = vadd.f32 %v4167_v41, %v2490_v47 }
 0xd9d   :  { %v3743_v20 = vpop.f32.mrf.mxu0 }
 0xd9e   :  { %v2497_v22 = vsel %vm232_vm2, %v4883_v4, -inf }
 0xd9f   :  { %2498 = vmax.xlane.f32.xlu0 %v2497_v22  ;;  %v2493_v5 = vpop.f32.mrf.mxu0 }
 0xda0   :  { %v4887_v45 = vadd.f32 %v4167_v41, %v2493_v5 }
 0xda1   :  { %v3744_v6 = vpop.f32.mrf.mxu0 }
 0xda2   :  { %v2500_v59 = vsel %vm232_vm2, %v4887_v45, -inf }
 0xda3   :  { %2501 = vmax.xlane.f32.xlu1 %v2500_v59  ;;  %v2612_v51 = vpop.f32.mrf.mxu0 }
 0xda4   :  { %v4891_v60 = vadd.f32 %v4167_v41, %v2612_v51 }
 0xda5   :  { %v3755_v9 = vpop.f32.mrf.mxu0 }
 0xda6   :  { %v2619_v56 = vsel %vm232_vm2, %v4891_v60, -inf }
 0xda7   :  { %2620 = vmax.xlane.f32.xlu0 %v2619_v56  ;;  %v2615_v32 = vpop.f32.mrf.mxu0 }
 0xda8   :  { %v4895_v63 = vadd.f32 %v4167_v41, %v2615_v32 }
 0xda9   :  { %v3756_v54 = vpop.f32.mrf.mxu0 }
 0xdaa   :  { %v2622_v1 = vsel %vm232_vm2, %v4895_v63, -inf }
 0xdab   :  { %2623 = vmax.xlane.f32.xlu1 %v2622_v1  ;;  %v2733_v14 = vpop.f32.mrf.mxu0 }
 0xdac   :  { %v4899_v15 = vadd.f32 %v4167_v41, %v2733_v14 }
 0xdad   :  { %v3767_v18 = vpop.f32.mrf.mxu0 }
 0xdae   :  { %v2740_v19 = vsel %vm232_vm2, %v4899_v15, -inf }
 0xdaf   :  { %2741 = vmax.xlane.f32.xlu0 %v2740_v19  ;;  %v2736_v12 = vpop.f32.mrf.mxu0 }
 0xdb0   :  { %v4903_v8 = vadd.f32 %v4167_v41, %v2736_v12 }
 0xdb1   :  { %v3768_v13 = vpop.f32.mrf.mxu0 }
 0xdb2   :  { %v2743_v25 = vsel %vm232_vm2, %v4903_v8, -inf }
 0xdb3   :  { %2744 = vmax.xlane.f32.xlu1 %v2743_v25 }
 0xdc4   :  { %2129 = vrot.lane.b32.xlu1 %v4778_v42, %s4244_s0 }
 0xdc5   :  { %2008 = vrot.lane.b32.xlu0 %v4778_v42, %s4242_s19 }
 0xe00   :  { %v1868_v27 = vpop.xlane.xlu0 %1867 }
 0xe01   :  { %v1872_v29 = vsub.f32 %v4840_v61, %v1868_v27 }
 0xe03   :  { %v1874_v30 = vmul.f32 1.442695, %v1872_v29 }
 0xe04   :  { %v1871_v16 = vpop.xlane.xlu1 %1870 }
 0xe05   :  { %4066 = vpow2.f32 %v1874_v30  ;;  %v1873_v21 = vsub.f32 %v4844_v7, %v1871_v16 }
 0xe07   :  { %v1876_v33 = vmul.f32 1.442695, %v1873_v21 }
 0xe08   :  { %v1986_v35 = vpop.xlane.xlu0 %1985 }
 0xe09   :  { %4068 = vpow2.f32 %v1876_v33  ;;  %v1990_v37 = vsub.f32 %v4848_v23, %v1986_v35 }
 0xe0b   :  { %v1992_v26 = vmul.f32 1.442695, %v1990_v37 }
 0xe0c   :  { %v1989_v31 = vpop.xlane.xlu0 %1988 }
 0xe0d   :  { %4070 = vpow2.f32 %v1992_v26  ;;  %v1991_v39 = vsub.f32 %v4852_v17, %v1989_v31 }
 0xe0f   :  { %v1994_v28 = vmul.f32 1.442695, %v1991_v39 }
 0xe10   :  { %v2108_v50 = vpop.xlane.xlu0 %2107 }
 0xe11   :  { %4072 = vpow2.f32 %v1994_v28  ;;  %v2112_v61 = vsub.f32 %v4856_v62, %v2108_v50 }
 0xe12   :  { %v4916_v52 = vpop.eup %4066 }
 0xe13   :  { %v2114_v24 = vmul.f32 1.442695, %v2112_v61  ;;  %v1878_v7 = vsel %vm232_vm2, %v4916_v52, 0.0 }
 0xe14   :  { %1879 = vadd.xlane.f32.xlu0 %v1878_v7  ;;  %v2111_v41 = vpop.xlane.xlu1 %2110 }
 0xe15   :  { %4074 = vpow2.f32 %v2114_v24  ;;  %v2113_v23 = vsub.f32 %v4860_v34, %v2111_v41 }
 0xe16   :  { %v4921_v55 = vpop.eup %4068 }
 0xe17   :  { %v2116_v57 = vmul.f32 1.442695, %v2113_v23  ;;  %v1881_v17 = vsel %vm232_vm2, %v4921_v55, 0.0 }
 0xe18   :  { %v2229_v58 = vpop.xlane.xlu0 %2228  ;;  %1882 = vadd.xlane.f32.xlu1 %v1881_v17 }
 0xe19   :  { %4076 = vpow2.f32 %v2116_v57  ;;  %v2233_v62 = vsub.f32 %v4864_v38, %v2229_v58 }
 0xe1a   :  { %v4926_v2 = vpop.eup %4070 }
 0xe1b   :  { %v2235_v3 = vmul.f32 1.442695, %v2233_v62  ;;  %v1996_v47 = vsel %vm232_vm2, %v4926_v2, 0.0 }
 0xe1c   :  { %1997 = vadd.xlane.f32.xlu0 %v1996_v47  ;;  %v2232_v20 = vpop.xlane.xlu1 %2231 }
 0xe1d   :  { %4078 = vpow2.f32 %v2235_v3  ;;  %v2234_v34 = vsub.f32 %v4868_v43, %v2232_v20  ;;  %v4991_v20 = vpack.c.bf16 %v4835_v10, %v4783_v46 }
 0xe1e   :  { %v4931_v22 = vpop.eup %4072 }
 0xe1f   :  { %v2237_v5 = vmul.f32 1.442695, %v2234_v34  ;;  %v1999_v6 = vsel %vm232_vm2, %v4931_v22, 0.0 }
 0xe20   :  { %v2381_v59 = vpop.xlane.xlu0 %2380  ;;  %2000 = vadd.xlane.f32.xlu1 %v1999_v6 }
 0xe21   :  { %4080 = vpow2.f32 %v2237_v5  ;;  %v2385_v38 = vsub.f32 %v4875_v53, %v2381_v59 }
 0xe22   :  { %v4936_v51 = vpop.eup %4074 }
 0xe23   :  { %v2387_v9 = vmul.f32 1.442695, %v2385_v38  ;;  %v2118_v56 = vsel %vm232_vm2, %v4936_v51, 0.0 }
 0xe24   :  { %2119 = vadd.xlane.f32.xlu0 %v2118_v56  ;;  %v2384_v32 = vpop.xlane.xlu1 %2383 }
 0xe25   :  { %4082 = vpow2.f32 %v2387_v9  ;;  %v2386_v43 = vsub.f32 %v4879_v44, %v2384_v32 }
 0xe26   :  { %v4941_v54 = vpop.eup %4076 }
 0xe27   :  { %v2389_v1 = vmul.f32 1.442695, %v2386_v43  ;;  %v2121_v14 = vsel %vm232_vm2, %v4941_v54, 0.0 }
 0xe28   :  { %v2499_v18 = vpop.xlane.xlu0 %2498  ;;  %2122 = vadd.xlane.f32.xlu1 %v2121_v14 }
 0xe29   :  { %4084 = vpow2.f32 %v2389_v1  ;;  %v2503_v53 = vsub.f32 %v4883_v4, %v2499_v18 }
 0xe2a   :  { %v4946_v19 = vpop.eup %4078 }
 0xe2b   :  { %v2505_v12 = vmul.f32 1.442695, %v2503_v53  ;;  %v2239_v13 = vsel %vm232_vm2, %v4946_v19, 0.0 }
 0xe2c   :  { %2240 = vadd.xlane.f32.xlu0 %v2239_v13  ;;  %v2502_v25 = vpop.xlane.xlu1 %2501 }
 0xe2d   :  { %4086 = vpow2.f32 %v2505_v12  ;;  %v2504_v44 = vsub.f32 %v4887_v45, %v2502_v25 }
 0xe2e   :  { %v4951_v27 = vpop.eup %4080 }
 0xe2f   :  { %v2507_v29 = vmul.f32 1.442695, %v2504_v44  ;;  %v2242_v30 = vsel %vm232_vm2, %v4951_v27, 0.0 }
 0xe30   :  { %2243 = vadd.xlane.f32.xlu1 %v2242_v30  ;;  %v2621_v21 = vpop.xlane.xlu0 %2620 }
 0xe31   :  { %4088 = vpow2.f32 %v2507_v29  ;;  %v2625_v3 = vsub.f32 %v4891_v60, %v2621_v21 }
 0xe32   :  { %v4955_v4 = vpop.eup %4082 }
 0xe33   :  { %v2391_v16 = vsel %vm232_vm2, %v4955_v4, 0.0  ;;  %v2627_v47 = vmul.f32 1.442695, %v2625_v3 }
 0xe34   :  { %2392 = vadd.xlane.f32.xlu0 %v2391_v16  ;;  %v2624_v33 = vpop.xlane.xlu1 %2623 }
 0xe35   :  { %v2626_v35 = vsub.f32 %v4895_v63, %v2624_v33 }
 0xe36   :  { %v4960_v37 = vpop.eup %4084 }
 0xe37   :  { %v2629_v45 = vmul.f32 1.442695, %v2626_v35  ;;  %v2394_v26 = vsel %vm232_vm2, %v4960_v37, 0.0 }
 0xe38   :  { %v2742_v31 = vpop.xlane.xlu0 %2741  ;;  %2395 = vadd.xlane.f32.xlu1 %v2394_v26 }
 0xe39   :  { %4090 = vpow2.f32 %v2629_v45  ;;  %v2746_v39 = vsub.f32 %v4899_v15, %v2742_v31 }
 0xe3a   :  { %v4965_v28 = vpop.eup %4086 }
 0xe3b   :  { %v2748_v50 = vmul.f32 1.442695, %v2746_v39  ;;  %v2509_v61 = vsel %vm232_vm2, %v4965_v28, 0.0 }
 0xe3c   :  { %2510 = vadd.xlane.f32.xlu1 %v2509_v61  ;;  %v2745_v24 = vpop.xlane.xlu1 %2744  ;;  %v2009_v60 = vpop.permute.xlu0 %2008 }
 0xe3d   :  { %4092 = vpow2.f32 %v2748_v50  ;;  %v2747_v63 = vsub.f32 %v4903_v8, %v2745_v24 }
 0xe3e   :  { %v4970_v7 = vpop.eup %4088 }
 0xe3f   :  { %v2750_v41 = vmul.f32 1.442695, %v2747_v63  ;;  %v2512_v23 = vsel %vm232_vm2, %v4970_v7, 0.0 }
 0xe40   :  { %2513 = vadd.xlane.f32.xlu1 %v2512_v23  ;;  %v2130_v5 = vpop.permute.xlu1 %2129 }
 0xe41   :  { %4094 = vpow2.f32 %v2750_v41 }
 0xe42   :  { %4096 = vpow2.f32 %v2627_v47 }
 0xe46   :  { %v4974_v15 = vpop.eup %4090 }
 0xe47   :  { %v2634_v57 = vsel %vm232_vm2, %v4974_v15, 0.0 }
 0xe48   :  { %2635 = vadd.xlane.f32.xlu1 %v2634_v57 }
 0xe4a   :  { %v4978_v17 = vpop.eup %4092  ;;  %2250 = vrot.lane.b32.xlu0 %v4778_v42, %s4245_s21 }
 0xe4b   :  { %v2752_v8 = vsel %vm232_vm2, %v4978_v17, 0.0 }
 0xe4c   :  { %2753 = vadd.xlane.f32.xlu1 %v2752_v8 }
 0xe4e   :  { %v4984_v58 = vpop.eup %4094 }
 0xe4f   :  { %v2755_v62 = vsel %vm232_vm2, %v4984_v58, 0.0  ;;  %v4995_v42 = vpop.eup %4096 }
 0xe50   :  { %2756 = vadd.xlane.f32.xlu1 %v2755_v62  ;;  %v2631_v34 = vsel %vm232_vm2, %v4995_v42, 0.0 }
 0xe61   :  { %2521 = vrot.lane.b32.xlu1 %v4991_v20, %s4242_s19  ;;  %s4248_s19 = smov [#allocation7]  }
 0xe69   :  { %2632 = vadd.xlane.f32.xlu0 %v2631_v34 }
 0xe7f   :  { %2642 = vrot.lane.b32.xlu0 %v4991_v20, %s4244_s0  ;;  %s3292_s0 = sshll.u32 %s4248_s19, 4  ;;  %s3293_s0 = int_to_ptr.vmem [resolvable:$true] %s3292_s0 }
 0xe80   :  { %p4213_p11 = scmp.lt.s32.totalorder %s3293_s0, %s3293_s0 }
 0xe83   :  { %2763 = vrot.lane.b32.xlu0 %v4991_v20, %s4245_s21 }
 0xe9d   :  { %v1880_v6 = vpop.xlane.xlu0 %1879 }
 0xe9e   :  { %4098 = vrcp.f32 %v1880_v6 }
 0xea1   :  { %v1883_v46 = vpop.xlane.xlu1 %1882 }
 0xea2   :  { %4100 = vrcp.f32 %v1883_v46 }
 0xea5   :  { %v1998_v10 = vpop.xlane.xlu0 %1997 }
 0xea6   :  { %4102 = vrcp.f32 %v1998_v10 }
 0xea9   :  { %v2001_v59 = vpop.xlane.xlu1 %2000 }
 0xeaa   :  { %4104 = vrcp.f32 %v2001_v59 }
 0xeab   :  { %v4099_v38 = vpop.eup %4098 }
 0xeac   :  { %v1886_v32 = vmul.f32 %v4099_v38, %v4916_v52 }
 0xead   :  { %v2120_v9 = vpop.xlane.xlu0 %2119 }
 0xeae   :  { %4106 = vrcp.f32 %v2120_v9 }
 0xeaf   :  { %v4101_v56 = vpop.eup %4100 }
 0xeb0   :  { %v1887_v43 = vmul.f32 %v4101_v56, %v4921_v55 }
 0xeb1   :  { %v2123_v1 = vpop.xlane.xlu1 %2122 }
 0xeb2   :  { %4108 = vrcp.f32 %v2123_v1  ;;  %v1888_v14 = vpack.c.bf16 %v1887_v43, %v1886_v32 }
 0xeb3   :  { %v4103_v18 = vpop.eup %4102 }
 0xeb4   :  { %3688 = vmatmul.mubr.msk.bf16.vlgmr.msra.gmra.mxu1 %vm232_vm2, %v1888_v14  ;;  %v2004_v13 = vmul.f32 %v4103_v18, %v4926_v2 }
 0xeb5   :  { %3698 = vmatpush3.bf16.msra.mxu1 %v2009_v60  ;;  %v2241_v53 = vpop.xlane.xlu0 %2240  ;;  %3699 = vmatprep.mubr.msk.bf16.mxu1 %vm4240_vm1, %v4239_v48 }
 0xeb6   :  { %3709 = vmatprep.subr.bf16.mxu1 %v4239_v48  ;;  %4110 = vrcp.f32 %v2241_v53 }
 0xeb7   :  { %v4105_v12 = vpop.eup %4104 }
 0xeb8   :  { %v2005_v52 = vmul.f32 %v4105_v12, %v4931_v22 }
 0xeb9   :  { %v2244_v55 = vpop.xlane.xlu1 %2243 }
 0xeba   :  { %4112 = vrcp.f32 %v2244_v55  ;;  %v2006_v25 = vpack.c.bf16 %v2005_v52, %v2004_v13 }
 0xebb   :  { %v4107_v44 = vpop.eup %4106 }
 0xebc   :  { %3700 = vmatmul.mubr.msk.bf16.vlgmr.msra.gmra.mxu1 %vm232_vm2, %v2006_v25  ;;  %v2126_v16 = vmul.f32 %v4107_v44, %v4936_v51 }
 0xebd   :  { %3710 = vmatpush3.bf16.msra.mxu1 %v2130_v5  ;;  %v2393_v29 = vpop.xlane.xlu0 %2392  ;;  %3711 = vmatprep.mubr.msk.bf16.mxu1 %vm4240_vm1, %v4239_v48 }
 0xebe   :  { %3721 = vmatprep.subr.bf16.mxu1 %v4239_v48  ;;  %4114 = vrcp.f32 %v2393_v29 }
 0xebf   :  { %v4109_v30 = vpop.eup %4108 }
 0xec0   :  { %v2127_v2 = vmul.f32 %v4109_v30, %v4941_v54 }
 0xec1   :  { %v2396_v22 = vpop.xlane.xlu1 %2395  ;;  %v2251_v33 = vpop.permute.xlu0 %2250 }
 0xec2   :  { %4116 = vrcp.f32 %v2396_v22  ;;  %v2128_v21 = vpack.c.bf16 %v2127_v2, %v2126_v16 }
 0xec3   :  { %v4111_v35 = vpop.eup %4110 }
 0xec4   :  { %3712 = vmatmul.mubr.msk.bf16.vlgmr.msra.gmra.mxu1 %vm232_vm2, %v2128_v21  ;;  %v2247_v31 = vmul.f32 %v4111_v35, %v4946_v19  ;;  %v3938_v21 = vld [vmem:[%s5166_s3 + $0x38] sm:$0xff]  }
 0xec5   :  { %3722 = vmatpush3.bf16.msra.mxu1 %v2251_v33  ;;  %v2511_v45 = vpop.xlane.xlu1 %2510  ;;  %3723 = vmatprep.mubr.msk.bf16.mxu1 %vm4240_vm1, %v4239_v48 }
 0xec6   :  { %3733 = vmatprep.subr.bf16.mxu1 %v4239_v48  ;;  %3775 = vmatprep.subr.bf16.mxu0 %v3938_v21 }
 0xec7   :  { %v4113_v26 = vpop.eup %4112  ;;  %3776 = vmatpush3.bf16.msra.mxu0 %v3938_v21 }
 0xec8   :  { %v2248_v51 = vmul.f32 %v4113_v26, %v4951_v27 }
 0xec9   :  { %v2514_v54 = vpop.xlane.xlu1 %2513 }
 0xeca   :  { %v2249_v39 = vpack.c.bf16 %v2248_v51, %v2247_v31  ;;  %4118 = vrcp.f32 %v2514_v54  ;;  %v3939_v51 = vld [vmem:[%s5166_s3 + $0x30] sm:$0xff]   ;;  %v3940_v54 = vld [vmem:[%s5166_s3 + $0x28] sm:$0xff]  }
 0xecb   :  { %v4115_v50 = vpop.eup %4114  ;;  %4120 = vrcp.f32 %v2511_v45  ;;  %3777 = vmatprep.subr.bf16.mxu0 %v3939_v51 }
 0xecc   :  { %3724 = vmatmul.mubr.msk.bf16.vlgmr.msra.gmra.mxu1 %vm232_vm2, %v2249_v39  ;;  %v2399_v24 = vmul.f32 %v4115_v50, %v4955_v4  ;;  %3778 = vmatpush3.bf16.msra.mxu0 %v3939_v51  ;;  %v3947_v51 = vld [vmem:[#allocation5 + $0x64] ss:$8 sps:$4 sm:$0xff]  }
 0xecd   :  { %3734 = vmatpush3.bf16.msra.mxu1 %v4991_v20  ;;  %3735 = vmatprep.mubr.msk.bf16.mxu1 %vm4240_vm1, %v4239_v48 }
 0xece   :  { %3745 = vmatprep.subr.bf16.mxu1 %v4239_v48  ;;  %3779 = vmatprep.subr.bf16.mxu0 %v3940_v54 }
 0xecf   :  { %v4117_v61 = vpop.eup %4116 }
 0xed0   :  { %v2400_v19 = vmul.f32 %v4117_v61, %v4960_v37  ;;  %3780 = vmatpush3.bf16.msra.mxu0 %v3940_v54  ;;  %v3941_v61 = vld [vmem:[%s5166_s3 + $0x20] sm:$0xff]  }
 0xed1   :  { %v2636_v27 = vpop.xlane.xlu1 %2635  ;;  %3781 = vmatprep.subr.bf16.mxu0 %v3941_v61  ;;  %v3945_v54 = vld [vmem:[#allocation5 + $0x60] ss:$8 sps:$4 sm:$0xff]  }
 0xed2   :  { %v2401_v63 = vpack.c.bf16 %v2400_v19, %v2399_v24  ;;  %4122 = vrcp.f32 %v2636_v27 }
 0xed4   :  { %3736 = vmatmul.mubr.msk.bf16.vlgmr.msra.gmra.mxu1 %vm232_vm2, %v2401_v63  ;;  %3782 = vmatpush3.bf16.msra.mxu0 %v3941_v61  ;;  %v3951_v61 = vld [vmem:[#allocation5 + $0x40] ss:$8 sps:$4 sm:$0xff]  }
 0xed5   :  { %v2754_v41 = vpop.xlane.xlu1 %2753  ;;  %3747 = vmatprep.mubr.msk.bf16.mxu1 %vm4240_vm1, %v4239_v48 }
 0xed7   :  { %v4119_v23 = vpop.eup %4118 }
 0xed8   :  { %v4121_v8 = vpop.eup %4120  ;;  %v2518_v62 = vmul.f32 %v4119_v23, %v4970_v7 }
 0xed9   :  { %v2757_v57 = vpop.xlane.xlu1 %2756  ;;  %v2517_v47 = vmul.f32 %v4121_v8, %v4965_v28 }
 0xedb   :  { %v2519_v4 = vpack.c.bf16 %v2518_v62, %v2517_v47 }
 0xedd   :  { %v2522_v3 = vpop.permute.xlu1 %2521 }
 0xede   :  { %3746 = vmatpush3.bf16.msra.mxu1 %v2522_v3 }
 0xedf   :  { %3757 = vmatprep.subr.bf16.mxu1 %v4239_v48  ;;  %v4123_v7 = vpop.eup %4122 }
 0xee0   :  { %v2640_v60 = vmul.f32 %v4123_v7, %v4974_v15 }
 0xee1   :  { %3748 = vmatmul.mubr.msk.bf16.vlgmr.msra.gmra.mxu1 %vm232_vm2, %v2519_v4 }
 0xee2   :  { %3759 = vmatprep.mubr.msk.bf16.mxu1 %vm4240_vm1, %v4239_v48 }
 0xef2   :  { %v2633_v37 = vpop.xlane.xlu0 %2632 }
 0xef3   :  { %4124 = vrcp.f32 %v2633_v37 }
 0xef4   :  { %4126 = vrcp.f32 %v2757_v57 }
 0xef5   :  { %4128 = vrcp.f32 %v2754_v41 }
 0xef6   :  { %v2643_v20 = vpop.permute.xlu0 %2642 }
 0xef7   :  { %3758 = vmatpush3.bf16.msra.mxu1 %v2643_v20 }
 0xef8   :  { %3769 = vmatprep.subr.bf16.mxu1 %v4239_v48 }
 0xefa   :  { %v2764_v46 = vpop.permute.xlu0 %2763 }
 0xf00   :  { %v4125_v28 = vpop.eup %4124 }
 0xf01   :  { %v2639_v34 = vmul.f32 %v4125_v28, %v4995_v42  ;;  %v4127_v6 = vpop.eup %4126 }
 0xf02   :  { %v4129_v10 = vpop.eup %4128  ;;  %v2761_v59 = vmul.f32 %v4127_v6, %v4984_v58 }
 0xf03   :  { %v2641_v5 = vpack.c.bf16 %v2640_v60, %v2639_v34  ;;  %v2760_v38 = vmul.f32 %v4129_v10, %v4978_v17 }
 0xf05   :  { %3760 = vmatmul.mubr.msk.bf16.vlgmr.msra.gmra.mxu1 %vm232_vm2, %v2641_v5  ;;  %v2762_v9 = vpack.c.bf16 %v2761_v59, %v2760_v38 }
 0xf06   :  { %3770 = vmatpush3.bf16.msra.mxu1 %v2764_v46  ;;  %3771 = vmatprep.mubr.msk.bf16.mxu1 %vm4240_vm1, %v4239_v48 }
 0xf0d   :  { %3772 = vmatmul.mubr.msk.bf16.vlgmr.msra.gmra.mxu1 %vm232_vm2, %v2762_v9 }
 0xf0e   :  { %3067 = vmatprep.mubr.bf16.mxu1 %v4238_v11 }
 0xf74   :  { %v5049_v15 = vpop.f32.mrf.mxu1 }
 0xf76   :  { %v3689_v42 = vpop.f32.mrf.mxu1 }
 0xf78   :  { %v1929_v56 = vpop.f32.mrf.mxu1 }
 0xf7a   :  { %v3690_v32 = vpop.f32.mrf.mxu1 }
 0xf7c   :  { %v2048_v43 = vpop.f32.mrf.mxu1 }
 0xf7e   :  { %v3701_v1 = vpop.f32.mrf.mxu1 }
 0xf80   :  { %v2051_v14 = vpop.f32.mrf.mxu1 }
 0xf81   :  { %v3860_v18 = vpack.i.bf16 %v2051_v14, %v2048_v43 }
 0xf82   :  { %v3702_v53 = vpop.f32.mrf.mxu1 }
 0xf83   :  { %3861 = vrot.lane.b32.xlu0 %v3860_v18, %s4247_s22 }
 0xf84   :  { %v2169_v48 = vpop.f32.mrf.mxu1 }
 0xf86   :  { %v3713_v58 = vpop.f32.mrf.mxu1 }
 0xf88   :  { %v2172_v17 = vpop.f32.mrf.mxu1 }
 0xf89   :  { %v3865_v12 = vpack.i.bf16 %v2172_v17, %v2169_v48 }
 0xf8a   :  { %v3714_v13 = vpop.f32.mrf.mxu1 }
 0xf8b   :  { %3866 = vrot.lane.b32.xlu1 %v3865_v12, %s4243_s20 }
 0xf8c   :  { %v2290_v52 = vpop.f32.mrf.mxu1 }
 0xf8e   :  { %v3725_v55 = vpop.f32.mrf.mxu1 }
 0xf90   :  { %v2293_v25 = vpop.f32.mrf.mxu1 }
 0xf91   :  { %v3870_v44 = vpack.i.bf16 %v2293_v25, %v2290_v52 }
 0xf92   :  { %v3726_v29 = vpop.f32.mrf.mxu1 }
 0xf93   :  { %3871 = vrot.lane.b32.xlu1 %v3870_v44, %s4246_s4 }
 0xf94   :  { %v2439_v30 = vpop.f32.mrf.mxu1 }
 0xf96   :  { %v3737_v16 = vpop.f32.mrf.mxu1 }
 0xf98   :  { %v2442_v2 = vpop.f32.mrf.mxu1 }
 0xf9a   :  { %v3738_v22 = vpop.f32.mrf.mxu1 }
 0xfa1   :  { %v2561_v33 = vpop.f32.mrf.mxu1 }
 0xfa3   :  { %v3749_v35 = vpop.f32.mrf.mxu1 }
 0xfa5   :  { %v2564_v45 = vpop.f32.mrf.mxu1 }
 0xfa6   :  { %v3875_v26 = vpack.i.bf16 %v2564_v45, %v2561_v33 }
 0xfa7   :  { %v3750_v31 = vpop.f32.mrf.mxu1 }
 0xfa8   :  { %3876 = vrot.lane.b32.xlu0 %v3875_v26, %s4247_s22  ;;  %v3944_v26 = vld [vmem:[#allocation5 + $0x74] ss:$8 sps:$4 sm:$0xff]   ;;  %v3942_v31 = vld [vmem:[#allocation5 + $0x70] ss:$8 sps:$4 sm:$0xff]  }
 0xfa9   :  { %3043 = vmatprep.subr.bf16.mxu1 %v3944_v26 }
 0xfaa   :  { %3044 = vmatpush1.bf16.msra.mxu1 %v3942_v31 }
 0xfab   :  { %3045 = vmatprep.subr.bf16.mxu1 %v3947_v51 }
 0xfae   :  { %3046 = vmatpush1.bf16.msra.mxu1 %v3945_v54 }
 0xfc5   :  { %v2682_v39 = vpop.f32.mrf.mxu1 }
 0xfc7   :  { %v3761_v50 = vpop.f32.mrf.mxu1 }
 0xfc8   :  { %v3948_v50 = vld [vmem:[#allocation5 + $0x50] ss:$8 sps:$4 sm:$0xff]  }
 0xfc9   :  { %v2685_v24 = vpop.f32.mrf.mxu1 }
 0xfca   :  { %v3880_v19 = vpack.i.bf16 %v2685_v24, %v2682_v39  ;;  %v3950_v39 = vld [vmem:[#allocation5 + $0x54] ss:$8 sps:$4 sm:$0xff]   ;;  %v3953_v24 = vld [vmem:[#allocation5 + $0x44] ss:$8 sps:$4 sm:$0xff]  }
 0xfcb   :  { %v3762_v27 = vpop.f32.mrf.mxu1  ;;  %3047 = vmatprep.subr.bf16.mxu1 %v3950_v39 }
 0xfcc   :  { %3881 = vrot.lane.b32.xlu0 %v3880_v19, %s4243_s20  ;;  %3048 = vmatpush1.bf16.msra.mxu1 %v3948_v50 }
 0xfcd   :  { %v2803_v63 = vpop.f32.mrf.mxu1  ;;  %3049 = vmatprep.subr.bf16.mxu1 %v3953_v24 }
 0xfcf   :  { %v3773_v41 = vpop.f32.mrf.mxu1 }
 0xfd0   :  { %3050 = vmatpush1.bf16.msra.mxu1 %v3951_v61 }
 0xfd1   :  { %v2806_v23 = vpop.f32.mrf.mxu1 }
 0xfd2   :  { %v3885_v57 = vpack.i.bf16 %v2806_v23, %v2803_v63 }
 0xfd3   :  { %v3774_v8 = vpop.f32.mrf.mxu1 }
 0xfd4   :  { %3886 = vrot.lane.b32.xlu1 %v3885_v57, %s4246_s4 }
 0xff5   :  { %v3862_v62 = vpop.permute.xlu0 %3861 }
 0xff6   :  { %v3864_v47 = vunpack.i.h.bf16 %v3862_v62  ;;  %v3863_v4 = vunpack.i.l.bf16 %v3862_v62 }
 0xff8   :  { %v2322_v28 = vsel %vm232_vm2, %v1929_v56, %v3864_v47  ;;  %v2321_v34 = vsel %vm232_vm2, %v5049_v15, %v3863_v4 }
 0xffd   :  { %v3867_v3 = vpop.permute.xlu1 %3866 }
 0xffe   :  { %v3869_v37 = vunpack.i.h.bf16 %v3867_v3  ;;  %v3868_v20 = vunpack.i.l.bf16 %v3867_v3 }
0x1000   :  { %v2324_v6 = vsel %vm737_vm3, %v2322_v28, %v3869_v37  ;;  %v2323_v46 = vsel %vm737_vm3, %v2321_v34, %v3868_v20  ;;  %v3415_v34 = vld [vmem:[%s5170_s7 + $0x1] ss:$0 sm:$0xff] }
0x1005   :  { %v3872_v7 = vpop.permute.xlu1 %3871 }
0x1006   :  { %v3874_v60 = vunpack.i.h.bf16 %v3872_v7  ;;  %v3873_v5 = vunpack.i.l.bf16 %v3872_v7 }
0x1008   :  { %v2325_v10 = vsel %vm740_vm4, %v2323_v46, %v3873_v5  ;;  %v2326_v59 = vsel %vm740_vm4, %v2324_v6, %v3874_v60 }
0x1009   :  { %v2840_v38 = vpack.c.bf16 %v2326_v59, %v2325_v10 }
0x100b   :  { %3783 = vmatprep.mubr.msk.bf16.mxu0 %vm70_vm0, %v2840_v38 }
0x101a   :  { %v3877_v9 = vpop.permute.xlu0 %3876 }
0x101b   :  { %v3879_v32 = vunpack.i.h.bf16 %v3877_v9  ;;  %v3878_v56 = vunpack.i.l.bf16 %v3877_v9 }
0x101d   :  { %v2835_v14 = vsel %vm232_vm2, %v2442_v2, %v3879_v32  ;;  %v2834_v18 = vsel %vm232_vm2, %v2439_v30, %v3878_v56 }
0x103e   :  { %v3882_v42 = vpop.permute.xlu0 %3881 }
0x103f   :  { %v3884_v43 = vunpack.i.h.bf16 %v3882_v42  ;;  %v3883_v1 = vunpack.i.l.bf16 %v3882_v42 }
0x1041   :  { %v2837_v58 = vsel %vm737_vm3, %v2835_v14, %v3884_v43  ;;  %v2836_v17 = vsel %vm737_vm3, %v2834_v18, %v3883_v1  ;;  %v3954_v43 = vld [vmem:[%s5168_s5 + $0x78] sm:$0xff]   ;;  %v3955_v1 = vld [vmem:[%s5168_s5 + $0x70] sm:$0xff]  }
0x1042   :  { %3787 = vmatprep.subr.bf16.mxu0 %v3954_v43  ;;  %v3958_v14 = vld [vmem:[%s5168_s5 + $0x58] sm:$0xff]   ;;  %v3959_v18 = vld [vmem:[%s5168_s5 + $0x50] sm:$0xff]  }
0x1046   :  { %v3887_v15 = vpop.permute.xlu1 %3886 }
0x1047   :  { %v3889_v53 = vunpack.i.h.bf16 %v3887_v15  ;;  %v3888_v48 = vunpack.i.l.bf16 %v3887_v15  ;;  %v3957_v15 = vld [vmem:[%s5168_s5 + $0x60] sm:$0xff]  }
0x1049   :  { %v2839_v12 = vsel %vm740_vm4, %v2837_v58, %v3889_v53  ;;  %v2838_v13 = vsel %vm740_vm4, %v2836_v17, %v3888_v48  ;;  %v3960_v53 = vld [vmem:[%s5168_s5 + $0x48] sm:$0xff]   ;;  %v3961_v48 = vld [vmem:[%s5168_s5 + $0x40] sm:$0xff]  }
0x104a   :  { %v2841_v52 = vpack.c.bf16 %v2839_v12, %v2838_v13 }
0x104c   :  { %3784 = vmatmul.mubr.msk.bf16.vlgmr.msra.gmra.mxu0 %vm70_vm0, %v2841_v52 }
0x104d   :  { %3788 = vmatpush3.bf16.msra.mxu0 %v3954_v43 }
0x104e   :  { %3789 = vmatprep.subr.bf16.mxu0 %v3955_v1 }
0x1051   :  { %3790 = vmatpush3.bf16.msra.mxu0 %v3955_v1 }
0x110c   :  { %v3785_v55 = vpop.f32.mrf.mxu0 }
0x110d   :  { %v5085_v44 = vadd.f32 %v3785_v55, %v4718_v36 }
0x110e   :  { %v2915_v25 = vpop.f32.mrf.mxu0 }
0x110f   :  { %v5088_v29 = vadd.f32 %v2915_v25, %v4721_v49  ;;  %v2936_v36 = vmul.f32 %v5085_v44, %v5085_v44 }
0x1110   :  { %v3786_v30 = vpop.f32.mrf.mxu0 }
0x1111   :  { %v2934_v16 = vmul.f32 %v5088_v29, %v5088_v29  ;;  %v5093_v22 = vadd.f32 %v3786_v30, %v4726_v40  ;;  %v2944_v35 = vsel %vm70_vm0, %v2936_v36, 0.0 }
0x1112   :  { %v2918_v2 = vpop.f32.mrf.mxu0 }
0x1113   :  { %v5096_v21 = vadd.f32 %v2918_v2, %v4729_v0  ;;  %v2938_v33 = vsel %vm70_vm0, %v2934_v16, 0.0  ;;  %v2937_v40 = vmul.f32 %v5093_v22, %v5093_v22 }
0x1114   :  { %2939 = vadd.xlane.f32.xlu0 %v2938_v33 }
0x1115   :  { %v2935_v49 = vmul.f32 %v5096_v21, %v5096_v21  ;;  %v2947_v0 = vsel %vm70_vm0, %v2937_v40, 0.0 }
0x1117   :  { %v2941_v45 = vsel %vm70_vm0, %v2935_v49, 0.0 }
0x1118   :  { %2945 = vadd.xlane.f32.xlu0 %v2944_v35  ;;  %2942 = vadd.xlane.f32.xlu1 %v2941_v45 }
0x111c   :  { %2948 = vadd.xlane.f32.xlu0 %v2947_v0 }
0x119d   :  { %v2940_v19 = vpop.xlane.xlu0 %2939 }
0x119e   :  { %v2950_v27 = vmul.f32 0.015625, %v2940_v19 }
0x11a0   :  { %v2954_v63 = vadd.f32 1e-06, %v2950_v27 }
0x11a1   :  { %v2946_v41 = vpop.xlane.xlu0 %2945  ;;  %v2943_v23 = vpop.xlane.xlu1 %2942 }
0x11a2   :  { %v2951_v57 = vmul.f32 0.015625, %v2943_v23  ;;  %4130 = vrsqrt.f32 %v2954_v63  ;;  %v2952_v8 = vmul.f32 0.015625, %v2946_v41 }
0x11a4   :  { %v2955_v62 = vadd.f32 1e-06, %v2951_v57  ;;  %v2956_v4 = vadd.f32 1e-06, %v2952_v8 }
0x11a5   :  { %v2949_v3 = vpop.xlane.xlu0 %2948 }
0x11a6   :  { %v2953_v47 = vmul.f32 0.015625, %v2949_v3  ;;  %4132 = vrsqrt.f32 %v2955_v62 }
0x11a8   :  { %v2957_v37 = vadd.f32 1e-06, %v2953_v47 }
0x11aa   :  { %4134 = vrsqrt.f32 %v2957_v37 }
0x11ab   :  { %4136 = vrsqrt.f32 %v2956_v4 }
0x11af   :  { %v4131_v20 = vpop.eup %4130 }
0x11b0   :  { %v2962_v7 = vmul.f32 %v4131_v20, %v5088_v29 }
0x11b2   :  { %v2974_v6 = vmul.f32 %v3415_v34, %v2962_v7 }
0x11b3   :  { %v4133_v28 = vpop.eup %4132 }
0x11b4   :  { %v2963_v60 = vmul.f32 %v4133_v28, %v5096_v21 }
0x11b6   :  { %v2975_v46 = vmul.f32 %v3415_v34, %v2963_v60 }
0x11b7   :  { %v4135_v5 = vpop.eup %4134 }
0x11b8   :  { %v4137_v10 = vpop.eup %4136  ;;  %v2978_v59 = vpack.c.bf16 %v2975_v46, %v2974_v6  ;;  %v2965_v38 = vmul.f32 %v4135_v5, %v5093_v22 }
0x11b9   :  { %v2964_v9 = vmul.f32 %v4137_v10, %v5085_v44 }
0x11ba   :  { %3424 = vmatmul.mubr.msk.bf16.vlgmr.msra.gmra.mxu1 %vm70_vm0, %v2978_v59  ;;  %v2977_v42 = vmul.f32 %v3415_v34, %v2965_v38 }
0x11bb   :  { %3077 = vmatprep.mubr.bf16.mxu1 %v4238_v11  ;;  %v2976_v32 = vmul.f32 %v3415_v34, %v2964_v9  ;;  %v3956_v11 = vld [vmem:[%s5168_s5 + $0x68] sm:$0xff]  }
0x11bc   :  { %3791 = vmatprep.subr.bf16.mxu0 %v3956_v11 }
0x11bd   :  { %v2979_v56 = vpack.c.bf16 %v2977_v42, %v2976_v32  ;;  %3792 = vmatpush3.bf16.msra.mxu0 %v3956_v11 }
0x11be   :  { %3793 = vmatprep.subr.bf16.mxu0 %v3957_v15 }
0x11c1   :  { %3794 = vmatpush3.bf16.msra.mxu0 %v3957_v15 }
0x11c2   :  { %3425 = vmatmul.mubr.msk.bf16.gmra.mxu1 %vm70_vm0, %v2979_v56  ;;  %3795 = vmatprep.subr.bf16.mxu0 %v3958_v14 }
0x11c5   :  { %3796 = vmatpush3.bf16.msra.mxu0 %v3958_v14 }
0x11c6   :  { %3797 = vmatprep.subr.bf16.mxu0 %v3959_v18 }
0x11c9   :  { %3798 = vmatpush3.bf16.msra.mxu0 %v3959_v18 }
0x11ca   :  { %3799 = vmatprep.subr.bf16.mxu0 %v3960_v53 }
0x11cd   :  { %3800 = vmatpush3.bf16.msra.mxu0 %v3960_v53 }
0x11ce   :  { %3801 = vmatprep.subr.bf16.mxu0 %v3961_v48 }
0x11d1   :  { %3802 = vmatpush3.bf16.msra.mxu0 %v3961_v48  ;;  %v3454_v48 = vld [vmem:[%s5171_s8] ss:$0 sm:$0xff]  ;;  %s4208_s8 = scalar_lea.vmem %s3293_s0, 512 }
0x11d2   :  { %p4209_p10 = scmp.ne.s32.totalorder %s3293_s0, %s4208_s8  ;;  %p4214_p12 = scmp.lt.s32.totalorder %s4208_s8, %s4208_s8 }
0x11d4   :  { %p4215_p13 = por %p4214_p12, %p4213_p11 }
0x11d6   :  { %p4216_p0 = pnand %p4215_p13, %p4209_p10 }
0x127a   :  { %v3069_v58 = vpop.f32.mrf.mxu1 }
0x127b   :  { %v3426_v17 = vmul.f32 -1.442695, %v3069_v58 }
0x127c   :  { %v3071_v12 = vpop.f32.mrf.mxu1 }
0x127d   :  { %4138 = vpow2.f32 %v3426_v17 }
0x127e   :  { %v3073_v13 = vpop.f32.mrf.mxu1 }
0x127f   :  { %v3427_v52 = vmul.f32 -1.442695, %v3073_v13 }
0x1280   :  { %v3075_v55 = vpop.f32.mrf.mxu1 }
0x1281   :  { %4140 = vpow2.f32 %v3427_v52 }
0x1282   :  { %v3079_v25 = vpop.f32.mrf.mxu1 }
0x1283   :  { %v3428_v30 = vmul.f32 -1.442695, %v3079_v25 }
0x1284   :  { %v3081_v16 = vpop.f32.mrf.mxu1 }
0x1285   :  { %4142 = vpow2.f32 %v3428_v30 }
0x1286   :  { %v3083_v2 = vpop.f32.mrf.mxu1 }
0x1287   :  { %v3429_v33 = vmul.f32 -1.442695, %v3083_v2 }
0x1288   :  { %v3085_v57 = vpop.f32.mrf.mxu1 }
0x1289   :  { %4144 = vpow2.f32 %v3429_v33 }
0x128a   :  { %v4139_v36 = vpop.eup %4138 }
0x128b   :  { %v3100_v49 = vadd.f32 1.0, %v4139_v36 }
0x128d   :  { %4146 = vrcp.f32 %v3100_v49 }
0x128e   :  { %v4141_v35 = vpop.eup %4140 }
0x128f   :  { %v3101_v45 = vadd.f32 1.0, %v4141_v35 }
0x1291   :  { %4148 = vrcp.f32 %v3101_v45 }
0x1292   :  { %v4143_v40 = vpop.eup %4142 }
0x1293   :  { %v3102_v0 = vadd.f32 1.0, %v4143_v40 }
0x1295   :  { %4150 = vrcp.f32 %v3102_v0 }
0x1296   :  { %v4145_v26 = vpop.eup %4144 }
0x1297   :  { %v3103_v31 = vadd.f32 1.0, %v4145_v26 }
0x1299   :  { %4152 = vrcp.f32 %v3103_v31 }
0x129a   :  { %v4147_v51 = vpop.eup %4146 }
0x129b   :  { %v3112_v54 = vmul.f32 %v4147_v51, %v3069_v58 }
0x129d   :  { %v3116_v61 = vmul.f32 %v3112_v54, %v3071_v12 }
0x129e   :  { %v4149_v39 = vpop.eup %4148 }
0x129f   :  { %v3113_v50 = vmul.f32 %v4149_v39, %v3073_v13 }
0x12a1   :  { %v3117_v24 = vmul.f32 %v3113_v50, %v3075_v55 }
0x12a2   :  { %v4151_v19 = vpop.eup %4150 }
0x12a3   :  { %v3120_v27 = vpack.c.bf16 %v3117_v24, %v3116_v61  ;;  %v3114_v63 = vmul.f32 %v4151_v19, %v3079_v25 }
0x12a5   :  { %3803 = vmatprep.mubr.bf16.mxu0 %v3120_v27  ;;  %v3118_v8 = vmul.f32 %v3114_v63, %v3081_v16 }
0x12a6   :  { %v4153_v41 = vpop.eup %4152 }
0x12a7   :  { %v3115_v23 = vmul.f32 %v4153_v41, %v3083_v2 }
0x12a9   :  { %v3119_v62 = vmul.f32 %v3115_v23, %v3085_v57 }
0x12ab   :  { %v3121_v3 = vpack.c.bf16 %v3119_v62, %v3118_v8 }
0x12ad   :  { %3804 = vmatmul.mubr.bf16.vlgmr.msra.gmra.mxu0 %v3121_v3 }
0x136d   :  { %v3805_v47 = vpop.f32.mrf.mxu0 }
0x136e   :  { %v3238_v37 = vadd.f32 %v3805_v47, %v5085_v44 }
0x136f   :  { %v3221_v4 = vpop.f32.mrf.mxu0 }
0x1370   :  { %v3236_v20 = vadd.f32 %v3221_v4, %v5088_v29  ;;  %v3242_v60 = vmul.f32 %v3238_v37, %v3238_v37 }
0x1371   :  { %v3806_v7 = vpop.f32.mrf.mxu0 }
0x1372   :  { %v3240_v28 = vmul.f32 %v3236_v20, %v3236_v20  ;;  %v3239_v5 = vadd.f32 %v3806_v7, %v5093_v22  ;;  %v3250_v38 = vsel %vm70_vm0, %v3242_v60, 0.0 }
0x1373   :  { %v3224_v34 = vpop.f32.mrf.mxu0 }
0x1374   :  { %v3237_v6 = vadd.f32 %v3224_v34, %v5096_v21  ;;  %v3244_v46 = vsel %vm70_vm0, %v3240_v28, 0.0  ;;  %v3243_v59 = vmul.f32 %v3239_v5, %v3239_v5 }
0x1375   :  { %3245 = vadd.xlane.f32.xlu0 %v3244_v46 }
0x1376   :  { %v3241_v10 = vmul.f32 %v3237_v6, %v3237_v6  ;;  %v3253_v44 = vsel %vm70_vm0, %v3243_v59, 0.0 }
0x1378   :  { %v3247_v9 = vsel %vm70_vm0, %v3241_v10, 0.0 }
0x1379   :  { %3251 = vadd.xlane.f32.xlu0 %v3250_v38  ;;  %3248 = vadd.xlane.f32.xlu1 %v3247_v9 }
0x137d   :  { %3254 = vadd.xlane.f32.xlu1 %v3253_v44 }
0x13fe   :  { %v3246_v29 = vpop.xlane.xlu0 %3245 }
0x13ff   :  { %v3256_v42 = vmul.f32 0.015625, %v3246_v29 }
0x1401   :  { %v3260_v32 = vadd.f32 1e-06, %v3256_v42 }
0x1402   :  { %v3252_v22 = vpop.xlane.xlu0 %3251  ;;  %v3249_v56 = vpop.xlane.xlu1 %3248 }
0x1403   :  { %4154 = vrsqrt.f32 %v3260_v32  ;;  %v3258_v21 = vmul.f32 0.015625, %v3252_v22  ;;  %v3257_v43 = vmul.f32 0.015625, %v3249_v56 }
0x1405   :  { %v3262_v1 = vadd.f32 1e-06, %v3258_v21  ;;  %v3261_v11 = vadd.f32 1e-06, %v3257_v43 }
0x1406   :  { %v3255_v15 = vpop.xlane.xlu1 %3254 }
0x1407   :  { %4156 = vrsqrt.f32 %v3262_v1  ;;  %v3259_v14 = vmul.f32 0.015625, %v3255_v15 }
0x1408   :  { %4158 = vrsqrt.f32 %v3261_v11 }
0x1409   :  { %v3263_v18 = vadd.f32 1e-06, %v3259_v14 }
0x140b   :  { %4160 = vrsqrt.f32 %v3263_v18 }
0x1410   :  { %v4155_v53 = vpop.eup %4154 }
0x1411   :  { %v3268_v58 = vmul.f32 %v4155_v53, %v3236_v20 }
0x1413   :  { %v3279_v17 = vmul.f32 %v3454_v48, %v3268_v58 }
0x1414   :  { %v4157_v12 = vpop.eup %4156 }
0x1415   :  { %v4159_v13 = vpop.eup %4158  ;;  %v3270_v52 = vmul.f32 %v4157_v12, %v3238_v37  ;;  %3283 = vst.msk [vmem:[#allocation7] sm:$0xff] %vm70_vm0, %v3279_v17 }
0x1416   :  { %v3269_v55 = vmul.f32 %v4159_v13, %v3237_v6 }
0x1417   :  { %v3281_v25 = vmul.f32 %v3454_v48, %v3270_v52 }
0x1418   :  { %v4161_v30 = vpop.eup %4160  ;;  %v3280_v16 = vmul.f32 %v3454_v48, %v3269_v55 }
0x1419   :  { %v3271_v2 = vmul.f32 %v4161_v30, %v3239_v5  ;;  %3285 = vst.msk [vmem:[#allocation7 + $0x10] sm:$0xff] %vm70_vm0, %v3281_v25 }
0x141a   :  { %3284 = vst.msk [vmem:[#allocation7 + $0x8] sm:$0xff] %vm70_vm0, %v3280_v16 }
0x141b   :  { %v3282_v33 = vmul.f32 %v3454_v48, %v3271_v2 }
0x141d   :  { %3286 = vst.msk [vmem:[#allocation7 + $0x18] sm:$0xff] %vm70_vm0, %v3282_v33 }
0x141e   :  { %4219 = shalt.err (!%p4216_p0)
}
0x141f   :  { %3298 = dma.vmem_to_hbm [thread:$0]  %s3293_s0, 512, %s5172_s9, [#allocation4], %s4235_s12, %s4235_s12, %s4236_s13  }
0x1420   :  { %4232 = dma.done.wait [#allocation4], 512  }
0x1421   :  { %4233 = vsyncadd [#allocation4], 4294966784 }
0x1422   :  { %3302 = vsyncpa [#allocation3], 1 }
0x1423   :  { %3303 = vsyncpa [#allocation6], 1 }
0x1424   :  { %3304 = vsyncpa [#allocation4], 1 }

</bundles_post_ra>
